<compile_context>
chip_gen: v7x
topology: tpu7x:2x2x1
jax: 0.10.0
libtpu: 0.0.40
codegen_flags: <defaults>
</compile_context>

<pallas_src>
import functools

import jax
import jax.numpy as jnp
from jax.experimental import pallas as pl
from jax.experimental.pallas import tpu as pltpu


# -----------------------------------------------------------------------------
# Kernel 1: fused path encoder
#   for each window size h: Conv1d(E1->E1, k=h) -> ReLU -> MaxPool1d(P-h+1)
#   then concat over windows and apply path_linear (len(ws)*E1 -> E1).
# -----------------------------------------------------------------------------
def _path_conv_kernel(window_sizes, path_len, emb, x_ref, *rest):
    out_ref = rest[-1]
    nw = len(window_sizes)
    conv_refs = rest[: 2 * nw]
    wl_ref, bl_ref = rest[2 * nw], rest[2 * nw + 1]

    x = x_ref[...]                                   # (tbs, P, E1) bf16 (MXU operands stay bf16)
    tbs = x.shape[0]
    feats = []
    for wi, h in enumerate(window_sizes):
        w_ref = conv_refs[2 * wi]                    # (h*E1, E1) bf16, im2col layout
        b_ref = conv_refs[2 * wi + 1]                # (1, E1)    f32
        L = path_len - h + 1
        # im2col over taps: one matmul with an h*E1-deep contraction instead of
        # h tiny E1-deep matmuls + VPU accumulates.
        xw = jnp.concatenate([x[:, k:k + L, :] for k in range(h)], axis=-1)   # (tbs, L, h*E1)
        acc = jnp.dot(xw.reshape(tbs * L, h * emb), w_ref[...],
                      preferred_element_type=jnp.float32)                      # (tbs*L, E1) f32
        acc = jnp.maximum(acc + b_ref[...], 0.0)                               # bias + ReLU
        feats.append(jnp.max(acc.reshape(tbs, L, emb), axis=1))                # MaxPool over L
    f = jnp.concatenate(feats, axis=-1).astype(jnp.bfloat16)                   # (tbs, nw*E1)
    out = jnp.dot(f, wl_ref[...], preferred_element_type=jnp.float32) + bl_ref[...]
    # Store transposed: the (large) row axis maps to lanes -> lane-dense stores.
    out_ref[...] = out.T.astype(out_ref.dtype)                                 # (E1, tbs)


def _choose_row_tile(bs):
    # Prefer >=2 'parallel' grid steps (v7x has 2 TensorCores) with 128-row-multiple
    # tiles (lane-dense transposed output blocks).  Fall back to one full block for
    # small inputs.
    if bs >= 256:
        for cand in (1024, 512, 256, 128):
            if bs // cand >= 2:
                return cand
    return bs


def path_conv_encode(x, conv_w, conv_b, wl, bl, window_sizes):
    BS, P, E1 = x.shape
    tbs = _choose_row_tile(BS)
    pad = (-BS) % tbs
    if pad:                                          # pad rows instead of asserting divisibility
        x = jnp.concatenate([x, jnp.zeros((pad, P, E1), x.dtype)], axis=0)
    BSp = BS + pad
    grid = (BSp // tbs,)

    in_specs = [pl.BlockSpec((tbs, P, E1), lambda i: (i, 0, 0))]
    inputs = [x]
    for w, b in zip(conv_w, conv_b):
        in_specs.append(pl.BlockSpec(w.shape, lambda i: (0, 0)))
        inputs.append(w)
        in_specs.append(pl.BlockSpec(b.shape, lambda i: (0, 0)))
        inputs.append(b)
    in_specs.append(pl.BlockSpec(wl.shape, lambda i: (0, 0)))
    inputs.append(wl)
    in_specs.append(pl.BlockSpec(bl.shape, lambda i: (0, 0)))
    inputs.append(bl)

    kernel = functools.partial(_path_conv_kernel, tuple(window_sizes), P, E1)
    out_t = pl.pallas_call(
        kernel,
        out_shape=jax.ShapeDtypeStruct((E1, BSp), jnp.bfloat16),
        grid=grid,
        in_specs=in_specs,
        out_specs=pl.BlockSpec((E1, tbs), lambda i: (0, i)),
        compiler_params=pltpu.CompilerParams(dimension_semantics=("parallel",)),
    )(*inputs)
    return out_t.T[:BS]                              # (BS, E1); transpose back is XLA plumbing


# -----------------------------------------------------------------------------
# Kernel 2: the whole TransformerEncoder stack in ONE pallas_call
#   grid = (nlayers,) "arbitrary"; weights stacked along the layer axis;
#   the (S*B, E) activation lives in the resident output block across layers.
# -----------------------------------------------------------------------------
def _layer_norm(x, g, b, eps=1e-5):
    mu = jnp.mean(x, axis=-1, keepdims=True)
    xc = x - mu
    var = jnp.mean(xc * xc, axis=-1, keepdims=True)
    return xc * jax.lax.rsqrt(var + eps) * g + b


def _transformer_stack_kernel(nhead, S, B,
                              x_ref, wqkv_ref, bqkv_ref, wo_ref, bo_ref,
                              w1_ref, b1_ref, w2_ref, b2_ref,
                              g1_ref, be1_ref, g2_ref, be2_ref, out_ref):
    layer = pl.program_id(0)
    N, E = out_ref.shape                             # N = S*B (s-major, b-minor)
    Dh = E // nhead
    scale = 1.0 / float(Dh) ** 0.5

    @pl.when(layer == 0)
    def _():
        out_ref[...] = x_ref[...]                    # seed the resident activation

    x = out_ref[...]                                 # (N, E) bf16
    x_f32 = x.astype(jnp.float32)

    # ---- self-attention (all heads in one batched contraction) ---------------
    qkv = jnp.dot(x, wqkv_ref[0], preferred_element_type=jnp.float32)          # (N, 3E) f32
    qkv = (qkv + bqkv_ref[0]).astype(jnp.bfloat16)
    q = qkv[:, 0 * E:1 * E].reshape(S, B * nhead, Dh)
    k = qkv[:, 1 * E:2 * E].reshape(S, B * nhead, Dh)
    v = qkv[:, 2 * E:3 * E].reshape(S, B * nhead, Dh)

    sc = jnp.einsum("snd,tnd->nst", q, k, preferred_element_type=jnp.float32) * scale
    sc = sc - jnp.max(sc, axis=-1, keepdims=True)
    p = jnp.exp(sc)
    p = p * pl.reciprocal(jnp.sum(p, axis=-1, keepdims=True), approx=True)     # EUP, not VALU
    ctx = jnp.einsum("nst,tnd->snd", p.astype(jnp.bfloat16), v,
                     preferred_element_type=jnp.float32)                        # (S, B*H, Dh)
    attn = jnp.dot(ctx.reshape(N, E).astype(jnp.bfloat16), wo_ref[0],
                   preferred_element_type=jnp.float32) + bo_ref[0]

    # ---- post-norm residual blocks (f32 elementwise, bf16 GEMM operands) ------
    y = _layer_norm(x_f32 + attn, g1_ref[0], be1_ref[0])
    ff = jnp.dot(y.astype(jnp.bfloat16), w1_ref[0],
                 preferred_element_type=jnp.float32) + b1_ref[0]
    ff = jnp.maximum(ff, 0.0)
    ff = jnp.dot(ff.astype(jnp.bfloat16), w2_ref[0],
                 preferred_element_type=jnp.float32) + b2_ref[0]
    z = _layer_norm(y + ff, g2_ref[0], be2_ref[0])
    out_ref[...] = z.astype(out_ref.dtype)


def transformer_stack(src, tp, nhead, S, B):
    # TODO(synk): for realistic S*B/E/nhid, add a second (query-block) grid axis with
    # BlockSpecs instead of keeping the whole activation resident.
    N, E = src.shape
    nlayers = tp["wqkv"].shape[0]
    names = ["wqkv", "bqkv", "wo", "bo", "w1", "b1", "w2", "b2",
             "g1", "be1", "g2", "be2"]
    args = [src] + [tp[n] for n in names]
    in_specs = [pl.BlockSpec((N, E), lambda l: (0, 0))]
    for n in names:
        a = tp[n]                                    # (nlayers, d0, d1)
        in_specs.append(pl.BlockSpec((1,) + a.shape[1:], lambda l: (l, 0, 0)))
    return pl.pallas_call(
        functools.partial(_transformer_stack_kernel, nhead, S, B),
        out_shape=jax.ShapeDtypeStruct((N, E), src.dtype),
        grid=(nlayers,),
        in_specs=in_specs,
        out_specs=pl.BlockSpec((N, E), lambda l: (0, 0)),
        compiler_params=pltpu.CompilerParams(
            dimension_semantics=("arbitrary",),          # layers are sequential
            vmem_limit_bytes=32 * 1024 * 1024),          # explicit VMEM budget
    )(*args)


# -----------------------------------------------------------------------------
# Parameter construction (deterministic, synthetic) + forward pass
# -----------------------------------------------------------------------------
def init_params(key, ntokens, ncls, emsizes, nhead, nhid, nlayers, window_sizes):
    E0, E1 = emsizes
    E = E0 + E1
    keys = iter(jax.random.split(key, 256))
    bf = jnp.bfloat16

    def nrm(shape, s=0.02, dtype=jnp.float32):
        return (s * jax.random.normal(next(keys), shape)).astype(dtype)

    def stk(shape, dtype=jnp.float32):
        return jnp.stack([nrm(shape, dtype=dtype) for _ in range(nlayers)], axis=0)

    params = {
        "emb0": nrm((ntokens[0], E0), dtype=bf),
        "emb1": nrm((ntokens[1], E1), dtype=bf),
        # NOTE: conv weights are stored in im2col layout (k*in, out).  PyTorch stores
        # (out, in, k): a real checkpoint needs w_pt.transpose(2, 1, 0).reshape(k*in, out).
        "conv_w": [nrm((h * E1, E1), dtype=bf) for h in window_sizes],
        "conv_b": [nrm((1, E1)) for _ in window_sizes],
        "wl": nrm((E1 * len(window_sizes), E1), dtype=bf),
        "bl": nrm((1, E1)),
        "dec_w": nrm((E, ncls)),
        "dec_b": nrm((ncls,)),
        "tx": {
            "wqkv": stk((E, 3 * E), dtype=bf), "bqkv": stk((1, 3 * E)),
            "wo": stk((E, E), dtype=bf), "bo": stk((1, E)),
            "w1": stk((E, nhid), dtype=bf), "b1": stk((1, nhid)),
            "w2": stk((nhid, E), dtype=bf), "b2": stk((1, E)),
            "g1": jnp.ones((nlayers, 1, E), jnp.float32),
            "be1": jnp.zeros((nlayers, 1, E), jnp.float32),
            "g2": jnp.ones((nlayers, 1, E), jnp.float32),
            "be2": jnp.zeros((nlayers, 1, E), jnp.float32),
        },
    }
    return params


def hit_conv1d_forward(params, code_inp, path_inp, nhead, window_sizes):
    B, S, P = path_inp.shape
    E0 = params["emb0"].shape[1]
    E1 = params["emb1"].shape[1]

    # TODO(synk): `Encoder` approximated as an embedding lookup (eval-mode, no pos-enc).
    code_encode = jnp.take(params["emb0"], code_inp, axis=0)              # (B, S, E0) bf16

    path_flat = path_inp.reshape(B * S, P)                                # 'b s p -> (b s) p'
    path_emb = jnp.take(params["emb1"], path_flat, axis=0)                # (B*S, P, E1) bf16
    path_feat = path_conv_encode(path_emb, params["conv_w"], params["conv_b"],
                                 params["wl"], params["bl"], window_sizes)  # (B*S, E1) bf16

    # Build the (S*B, E) s-major activation slab consumed by the fused stack.
    path_sbe = path_feat.reshape(B, S, E1).transpose(1, 0, 2)             # (S, B, E1)
    code_sbe = code_encode.transpose(1, 0, 2)                             # (S, B, E0)
    src = jnp.concatenate([code_sbe, path_sbe], axis=-1).reshape(S * B, E0 + E1)

    src = transformer_stack(src, params["tx"], nhead, S, B)               # (S*B, E) bf16
    src0 = src.reshape(S, B, E0 + E1)[0]                                  # (B, E)  == src[0]

    # TODO(synk): `Decoder` approximated as Linear(emsize, ncls) (dropout = identity).
    logits = src0.astype(jnp.float32) @ params["dec_w"] + params["dec_b"]
    prob = jax.nn.softmax(logits, axis=1)
    return prob


if __name__ == "__main__":
    ntokens = [50, 40]
    ncls = 5
    emsizes = [16, 16]
    nhead = 4
    nhid = 64
    nlayers = 2
    path_len = 20
    window_sizes = [2, 3, 4, 5]
    B, S = 2, 4

    key = jax.random.PRNGKey(0)
    kp, kc, kq = jax.random.split(key, 3)
    params = init_params(kp, ntokens, ncls, emsizes, nhead, nhid, nlayers, window_sizes)
    code_inp = jax.random.randint(kc, (B, S), 0, ntokens[0], dtype=jnp.int32)
    path_inp = jax.random.randint(kq, (B, S, path_len), 0, ntokens[1], dtype=jnp.int32)

    prob = hit_conv1d_forward(params, code_inp, path_inp, nhead, window_sizes)
    prob = jax.block_until_ready(prob)
    assert prob.shape == (B, ncls)
    assert bool(jnp.all(jnp.isfinite(prob)))
    print("KERNEL_OK")
</pallas_src>

<mosaic_0001>
module attributes {stable_mosaic.version = 11 : i64} {
  func.func @_path_conv_kernel(%arg0: i32, %arg1: memref<8x20x16xbf16, #tpu.memory_space<vmem>>, %arg2: memref<32x16xbf16, #tpu.memory_space<vmem>>, %arg3: memref<1x16xf32, #tpu.memory_space<vmem>>, %arg4: memref<48x16xbf16, #tpu.memory_space<vmem>>, %arg5: memref<1x16xf32, #tpu.memory_space<vmem>>, %arg6: memref<64x16xbf16, #tpu.memory_space<vmem>>, %arg7: memref<1x16xf32, #tpu.memory_space<vmem>>, %arg8: memref<80x16xbf16, #tpu.memory_space<vmem>>, %arg9: memref<1x16xf32, #tpu.memory_space<vmem>>, %arg10: memref<64x16xbf16, #tpu.memory_space<vmem>>, %arg11: memref<1x16xf32, #tpu.memory_space<vmem>>, %arg12: memref<16x8xbf16, #tpu.memory_space<vmem>>) attributes {dimension_semantics = [#tpu.dimension_semantics<parallel>], iteration_bounds = array<i64: 1>, scalar_prefetch = 0 : i64, scratch_operands = 0 : i64, tpu.core_type = #tpu.core_type<tc>, window_params = [{transform_indices = @transform_0, window_bounds = array<i64: 8, 20, 16>}, {pipeline_mode = #tpu.pipeline_mode<synchronous>, transform_indices = @transform_1, window_bounds = array<i64: 32, 16>}, {pipeline_mode = #tpu.pipeline_mode<synchronous>, transform_indices = @transform_2, window_bounds = array<i64: 1, 16>}, {pipeline_mode = #tpu.pipeline_mode<synchronous>, transform_indices = @transform_3, window_bounds = array<i64: 48, 16>}, {pipeline_mode = #tpu.pipeline_mode<synchronous>, transform_indices = @transform_4, window_bounds = array<i64: 1, 16>}, {pipeline_mode = #tpu.pipeline_mode<synchronous>, transform_indices = @transform_5, window_bounds = array<i64: 64, 16>}, {pipeline_mode = #tpu.pipeline_mode<synchronous>, transform_indices = @transform_6, window_bounds = array<i64: 1, 16>}, {pipeline_mode = #tpu.pipeline_mode<synchronous>, transform_indices = @transform_7, window_bounds = array<i64: 80, 16>}, {pipeline_mode = #tpu.pipeline_mode<synchronous>, transform_indices = @transform_8, window_bounds = array<i64: 1, 16>}, {pipeline_mode = #tpu.pipeline_mode<synchronous>, transform_indices = @transform_9, window_bounds = array<i64: 64, 16>}, {pipeline_mode = #tpu.pipeline_mode<synchronous>, transform_indices = @transform_10, window_bounds = array<i64: 1, 16>}, {transform_indices = @transform_11, window_bounds = array<i64: 16, 8>}]} {
    %c0 = arith.constant 0 : index
    %c0_0 = arith.constant 0 : index
    %c0_1 = arith.constant 0 : index
    %0 = vector.load %arg1[%c0, %c0_0, %c0_1] : memref<8x20x16xbf16, #tpu.memory_space<vmem>>, vector<8x20x16xbf16>
    %1 = vector.extract_strided_slice %0 {offsets = [0, 0, 0], sizes = [8, 19, 16], strides = [1, 1, 1]} : vector<8x20x16xbf16> to vector<8x19x16xbf16>
    %2 = vector.extract_strided_slice %0 {offsets = [0, 1, 0], sizes = [8, 19, 16], strides = [1, 1, 1]} : vector<8x20x16xbf16> to vector<8x19x16xbf16>
    %3 = tpu.concatenate %1, %2 in 2 : vector<8x19x16xbf16>, vector<8x19x16xbf16> -> vector<8x19x32xbf16>
    %4 = vector.shape_cast %3 : vector<8x19x32xbf16> to vector<152x32xbf16>
    %c0_2 = arith.constant 0 : index
    %c0_3 = arith.constant 0 : index
    %5 = vector.load %arg2[%c0_2, %c0_3] : memref<32x16xbf16, #tpu.memory_space<vmem>>, vector<32x16xbf16>
    %cst = arith.constant dense<0.000000e+00> : vector<152x16xf32>
    %6 = tpu.matmul %4, %5, %cst {dimension_numbers = #tpu.dot_dimension_numbers<[1], [0], [0], [1], [0, 0, 1, 1], [], []>} : vector<152x32xbf16>, vector<32x16xbf16>, vector<152x16xf32> -> vector<152x16xf32>
    %c0_4 = arith.constant 0 : index
    %c0_5 = arith.constant 0 : index
    %7 = vector.load %arg3[%c0_4, %c0_5] : memref<1x16xf32, #tpu.memory_space<vmem>>, vector<1x16xf32>
    %8 = vector.broadcast %7 : vector<1x16xf32> to vector<152x16xf32>
    %9 = arith.addf %6, %8 : vector<152x16xf32>
    %cst_6 = arith.constant 0.000000e+00 : f32
    %10 = vector.broadcast %cst_6 : f32 to vector<152x16xf32>
    %11 = arith.maximumf %9, %10 : vector<152x16xf32>
    %12 = vector.shape_cast %11 : vector<152x16xf32> to vector<8x19x16xf32>
    %cst_7 = arith.constant dense<0xFF800000> : vector<8x16xf32>
    %13 = vector.multi_reduction <maximumf>, %12, %cst_7 [1] : vector<8x19x16xf32> to vector<8x16xf32>
    %14 = vector.extract_strided_slice %0 {offsets = [0, 0, 0], sizes = [8, 18, 16], strides = [1, 1, 1]} : vector<8x20x16xbf16> to vector<8x18x16xbf16>
    %15 = vector.extract_strided_slice %0 {offsets = [0, 1, 0], sizes = [8, 18, 16], strides = [1, 1, 1]} : vector<8x20x16xbf16> to vector<8x18x16xbf16>
    %16 = vector.extract_strided_slice %0 {offsets = [0, 2, 0], sizes = [8, 18, 16], strides = [1, 1, 1]} : vector<8x20x16xbf16> to vector<8x18x16xbf16>
    %17 = tpu.concatenate %14, %15, %16 in 2 : vector<8x18x16xbf16>, vector<8x18x16xbf16>, vector<8x18x16xbf16> -> vector<8x18x48xbf16>
    %18 = vector.shape_cast %17 : vector<8x18x48xbf16> to vector<144x48xbf16>
    %c0_8 = arith.constant 0 : index
    %c0_9 = arith.constant 0 : index
    %19 = vector.load %arg4[%c0_8, %c0_9] : memref<48x16xbf16, #tpu.memory_space<vmem>>, vector<48x16xbf16>
    %cst_10 = arith.constant dense<0.000000e+00> : vector<144x16xf32>
    %20 = tpu.matmul %18, %19, %cst_10 {dimension_numbers = #tpu.dot_dimension_numbers<[1], [0], [0], [1], [0, 0, 1, 1], [], []>} : vector<144x48xbf16>, vector<48x16xbf16>, vector<144x16xf32> -> vector<144x16xf32>
    %c0_11 = arith.constant 0 : index
    %c0_12 = arith.constant 0 : index
    %21 = vector.load %arg5[%c0_11, %c0_12] : memref<1x16xf32, #tpu.memory_space<vmem>>, vector<1x16xf32>
    %22 = vector.broadcast %21 : vector<1x16xf32> to vector<144x16xf32>
    %23 = arith.addf %20, %22 : vector<144x16xf32>
    %cst_13 = arith.constant 0.000000e+00 : f32
    %24 = vector.broadcast %cst_13 : f32 to vector<144x16xf32>
    %25 = arith.maximumf %23, %24 : vector<144x16xf32>
    %26 = vector.shape_cast %25 : vector<144x16xf32> to vector<8x18x16xf32>
    %cst_14 = arith.constant dense<0xFF800000> : vector<8x16xf32>
    %27 = vector.multi_reduction <maximumf>, %26, %cst_14 [1] : vector<8x18x16xf32> to vector<8x16xf32>
    %28 = vector.extract_strided_slice %0 {offsets = [0, 0, 0], sizes = [8, 17, 16], strides = [1, 1, 1]} : vector<8x20x16xbf16> to vector<8x17x16xbf16>
    %29 = vector.extract_strided_slice %0 {offsets = [0, 1, 0], sizes = [8, 17, 16], strides = [1, 1, 1]} : vector<8x20x16xbf16> to vector<8x17x16xbf16>
    %30 = vector.extract_strided_slice %0 {offsets = [0, 2, 0], sizes = [8, 17, 16], strides = [1, 1, 1]} : vector<8x20x16xbf16> to vector<8x17x16xbf16>
    %31 = vector.extract_strided_slice %0 {offsets = [0, 3, 0], sizes = [8, 17, 16], strides = [1, 1, 1]} : vector<8x20x16xbf16> to vector<8x17x16xbf16>
    %32 = tpu.concatenate %28, %29, %30, %31 in 2 : vector<8x17x16xbf16>, vector<8x17x16xbf16>, vector<8x17x16xbf16>, vector<8x17x16xbf16> -> vector<8x17x64xbf16>
    %33 = vector.shape_cast %32 : vector<8x17x64xbf16> to vector<136x64xbf16>
    %c0_15 = arith.constant 0 : index
    %c0_16 = arith.constant 0 : index
    %34 = vector.load %arg6[%c0_15, %c0_16] : memref<64x16xbf16, #tpu.memory_space<vmem>>, vector<64x16xbf16>
    %cst_17 = arith.constant dense<0.000000e+00> : vector<136x16xf32>
    %35 = tpu.matmul %33, %34, %cst_17 {dimension_numbers = #tpu.dot_dimension_numbers<[1], [0], [0], [1], [0, 0, 1, 1], [], []>} : vector<136x64xbf16>, vector<64x16xbf16>, vector<136x16xf32> -> vector<136x16xf32>
    %c0_18 = arith.constant 0 : index
    %c0_19 = arith.constant 0 : index
    %36 = vector.load %arg7[%c0_18, %c0_19] : memref<1x16xf32, #tpu.memory_space<vmem>>, vector<1x16xf32>
    %37 = vector.broadcast %36 : vector<1x16xf32> to vector<136x16xf32>
    %38 = arith.addf %35, %37 : vector<136x16xf32>
    %cst_20 = arith.constant 0.000000e+00 : f32
    %39 = vector.broadcast %cst_20 : f32 to vector<136x16xf32>
    %40 = arith.maximumf %38, %39 : vector<136x16xf32>
    %41 = vector.shape_cast %40 : vector<136x16xf32> to vector<8x17x16xf32>
    %cst_21 = arith.constant dense<0xFF800000> : vector<8x16xf32>
    %42 = vector.multi_reduction <maximumf>, %41, %cst_21 [1] : vector<8x17x16xf32> to vector<8x16xf32>
    %43 = vector.extract_strided_slice %0 {offsets = [0, 0, 0], sizes = [8, 16, 16], strides = [1, 1, 1]} : vector<8x20x16xbf16> to vector<8x16x16xbf16>
    %44 = vector.extract_strided_slice %0 {offsets = [0, 1, 0], sizes = [8, 16, 16], strides = [1, 1, 1]} : vector<8x20x16xbf16> to vector<8x16x16xbf16>
    %45 = vector.extract_strided_slice %0 {offsets = [0, 2, 0], sizes = [8, 16, 16], strides = [1, 1, 1]} : vector<8x20x16xbf16> to vector<8x16x16xbf16>
    %46 = vector.extract_strided_slice %0 {offsets = [0, 3, 0], sizes = [8, 16, 16], strides = [1, 1, 1]} : vector<8x20x16xbf16> to vector<8x16x16xbf16>
    %47 = vector.extract_strided_slice %0 {offsets = [0, 4, 0], sizes = [8, 16, 16], strides = [1, 1, 1]} : vector<8x20x16xbf16> to vector<8x16x16xbf16>
    %48 = tpu.concatenate %43, %44, %45, %46, %47 in 2 : vector<8x16x16xbf16>, vector<8x16x16xbf16>, vector<8x16x16xbf16>, vector<8x16x16xbf16>, vector<8x16x16xbf16> -> vector<8x16x80xbf16>
    %49 = vector.shape_cast %48 : vector<8x16x80xbf16> to vector<128x80xbf16>
    %c0_22 = arith.constant 0 : index
    %c0_23 = arith.constant 0 : index
    %50 = vector.load %arg8[%c0_22, %c0_23] : memref<80x16xbf16, #tpu.memory_space<vmem>>, vector<80x16xbf16>
    %cst_24 = arith.constant dense<0.000000e+00> : vector<128x16xf32>
    %51 = tpu.matmul %49, %50, %cst_24 {dimension_numbers = #tpu.dot_dimension_numbers<[1], [0], [0], [1], [0, 0, 1, 1], [], []>} : vector<128x80xbf16>, vector<80x16xbf16>, vector<128x16xf32> -> vector<128x16xf32>
    %c0_25 = arith.constant 0 : index
    %c0_26 = arith.constant 0 : index
    %52 = vector.load %arg9[%c0_25, %c0_26] : memref<1x16xf32, #tpu.memory_space<vmem>>, vector<1x16xf32>
    %53 = vector.broadcast %52 : vector<1x16xf32> to vector<128x16xf32>
    %54 = arith.addf %51, %53 : vector<128x16xf32>
    %cst_27 = arith.constant 0.000000e+00 : f32
    %55 = vector.broadcast %cst_27 : f32 to vector<128x16xf32>
    %56 = arith.maximumf %54, %55 : vector<128x16xf32>
    %57 = vector.shape_cast %56 : vector<128x16xf32> to vector<8x16x16xf32>
    %cst_28 = arith.constant dense<0xFF800000> : vector<8x16xf32>
    %58 = vector.multi_reduction <maximumf>, %57, %cst_28 [1] : vector<8x16x16xf32> to vector<8x16xf32>
    %59 = tpu.concatenate %13, %27, %42, %58 in 1 : vector<8x16xf32>, vector<8x16xf32>, vector<8x16xf32>, vector<8x16xf32> -> vector<8x64xf32>
    %60 = arith.truncf %59 : vector<8x64xf32> to vector<8x64xbf16>
    %c0_29 = arith.constant 0 : index
    %c0_30 = arith.constant 0 : index
    %61 = vector.load %arg10[%c0_29, %c0_30] : memref<64x16xbf16, #tpu.memory_space<vmem>>, vector<64x16xbf16>
    %cst_31 = arith.constant dense<0.000000e+00> : vector<8x16xf32>
    %62 = tpu.matmul %60, %61, %cst_31 {dimension_numbers = #tpu.dot_dimension_numbers<[1], [0], [0], [1], [0, 0, 1, 1], [], []>} : vector<8x64xbf16>, vector<64x16xbf16>, vector<8x16xf32> -> vector<8x16xf32>
    %c0_32 = arith.constant 0 : index
    %c0_33 = arith.constant 0 : index
    %63 = vector.load %arg11[%c0_32, %c0_33] : memref<1x16xf32, #tpu.memory_space<vmem>>, vector<1x16xf32>
    %64 = vector.broadcast %63 : vector<1x16xf32> to vector<8x16xf32>
    %65 = arith.addf %62, %64 : vector<8x16xf32>
    %66 = tpu.transpose %65, [1, 0] : vector<8x16xf32> -> vector<16x8xf32>
    %67 = arith.truncf %66 : vector<16x8xf32> to vector<16x8xbf16>
    %c0_34 = arith.constant 0 : index
    %c0_35 = arith.constant 0 : index
    %68 = vector.load %arg12[%c0_34, %c0_35] : memref<16x8xbf16, #tpu.memory_space<vmem>>, vector<16x8xbf16>
    tpu.vector_store %arg12[%c0_34, %c0_35], %67 {strides = array<i32>} : memref<16x8xbf16, #tpu.memory_space<vmem>>, vector<16x8xbf16>,
    return
  }
  func.func @transform_0(%arg0: i32) -> (i32, i32, i32) {
    %c0_i32 = arith.constant 0 : i32
    %c0_i32_0 = arith.constant 0 : i32
    %c0_i32_1 = arith.constant 0 : i32
    return %arg0, %c0_i32, %c0_i32_0 : i32, i32, i32
  }
  func.func @transform_1(%arg0: i32) -> (i32, i32) {
    %c0_i32 = arith.constant 0 : i32
    %c0_i32_0 = arith.constant 0 : i32
    %c0_i32_1 = arith.constant 0 : i32
    return %c0_i32, %c0_i32_0 : i32, i32
  }
  func.func @transform_2(%arg0: i32) -> (i32, i32) {
    %c0_i32 = arith.constant 0 : i32
    %c0_i32_0 = arith.constant 0 : i32
    %c0_i32_1 = arith.constant 0 : i32
    return %c0_i32, %c0_i32_0 : i32, i32
  }
  func.func @transform_3(%arg0: i32) -> (i32, i32) {
    %c0_i32 = arith.constant 0 : i32
    %c0_i32_0 = arith.constant 0 : i32
    %c0_i32_1 = arith.constant 0 : i32
    return %c0_i32, %c0_i32_0 : i32, i32
  }
  func.func @transform_4(%arg0: i32) -> (i32, i32) {
    %c0_i32 = arith.constant 0 : i32
    %c0_i32_0 = arith.constant 0 : i32
    %c0_i32_1 = arith.constant 0 : i32
    return %c0_i32, %c0_i32_0 : i32, i32
  }
  func.func @transform_5(%arg0: i32) -> (i32, i32) {
    %c0_i32 = arith.constant 0 : i32
    %c0_i32_0 = arith.constant 0 : i32
    %c0_i32_1 = arith.constant 0 : i32
    return %c0_i32, %c0_i32_0 : i32, i32
  }
  func.func @transform_6(%arg0: i32) -> (i32, i32) {
    %c0_i32 = arith.constant 0 : i32
    %c0_i32_0 = arith.constant 0 : i32
    %c0_i32_1 = arith.constant 0 : i32
    return %c0_i32, %c0_i32_0 : i32, i32
  }
  func.func @transform_7(%arg0: i32) -> (i32, i32) {
    %c0_i32 = arith.constant 0 : i32
    %c0_i32_0 = arith.constant 0 : i32
    %c0_i32_1 = arith.constant 0 : i32
    return %c0_i32, %c0_i32_0 : i32, i32
  }
  func.func @transform_8(%arg0: i32) -> (i32, i32) {
    %c0_i32 = arith.constant 0 : i32
    %c0_i32_0 = arith.constant 0 : i32
    %c0_i32_1 = arith.constant 0 : i32
    return %c0_i32, %c0_i32_0 : i32, i32
  }
  func.func @transform_9(%arg0: i32) -> (i32, i32) {
    %c0_i32 = arith.constant 0 : i32
    %c0_i32_0 = arith.constant 0 : i32
    %c0_i32_1 = arith.constant 0 : i32
    return %c0_i32, %c0_i32_0 : i32, i32
  }
  func.func @transform_10(%arg0: i32) -> (i32, i32) {
    %c0_i32 = arith.constant 0 : i32
    %c0_i32_0 = arith.constant 0 : i32
    %c0_i32_1 = arith.constant 0 : i32
    return %c0_i32, %c0_i32_0 : i32, i32
  }
  func.func @transform_11(%arg0: i32) -> (i32, i32) {
    %c0_i32 = arith.constant 0 : i32
    %c0_i32_0 = arith.constant 0 : i32
    return %c0_i32, %arg0 : i32, i32
  }
}

</mosaic_0001>

<bundles_post_ra>
// kernel: tpu_custom_call.1
= control target key start
LH: loop header
LB: loop body
LE: loop exit
PB: predicated region body
PF: predicated region fallthrough
CT: control target
= control target key end

     0   :  { %vm127_vm0 = vsmask.f32 7424  ;;  %s10132_s12 = smov 16   ;;  %vm3806_vm1 = vcmask 1046528   ;;  %s10133_s15 = smov 32   ;;  %vm10136_vm3 = vmmov 0   ;;  %s13317_s0 = inlined_call_operand.vmem [shape: bf16[8,20,16], index: 0, kind: input, shape index: {}]   ;;  %s13318_s1 = inlined_call_operand.vmem [shape: bf16[32,16], index: 1, kind: input, shape index: {}]   ;;  %s13319_s5 = inlined_call_operand.vmem [shape: bf16[64,16], index: 5, kind: input, shape index: {}]   ;;  %s13320_s3 = inlined_call_operand.vmem [shape: bf16[48,16], index: 3, kind: input, shape index: {}]   ;;  %s13321_s7 = inlined_call_operand.vmem [shape: bf16[80,16], index: 7, kind: input, shape index: {}]   ;;  %s13322_s2 = inlined_call_operand.vmem [shape: f32[1,16], index: 2, kind: input, shape index: {}]   ;;  %s13323_s4 = inlined_call_operand.vmem [shape: f32[1,16], index: 4, kind: input, shape index: {}]   ;;  %s13324_s6 = inlined_call_operand.vmem [shape: f32[1,16], index: 6, kind: input, shape index: {}]   ;;  %s13325_s9 = inlined_call_operand.vmem [shape: bf16[64,16], index: 9, kind: input, shape index: {}]   ;;  %s13326_s8 = inlined_call_operand.vmem [shape: f32[1,16], index: 8, kind: input, shape index: {}]   ;;  %s13327_s10 = inlined_call_operand.vmem [shape: f32[1,16], index: 10, kind: input, shape index: {}]   ;;  %s13328_s11 = inlined_call_operand.vmem [shape: bf16[16,8], index: 11, kind: output, shape index: {}]  }
   0x1   :  { %v10203_v0 = vld [vmem:[%s13317_s0 + $0x8] ss:$0 sps:$4 sm:$0x33]   ;;  %v10208_v1 = vld [vmem:[%s13317_s0 + $0xc] sm:$0xff]   ;;  %v10224_v7 = vld [vmem:[%s13317_s0] sm:$0xff]   ;;  %vm9151_vm4 = vcmask 1045504  }
   0x2   :  { %v136_v2 = vshll.u32 %v10203_v0, 16  ;;  %v10212_v3 = vshrl.u32 %v10203_v0, 16  ;;  %v10217_v4 = vld [vmem:[%s13317_s0 + $0x14] ss:$0 sps:$4 sm:$0x33]   ;;  %v144_v5 = vshrl.u32 %v10208_v1, 16 }
   0x3   :  { %v146_v6 = vshll.u32 %v10208_v1, 16  ;;  %v151_v9 = vshll.u32 %v10217_v4, 16  ;;  %v10230_v10 = vshrl.u32 %v10217_v4, 16  ;;  %v129_v12 = vshrl.u32 %v10224_v7, 16  ;;  %v10239_v14 = vld [vmem:[%s13317_s0 + $0x18] sm:$0xff]   ;;  %v10258_v22 = vld [vmem:[%s13317_s0 + $0x24] sm:$0xff]  }
   0x4   :  { %v138_v8 = vrot.slane %v136_v2, 1  ;;  %v131_v13 = vshll.u32 %v10224_v7, 16  ;;  %v10247_v17 = vld [vmem:[%s13317_s0 + $0x20] ss:$0 sps:$4 sm:$0x33]   ;;  %v159_v20 = vshrl.u32 %v10239_v14, 16 }
   0x5   :  { %v148_v11 = vrot.slane %v146_v6, 1  ;;  %v153_v16 = vrot.slane %v151_v9, 1  ;;  %v161_v21 = vshll.u32 %v10239_v14, 16  ;;  %v166_v24 = vshll.u32 %v10247_v17, 16  ;;  %v10277_v30 = vld [vmem:[%s13317_s0 + $0x30] sm:$0xff]   ;;  %v10295_v37 = vld [vmem:[%s13317_s0 + $0x3c] sm:$0xff]  }
   0x6   :  { %v142_v15 = vor.u32 %v10212_v3, %v138_v8  ;;  %v133_v19 = vrot.slane %v131_v13, 1  ;;  %v10271_v28 = vld [vmem:[%s13317_s0 + $0x2c] ss:$0 sps:$4 sm:$0x33]   ;;  %v174_v29 = vshrl.u32 %v10258_v22, 16  ;;  %v176_v32 = vshll.u32 %v10258_v22, 16 }
   0x7   :  { %v149_v18 = vor.u32 %v148_v11, %v144_v5  ;;  %v157_v23 = vor.u32 %v10230_v10, %v153_v16  ;;  %v163_v27 = vrot.slane %v161_v21, 1  ;;  %v168_v31 = vrot.slane %v166_v24, 1  ;;  %v10290_v36 = vld [vmem:[%s13317_s0 + $0x38] ss:$0 sps:$4 sm:$0x33]   ;;  %v10322_v47 = vld [vmem:[%s13317_s0 + $0x48] sm:$0xff]  }
   0x8   :  { %250 = vrot.lane.b32.xlu1 %v142_v15, %s10132_s12  ;;  %v134_v26 = vor.u32 %v133_v19, %v129_v12  ;;  %v181_v35 = vshll.u32 %v10271_v28, 16  ;;  %v178_v38 = vrot.slane %v176_v32, 1  ;;  %v10301_v39 = vshrl.u32 %v10271_v28, 16  ;;  %v10317_v46 = vld [vmem:[%s13317_s0 + $0x44] ss:$0 sps:$4 sm:$0x33]  }
   0x9   :  { %v154_v25 = vsel %vm127_vm0, %v149_v18, %v153_v16  ;;  %v164_v34 = vor.u32 %v163_v27, %v159_v20  ;;  %v191_v40 = vshll.u32 %v10277_v30, 16  ;;  %v10308_v43 = vshrl.u32 %v10247_v17, 16  ;;  %v10340_v56 = vld [vmem:[%s13317_s0 + $0x54] sm:$0xff]   ;;  %v10350_v60 = vld [vmem:[%s13317_s0 + $0x50] ss:$0 sps:$4 sm:$0x33]  }
   0xa   :  { %252 = vrot.lane.b32.xlu0 %v154_v25, %s10132_s12  ;;  %v139_v33 = vsel %vm127_vm0, %v134_v26, %v138_v8  ;;  %v183_v42 = vrot.slane %v181_v35, 1  ;;  %v196_v44 = vshll.u32 %v10290_v36, 16  ;;  %v179_v45 = vor.u32 %v178_v38, %v174_v29  ;;  %v10371_v25 = vld [vmem:[%s13317_s0 + $0x5c] ss:$0 sps:$4 sm:$0x33]  }
   0xb   :  { %v169_v41 = vsel %vm127_vm0, %v164_v34, %v168_v31  ;;  %v10325_v48 = vshrl.u32 %v10290_v36, 16  ;;  %v189_v49 = vshrl.u32 %v10277_v30, 16  ;;  %v193_v50 = vrot.slane %v191_v40, 1 }
   0xc   :  { %254 = vrot.lane.b32.xlu1 %v157_v23, %s10132_s12  ;;  %v206_v51 = vshll.u32 %v10295_v37, 16  ;;  %v184_v52 = vsel %vm127_vm0, %v179_v45, %v183_v42  ;;  %v187_v53 = vor.u32 %v10301_v39, %v183_v42  ;;  %v198_v54 = vrot.slane %v196_v44, 1 }
   0xd   :  { %v13329_v55 = vshll.u32 %v10317_v46, 16  ;;  %v172_v57 = vor.u32 %v10308_v43, %v168_v31  ;;  %v204_v58 = vshrl.u32 %v10295_v37, 16  ;;  %v221_v61 = vshll.u32 %v10322_v47, 16 }
   0xe   :  { %248 = vrot.lane.b32.xlu0 %v139_v33, %s10132_s12  ;;  %v208_v59 = vrot.slane %v206_v51, 1  ;;  %v194_v62 = vor.u32 %v193_v50, %v189_v49  ;;  %v202_v63 = vor.u32 %v10325_v48, %v198_v54  ;;  %v10360_v11 = vshrl.u32 %v10317_v46, 16 }
   0xf   :  { %v213_v8 = vrot.slane %v13329_v55, 1  ;;  %v219_v16 = vshrl.u32 %v10322_v47, 16  ;;  %v223_v19 = vrot.slane %v221_v61, 1  ;;  %v226_v23 = vshll.u32 %v10350_v60, 16 }
  0x10   :  { %256 = vrot.lane.b32.xlu1 %v169_v41, %s10132_s12  ;;  %v209_v15 = vor.u32 %v208_v59, %v204_v58  ;;  %v199_v18 = vsel %vm127_vm0, %v194_v62, %v198_v54  ;;  %v236_v26 = vshll.u32 %v10340_v56, 16  ;;  %v3807_v31 = vrot.slane %v10224_v7, 1 }
  0x11   :  { %v217_v27 = vor.u32 %v10360_v11, %v213_v8  ;;  %v3808_v33 = vrot.slane %v10203_v0, 1  ;;  %v234_v38 = vshrl.u32 %v10340_v56, 16  ;;  %v224_v41 = vor.u32 %v223_v19, %v219_v16 }
  0x12   :  { %260 = vrot.lane.b32.xlu0 %v184_v52, %s10132_s12  ;;  %v214_v34 = vsel %vm127_vm0, %v209_v15, %v213_v8  ;;  %v228_v42 = vrot.slane %v226_v23, 1  ;;  %v238_v45 = vrot.slane %v236_v26, 1  ;;  %v241_v50 = vshll.u32 %v10371_v25, 16 }
  0x13   :  { %v10384_v52 = vshrl.u32 %v10350_v60, 16  ;;  %v5824_v54 = vrot.slane %v136_v2, 2  ;;  %v10397_v8 = vshrl.u32 %v10371_v25, 16  ;;  %v5820_v2 = vrot.slane %v129_v12, 1 }
  0x14   :  { %262 = vrot.lane.b32.xlu1 %v187_v53, %s10132_s12  ;;  %v3809_v53 = vsel %vm3806_vm1, %v3807_v31, %v3808_v33  ;;  %v229_v59 = vsel %vm127_vm0, %v224_v41, %v228_v42  ;;  %v239_v62 = vor.u32 %v238_v45, %v234_v38  ;;  %v5823_v19 = vrot.slane %v10212_v3, 1 }
  0x15   :  { %v232_v15 = vor.u32 %v10384_v52, %v228_v42  ;;  %v3810_v31 = vrot.slane %v10208_v1, 1  ;;  %v5827_v41 = vrot.slane %v144_v5, 1  ;;  %v5828_v45 = vrot.slane %v146_v6, 2 }
  0x16   :  { %258 = vrot.lane.b32.xlu0 %v172_v57, %s10132_s12  ;;  %v10100_v57 = vld [vmem:[%s13318_s1] sm:$0xff]   ;;  %v5825_v42 = vor.u32 %v5824_v54, %v5823_v19  ;;  %vm5819_vm2 = vsmask.f32 6400  ;;  %v5862_v5 = vrot.slane %v219_v16, 1  ;;  %v5866_v6 = vrot.slane %v226_v23, 2 }
  0x17   :  { %9928 = vmatprep.subr.bf16.mxu0 %v10100_v57  ;;  %v5829_v54 = vor.u32 %v5828_v45, %v5827_v41  ;;  %v5869_v55 = vrot.slane %v234_v38, 1  ;;  %v5872_v16 = vrot.slane %v10397_v8, 1  ;;  %v3813_v41 = vrot.slane %v10239_v14, 1 }
  0x18   :  { %266 = vrot.lane.b32.xlu1 %v202_v63, %s10132_s12  ;;  %v243_v63 = vrot.slane %v241_v50, 1  ;;  %9929 = vmatpush3.bf16.msra.mxu0 %v10100_v57  ;;  %v5831_v57 = vrot.slane %v151_v9, 2  ;;  %v3814_v23 = vrot.slane %v10247_v17, 1  ;;  %v3817_v45 = vrot.slane %v10271_v28, 1 }
  0x19   :  { %vm280_vm5 = vcmask 130048   ;;  %vm1613_vm6 = vcmask 261120   ;;  %vm4887_vm7 = vcmask 392192   ;;  %vm7143_vm8 = vcmask 523264  }
  0x1a   :  { %264 = vrot.lane.b32.xlu0 %v199_v18, %s10132_s12  ;;  %v5821_v18 = vrot.slane %v131_v13, 2  ;;  %v247_v12 = vor.u32 %v10397_v8, %v243_v63  ;;  %vm9255_vm9 = vcmask 654336   ;;  %vm3720_vm10 = vcmask 124928  }
  0x1b   :  { %vm5717_vm11 = vcmask 123904   ;;  %vm9065_vm12 = vcmask 122880   ;;  %vm9465_vm13 = vcmask 1041409   ;;  %vm9467_vm14 = vcmask 1042434  }
  0x1c   :  { %270 = vrot.lane.b32.xlu1 %v217_v27, %s10132_s12  ;;  %v244_v27 = vsel %vm127_vm0, %v239_v62, %v243_v63  ;;  %v5822_v13 = vor.u32 %v5821_v18, %v5820_v2  ;;  %v5863_v62 = vrot.slane %v221_v61, 2  ;;  %v10101_v2 = vld [vmem:[%s13318_s1 + $0x8] sm:$0xff]   ;;  %s10134_s1 = smov 48   ;;  %vm9469_vm15 = vcmask 1043459  }
  0x1d   :  { %9930 = vmatprep.subr.bf16.mxu0 %v10101_v2  ;;  %vm9471_vm0 = vcmask 1044484  }
  0x1e   :  { %268 = vrot.lane.b32.xlu0 %v214_v34, %s10132_s12  ;;  %v3811_v34 = vrot.slane %v10217_v4, 1  ;;  %v5826_v63 = vsel %vm5819_vm2, %v5822_v13, %v5825_v42  ;;  %v5864_v9 = vor.u32 %v5863_v62, %v5862_v5  ;;  %9931 = vmatpush3.bf16.msra.mxu0 %v10101_v2  ;;  %v3816_v42 = vrot.slane %v10258_v22, 1 }
  0x1f   :  { %v5837_v5 = vrot.slane %v10308_v43, 1  ;;  %v5838_v62 = vrot.slane %v166_v24, 2 }
  0x20   :  { %3831 = vrot.lane.b32.xlu1 %v3809_v53, %s10133_s15  ;;  %v5830_v53 = vrot.slane %v10230_v10, 1 }
  0x22   :  { %272 = vrot.lane.b32.xlu0 %v229_v59, %s10132_s12  ;;  %v3812_v59 = vsel %vm3806_vm1, %v3810_v31, %v3811_v34  ;;  %v5832_v18 = vor.u32 %v5831_v57, %v5830_v53  ;;  %v5873_v31 = vrot.slane %v241_v50, 2  ;;  %v3818_v57 = vsel %vm3806_vm1, %v3816_v42, %v3817_v45 }
  0x23   :  { %v3825_v42 = vrot.slane %v10322_v47, 1 }
  0x24   :  { %274 = vrot.lane.b32.xlu1 %v232_v15, %s10132_s12  ;;  %v5865_v15 = vrot.slane %v10384_v52, 1  ;;  %v5874_v38 = vor.u32 %v5873_v31, %v5872_v16  ;;  %v5833_v13 = vsel %vm5819_vm2, %v5829_v54, %v5832_v18  ;;  %v5839_v54 = vor.u32 %v5838_v62, %v5837_v5 }
  0x25   :  { %v3822_v18 = vrot.slane %v10295_v37, 1  ;;  %v5851_v31 = vrot.slane %v10325_v48, 1  ;;  %v3829_v62 = vrot.slane %v10371_v25, 1 }
  0x26   :  { %276 = vrot.lane.b32.xlu0 %v244_v27, %s10132_s12  ;;  %v5870_v27 = vrot.slane %v236_v26, 2  ;;  %v5867_v61 = vor.u32 %v5866_v6, %v5865_v15  ;;  %v3820_v6 = vrot.slane %v10290_v36, 1 }
  0x28   :  { %278 = vrot.lane.b32.xlu1 %v247_v12, %s10132_s12  ;;  %v5871_v12 = vor.u32 %v5870_v27, %v5869_v55  ;;  %v10435_v26 = vsel %vm5819_vm2, %v5864_v9, %v5867_v61  ;;  %v3815_v55 = vsel %vm3806_vm1, %v3813_v41, %v3814_v23  ;;  %v3823_v9 = vrot.slane %v10317_v46, 1 }
  0x29   :  { %v5848_v27 = vrot.slane %v189_v49, 1  ;;  %v5849_v61 = vrot.slane %v191_v40, 2  ;;  %v5852_v41 = vrot.slane %v196_v44, 2  ;;  %v5856_v49 = vrot.slane %v206_v51, 2 }
  0x2a   :  { %3835 = vrot.lane.b32.xlu0 %v3812_v59, %s10133_s15  ;;  %v10444_v50 = vsel %vm5819_vm2, %v5871_v12, %v5874_v38  ;;  %v5835_v59 = vrot.slane %v161_v21, 2  ;;  %v5858_v12 = vrot.slane %v10360_v11, 1  ;;  %v13363_v40 = vshll.u32 %v10317_v46, 16 }
  0x2b   :  { %v5850_v44 = vor.u32 %v5849_v61, %v5848_v27  ;;  %v9165_v27 = vrot.slane %v10290_v36, 2 }
  0x2c   :  { %5876 = vrot.lane.b32.xlu1 %v5826_v63, %s10134_s1  ;;  %v5845_v63 = vrot.slane %v181_v35, 2  ;;  %v5859_v38 = vrot.slane %v13363_v40, 2 }
  0x2e   :  { %3833 = vrot.lane.b32.xlu0 %v3808_v33, %s10133_s15  ;;  %v5834_v33 = vrot.slane %v159_v20, 1  ;;  %v5844_v20 = vrot.slane %v10301_v39, 1 }
  0x30   :  { %5880 = vrot.lane.b32.xlu1 %v5833_v13, %s10134_s1  ;;  %v5836_v21 = vor.u32 %v5835_v59, %v5834_v33  ;;  %v5853_v13 = vor.u32 %v5852_v41, %v5851_v31  ;;  %v10106_v59 = vld [vmem:[%s13320_s3 + $0x10] sm:$0xff]  }
  0x32   :  { %3839 = vrot.lane.b32.xlu0 %v3815_v55, %s10133_s15  ;;  %v5854_v51 = vsel %vm5819_vm2, %v5850_v44, %v5853_v13 }
  0x34   :  { %5803 = vrot.lane.b32.xlu1 %v10212_v3, %s10132_s12  ;;  %v5841_v3 = vrot.slane %v174_v29, 1  ;;  %v5840_v29 = vsel %vm5819_vm2, %v5836_v21, %v5839_v54  ;;  %v9153_v21 = vrot.slane %v10203_v0, 2 }
  0x36   :  { %3837 = vrot.lane.b32.xlu0 %v3811_v34, %s10133_s15  ;;  %v5842_v34 = vrot.slane %v176_v32, 2  ;;  %v3819_v32 = vrot.slane %v10277_v30, 1 }
  0x38   :  { %5878 = vrot.lane.b32.xlu1 %v5823_v19, %s10134_s1  ;;  %v5843_v24 = vor.u32 %v5842_v34, %v5841_v3  ;;  %v5846_v19 = vor.u32 %v5845_v63, %v5844_v20  ;;  %v3821_v2 = vsel %vm3806_vm1, %v3819_v32, %v3820_v6  ;;  %v333_v34 = vlaneseq }
  0x39   :  { %v9152_v63 = vrot.slane %v10224_v7, 2  ;;  %v9159_v32 = vrot.slane %v10247_v17, 2 }
  0x3a   :  { %3843 = vrot.lane.b32.xlu0 %v3818_v57, %s10133_s15  ;;  %v5847_v35 = vsel %vm5819_vm2, %v5843_v24, %v5846_v19  ;;  %v9161_v24 = vrot.slane %v10258_v22, 2  ;;  %v9162_v19 = vrot.slane %v10271_v28, 2 }
  0x3c   :  { %5805 = vrot.lane.b32.xlu1 %v10230_v10, %s10132_s12  ;;  %v13330_v10 = vmov 0.0  }
  0x3d   :  { %9994 = vmatprep.subr.bf16.mxu0 %v13330_v10  ;;  %9952 = vmatprep.subr.bf16.mxu1 %v13330_v10 }
  0x3e   :  { %3841 = vrot.lane.b32.xlu0 %v3814_v23, %s10133_s15  ;;  %v10103_v23 = vld [vmem:[%s13320_s3] sm:$0xff]   ;;  %9958 = vmatprep.mubr.msk.bf16.mxu1 %vm10136_vm3, %v13330_v10 }
  0x3f   :  { %9953 = vmatpush3.bf16.msra.mxu1 %v10103_v23 }
  0x40   :  { %5882 = vrot.lane.b32.xlu1 %v5830_v53, %s10134_s1  ;;  %v3824_v53 = vsel %vm3806_vm1, %v3822_v18, %v3823_v9  ;;  %9954 = vmatprep.subr.bf16.mxu1 %v13330_v10 }
  0x42   :  { %5884 = vrot.lane.b32.xlu0 %v5840_v29, %s10134_s1  ;;  %v9158_v29 = vrot.slane %v10239_v14, 2 }
  0x44   :  { %5888 = vrot.lane.b32.xlu1 %v5847_v35, %s10134_s1  ;;  %v9167_v35 = vrot.slane %v10295_v37, 2 }
  0x46   :  { %3847 = vrot.lane.b32.xlu0 %v3821_v2, %s10133_s15  ;;  %v9168_v2 = vrot.slane %v10317_v46, 2 }
  0x48   :  { %5807 = vrot.lane.b32.xlu1 %v10308_v43, %s10132_s12  ;;  %v5855_v43 = vrot.slane %v204_v58, 1  ;;  %v5860_v58 = vor.u32 %v5859_v38, %v5858_v12  ;;  %v9169_v23 = vsel %vm9151_vm4, %v9167_v35, %v9168_v2 }
  0x4a   :  { %3845 = vrot.lane.b32.xlu0 %v3817_v45, %s10133_s15  ;;  %v5857_v55 = vor.u32 %v5856_v49, %v5855_v43  ;;  %v3826_v45 = vrot.slane %v10350_v60, 1  ;;  %v9174_v43 = vrot.slane %v10371_v25, 2  ;;  %v9171_v25 = vrot.slane %v10350_v60, 2 }
  0x4c   :  { %3851 = vrot.lane.b32.xlu1 %v3824_v53, %s10133_s15  ;;  %v5861_v33 = vsel %vm5819_vm2, %v5857_v55, %v5860_v58  ;;  %v3827_v57 = vsel %vm3806_vm1, %v3825_v42, %v3826_v45  ;;  %v9164_v53 = vrot.slane %v10277_v30, 2  ;;  %vm9475_vm2 = vcmask 1046534  }
  0x4e   :  { %5886 = vrot.lane.b32.xlu0 %v5837_v5, %s10134_s1  ;;  %v3828_v5 = vrot.slane %v10340_v56, 1  ;;  %v9166_v44 = vsel %vm9151_vm4, %v9164_v53, %v9165_v27 }
  0x50   :  { %5809 = vrot.lane.b32.xlu1 %v10301_v39, %s10132_s12  ;;  %v10104_v39 = vld [vmem:[%s13320_s3 + $0x8] sm:$0xff]   ;;  %s10138_s3 = smov 64  }
  0x51   :  { %9955 = vmatpush3.bf16.msra.mxu1 %v10104_v39 }
  0x52   :  { %3849 = vrot.lane.b32.xlu0 %v3820_v6, %s10133_s15  ;;  %9956 = vmatprep.subr.bf16.mxu1 %v13330_v10  ;;  %v9163_v6 = vsel %vm9151_vm4, %v9161_v24, %v9162_v19 }
  0x54   :  { %5890 = vrot.lane.b32.xlu1 %v5844_v20, %s10134_s1  ;;  %v9155_v20 = vrot.slane %v10208_v1, 2 }
  0x55   :  { %9957 = vmatpush3.bf16.msra.mxu1 %v10106_v59 }
  0x56   :  { %5892 = vrot.lane.b32.xlu0 %v5854_v51, %s10134_s1  ;;  %v10614_v51 = vld [vmem:[%s13321_s7] sm:$0xff]  }
  0x57   :  { %13366 = vst [vmem:[#allocation4_spill] sm:$0xff] %v10614_v51  ;;  %10038 = vmatprep.subr.bf16.mxu1 %v10614_v51 }
  0x58   :  { %5896 = vrot.lane.b32.xlu1 %v5861_v33, %s10134_s1 }
  0x5a   :  { %3855 = vrot.lane.b32.xlu0 %v3827_v57, %s10133_s15 }
  0x5c   :  { %5811 = vrot.lane.b32.xlu1 %v10325_v48, %s10132_s12  ;;  %v3830_v48 = vsel %vm3806_vm1, %v3828_v5, %v3829_v62  ;;  %vm9473_vm1 = vcmask 1045509  }
  0x5e   :  { %3853 = vrot.lane.b32.xlu0 %v3823_v9, %s10133_s15  ;;  %v9160_v9 = vsel %vm9151_vm4, %v9158_v29, %v9159_v32 }
  0x60   :  { %3857 = vrot.lane.b32.xlu1 %v3826_v45, %s10133_s15 }
  0x62   :  { %5894 = vrot.lane.b32.xlu0 %v5851_v31, %s10134_s1 }
  0x64   :  { %5813 = vrot.lane.b32.xlu1 %v10360_v11, %s10132_s12  ;;  %v10137_v11 = vmov 1966171168  }
  0x65   :  { %v331_v3 = vunpack.c.l.s4 %v10137_v11 }
  0x66   :  { %3859 = vrot.lane.b32.xlu0 %v3830_v48, %s10133_s15 }
  0x68   :  { %5898 = vrot.lane.b32.xlu1 %v5858_v12, %s10134_s1 }
  0x6a   :  { %5900 = vrot.lane.b32.xlu0 %v10435_v26, %s10134_s1  ;;  %v9156_v26 = vrot.slane %v10217_v4, 2 }
  0x6c   :  { %3861 = vrot.lane.b32.xlu1 %v3829_v62, %s10133_s15  ;;  %v9157_v54 = vsel %vm9151_vm4, %v9155_v20, %v9156_v26 }
  0x6e   :  { %5904 = vrot.lane.b32.xlu0 %v10444_v50, %s10134_s1  ;;  %v10561_v50 = vshrl.u32 %v333_v34, 7 }
  0x70   :  { %5902 = vrot.lane.b32.xlu1 %v5865_v15, %s10134_s1  ;;  %v332_v15 = vunpack.c.0.s8 %v331_v3  ;;  %13364 = vst [vmem:[#allocation2_spill] sm:$0xff] %v10561_v50 }
  0x72   :  { %5815 = vrot.lane.b32.xlu0 %v10384_v52, %s10132_s12  ;;  %v9154_v52 = vsel %vm9151_vm4, %v9152_v63, %v9153_v21 }
  0x74   :  { %5906 = vrot.lane.b32.xlu1 %v5872_v16, %s10134_s1  ;;  %v10573_v16 = vsub.s32 %v332_v15, %v10561_v50 }
  0x76   :  { %5817 = vrot.lane.b32.xlu0 %v10397_v8, %s10132_s12 }
  0x78   :  { %9178 = vrot.lane.b32.xlu1 %v9157_v54, %s10138_s3 }
  0x7a   :  { %9176 = vrot.lane.b32.xlu0 %v9154_v52, %s10138_s3  ;;  %v251_v8 = vpop.permute.xlu1 %250 }
  0x7b   :  { %v10581_v18 = vsel %vm280_vm5, %v10203_v0, %v251_v8  ;;  %v9173_v0 = vrot.slane %v10340_v56, 2  ;;  %v9170_v56 = vrot.slane %v10322_v47, 2 }
  0x7c   :  { %v384_v61 = vrot.slane %v10581_v18, %v10573_v16  ;;  %v253_v31 = vpop.permute.xlu0 %252  ;;  %9182 = vrot.lane.b32.xlu1 %v9163_v6, %s10138_s3 }
  0x7d   :  { %v10591_v41 = vsel %vm280_vm5, %v10208_v1, %v253_v31  ;;  %v9175_v45 = vsel %vm9151_vm4, %v9173_v0, %v9174_v43  ;;  %v9172_v5 = vsel %vm9151_vm4, %v9170_v56, %v9171_v25  ;;  %vm9660_vm4 = vcmask 60416  }
  0x7e   :  { %v385_v49 = vcombine.high %v384_v61, %v384_v61  ;;  %v400_v12 = vcombine.high %v10591_v41, %v10591_v41  ;;  %v407_v40 = vrot.slane %v10591_v41, %v10573_v16  ;;  %9180 = vrot.lane.b32.xlu0 %v9160_v9, %s10138_s3  ;;  %v255_v38 = vpop.permute.xlu1 %254  ;;  %v392_v52 = vrot.slane %v384_v61, %v10573_v16 }
  0x7f   :  { %v10603_v1 = vsel %vm280_vm5, %v10217_v4, %v255_v38 }
  0x80   :  { %13365 = vst [vmem:[#allocation3_spill] sm:$0xff] %v10603_v1  ;;  %v414_v13 = vrot.slane %v400_v12, %v10573_v16  ;;  %v415_v55 = vcombine.high %v407_v40, %v407_v40  ;;  %v423_v58 = vrot.slane %v407_v40, %v10573_v16  ;;  %9186 = vrot.lane.b32.xlu1 %v9169_v23, %s10138_s3  ;;  %v249_v42 = vpop.permute.xlu0 %248 }
  0x81   :  { %v455_v4 = vrot.slane %v10603_v1, %v10573_v16  ;;  %v399_v60 = vrot.slane %v385_v49, %v10573_v16  ;;  %v10630_v63 = vsel %vm280_vm5, %v10224_v7, %v249_v42 }
  0x82   :  { %v416_v33 = vcombine.high %v414_v13, %v414_v13  ;;  %v430_v57 = vrot.slane %v414_v13, %v10573_v16  ;;  %9184 = vrot.lane.b32.xlu0 %v9166_v44, %s10138_s3  ;;  %v437_v39 = vrot.slane %v415_v55, %v10573_v16  ;;  %v445_v59 = vcombine.high %v423_v58, %v423_v58  ;;  %v257_v24 = vpop.permute.xlu1 %256 }
  0x83   :  { %v917_v48 = vunpack.i.h.s16 %v423_v58  ;;  %v456_v3 = vcombine.high %v455_v4, %v455_v4  ;;  %v463_v34 = vrot.slane %v455_v4, %v10573_v16  ;;  %v9684_v20 = vpack.i.b16 %v423_v58, %v399_v60 }
  0x84   :  { %v444_v62 = vrot.slane %v416_v33, %v10573_v16  ;;  %9190 = vrot.lane.b32.xlu1 %v9175_v45, %s10138_s3  ;;  %v446_v11 = vcombine.high %v430_v57, %v430_v57  ;;  %v447_v21 = vcombine.high %v437_v39, %v437_v39  ;;  %v919_v15 = vunpack.i.h.s16 %v437_v39  ;;  %v261_v19 = vpop.permute.xlu0 %260 }
  0x85   :  { %v921_v54 = vunpack.i.h.s16 %v445_v59  ;;  %v925_v29 = vunpack.i.h.s16 %v430_v57  ;;  %v10634_v32 = vpack.i.b16 %v437_v39, %v917_v48  ;;  %v470_v2 = vrot.slane %v456_v3, %v10573_v16 }
  0x86   :  { %v448_v26 = vcombine.high %v444_v62, %v444_v62  ;;  %9188 = vrot.lane.b32.xlu0 %v9172_v5, %s10138_s3  ;;  %v929_v35 = vunpack.i.h.s16 %v446_v11  ;;  %v933_v8 = vunpack.i.h.s16 %v463_v34  ;;  %v329_v7 = vcombine.high %v10630_v63, %v10630_v63 }
  0x87   :  { %v10639_v9 = vcombine.low %v392_v52, %v9684_v20  ;;  %v336_v53 = vrot.slane %v10630_v63, %v10573_v16  ;;  %v10645_v27 = vsel %vm280_vm5, %v10239_v14, %v257_v24  ;;  %v10649_v61 = vsel %vm280_vm5, %v10258_v22, %v261_v19 }
  0x88   :  { %v931_v6 = vunpack.i.h.s16 %v448_v26  ;;  %13367 = vst [vmem:[#allocation5_spill] sm:$0xff] %v10649_v61  ;;  %v923_v31 = vunpack.i.h.s16 %v447_v21  ;;  %v927_v23 = vunpack.i.h.s16 %v444_v62  ;;  %v10651_v0 = vpack.i.b16 %v445_v59, %v919_v15  ;;  %v259_v52 = vpop.permute.xlu0 %258 }
  0x89   :  { %v10653_v43 = vpack.i.b16 %v447_v21, %v921_v54  ;;  %v471_v12 = vcombine.high %v10645_v27, %v10645_v27  ;;  %v478_v40 = vrot.slane %v10645_v27, %v10573_v16  ;;  %v542_v14 = vcombine.high %v10649_v61, %v10649_v61 }
  0x8a   :  { %v9692_v49 = vpack.i.b16 %v463_v34, %v931_v6  ;;  %v9691_v38 = vpack.i.b16 %v448_v26, %v929_v35  ;;  %v9693_v44 = vpack.i.b16 %v470_v2, %v933_v8  ;;  %v343_v22 = vrot.slane %v329_v7, %v10573_v16 }
  0x8b   :  { %v549_v56 = vrot.slane %v10649_v61, %v10573_v16  ;;  %v344_v25 = vcombine.high %v336_v53, %v336_v53  ;;  %v485_v13 = vrot.slane %v471_v12, %v10573_v16  ;;  %v486_v55 = vcombine.high %v478_v40, %v478_v40 }
  0x8c   :  { %v494_v58 = vrot.slane %v478_v40, %v10573_v16  ;;  %v10666_v4 = vpack.i.b16 %v430_v57, %v923_v31  ;;  %v10668_v42 = vpack.i.b16 %v444_v62, %v925_v29  ;;  %v10670_v45 = vpack.i.b16 %v446_v11, %v927_v23  ;;  %v263_v57 = vpop.permute.xlu1 %262 }
  0x8d   :  { %v556_v60 = vrot.slane %v542_v14, %v10573_v16  ;;  %v1234_v33 = vcombine.low %v9691_v38, %v9692_v49  ;;  %v501_v39 = vrot.slane %v485_v13, %v10573_v16  ;;  %v508_v59 = vrot.slane %v486_v55, %v10573_v16 }
  0x8e   :  { %v516_v5 = vcombine.high %v494_v58, %v494_v58  ;;  %v345_v48 = vcombine.high %v343_v22, %v343_v22  ;;  %v557_v3 = vcombine.high %v549_v56, %v549_v56  ;;  %v10676_v20 = vrot.slane %v549_v56, %v10573_v16 }
  0x8f   :  { %v558_v34 = vcombine.high %v556_v60, %v556_v60  ;;  %v10681_v11 = vrot.slane %v344_v25, %v10573_v16  ;;  %v487_v26 = vcombine.high %v485_v13, %v485_v13  ;;  %v1235_v21 = vcombine.low %v9693_v44, %v494_v58 }
  0x90   :  { %v518_v15 = vcombine.high %v508_v59, %v508_v59  ;;  %v10683_v54 = vcombine.low %v508_v59, %v516_v5  ;;  %v10686_v24 = vrot.slane %v556_v60, %v10573_v16  ;;  %v10689_v19 = vrot.slane %v557_v3, %v10573_v16  ;;  %v267_v56 = vpop.permute.xlu1 %266  ;;  %v265_v5 = vpop.permute.xlu0 %264 }
  0x91   :  { %v10694_v6 = vrot.slane %v336_v53, %v10573_v16  ;;  %v10697_v35 = vrot.slane %v343_v22, %v10573_v16  ;;  %v517_v2 = vcombine.high %v501_v39, %v501_v39  ;;  %v10700_v8 = vrot.slane %v1234_v33, %v10573_v16 }
  0x92   :  { %v10703_v7 = vrot.slane %v345_v48, %v10573_v16  ;;  %v586_v31 = vrot.slane %v558_v34, %v10573_v16  ;;  %v587_v23 = vcombine.high %v10676_v20, %v10676_v20  ;;  %v515_v12 = vrot.slane %v487_v26, %v10573_v16 }
  0x93   :  { %v589_v40 = vcombine.high %v10689_v19, %v10689_v19  ;;  %v10715_v14 = vcombine.low %v518_v15, %v501_v39  ;;  %v10718_v38 = vrot.slane %v1235_v21, %v10573_v16  ;;  %v588_v22 = vcombine.high %v10686_v24, %v10686_v24 }
  0x94   :  { %v10724_v25 = vcombine.low %v515_v12, %v517_v2  ;;  %v955_v13 = vunpack.i.h.s16 %v10676_v20  ;;  %v957_v55 = vunpack.i.h.s16 %v10689_v19  ;;  %v10730_v58 = vsel %vm280_vm5, %v10271_v28, %v263_v57 }
  0x95   :  { %13368 = vst [vmem:[#allocation6_spill] sm:$0xff] %v10730_v58  ;;  %v959_v60 = vunpack.i.h.s16 %v587_v23  ;;  %v963_v33 = vunpack.i.h.s16 %v10686_v24  ;;  %v590_v39 = vcombine.high %v586_v31, %v586_v31  ;;  %v597_v59 = vrot.slane %v10730_v58, %v10573_v16 }
  0x96   :  { %v961_v48 = vunpack.i.h.s16 %v589_v40  ;;  %v965_v3 = vunpack.i.h.s16 %v586_v31  ;;  %v10737_v34 = vsel %vm280_vm5, %v10247_v17, %v259_v52  ;;  %v10741_v26 = vsel %vm280_vm5, %v10290_v36, %v267_v56 }
  0x97   :  { %13369 = vst [vmem:[#allocation7_spill] sm:$0xff] %v10737_v34  ;;  %13370 = vst [vmem:[#allocation8_spill] sm:$0xff] %v10741_v26  ;;  %v967_v28 = vunpack.i.h.s16 %v588_v22  ;;  %v598_v57 = vcombine.high %v597_v59, %v597_v59  ;;  %v605_v21 = vrot.slane %v597_v59, %v10573_v16  ;;  %v969_v15 = vunpack.i.h.s16 %v590_v39 }
  0x98   :  { %v10744_v2 = vpack.i.b16 %v587_v23, %v957_v55  ;;  %v519_v10 = vcombine.high %v515_v12, %v515_v12  ;;  %v526_v44 = vrot.slane %v10737_v34, %v10573_v16  ;;  %v10750_v29 = vsel %vm280_vm5, %v10277_v30, %v265_v5  ;;  %v271_v23 = vpop.permute.xlu1 %270 }
  0x99   :  { %13371 = vst [vmem:[#allocation9_spill] sm:$0xff] %v10750_v29  ;;  %v612_v17 = vrot.slane %v598_v57, %v10573_v16  ;;  %v971_v52 = vunpack.i.h.s16 %v605_v21  ;;  %v10755_v36 = vrot.slane %v10741_v26, %v10573_v16  ;;  %v613_v56 = vcombine.high %v10750_v29, %v10750_v29 }
  0x9a   :  { %v10759_v12 = vpack.i.b16 %v589_v40, %v959_v60  ;;  %v9702_v55 = vpack.i.b16 %v605_v21, %v969_v15  ;;  %v527_v59 = vcombine.high %v526_v44, %v526_v44  ;;  %v534_v62 = vrot.slane %v526_v44, %v10573_v16  ;;  %v269_v60 = vpop.permute.xlu0 %268 }
  0x9b   :  { %v10762_v30 = vpack.i.b16 %v588_v22, %v965_v3  ;;  %v9703_v5 = vpack.i.b16 %v612_v17, %v971_v52  ;;  %v620_v57 = vrot.slane %v10750_v29, %v10573_v16  ;;  %v627_v53 = vrot.slane %v613_v56, %v10573_v16 }
  0x9c   :  { %v10768_v49 = vpack.i.b16 %v10686_v24, %v961_v48  ;;  %v541_v50 = vrot.slane %v527_v59, %v10573_v16  ;;  %v1284_v26 = vcombine.low %v519_v10, %v534_v62  ;;  %v10773_v40 = vsel %vm280_vm5, %v10317_v46, %v271_v23 }
  0x9d   :  { %13372 = vst [vmem:[#allocation10_spill] sm:$0xff] %v10773_v40  ;;  %v10775_v44 = vpack.i.b16 %v590_v39, %v967_v28  ;;  %v669_v22 = vcombine.high %v10755_v36, %v10755_v36  ;;  %v628_v3 = vcombine.high %v620_v57, %v620_v57  ;;  %v629_v21 = vcombine.high %v627_v53, %v627_v53 }
  0x9e   :  { %v10781_v24 = vpack.i.b16 %v586_v31, %v963_v33  ;;  %v1334_v48 = vcombine.low %v9702_v55, %v9703_v5  ;;  %v1293_v10 = vrot.slane %v10724_v25, %v10573_v16  ;;  %v9694_v46 = vpack.i.b16 %v10676_v20, %v541_v50  ;;  %v273_v58 = vpop.permute.xlu0 %272 }
  0x9f   :  { %v1300_v62 = vrot.slane %v1284_v26, %v10573_v16  ;;  %v739_v39 = vrot.slane %v10773_v40, %v10573_v16  ;;  %v10791_v28 = vsel %vm280_vm5, %v10295_v37, %v269_v60  ;;  %v9695_v17 = vpack.i.b16 %v10689_v19, %v955_v13  ;;  %v3832_v19 = vpop.permute.xlu1 %3831 }
  0xa0   :  { %13373 = vst [vmem:[#allocation11_spill] sm:$0xff] %v10791_v28  ;;  %v650_v25 = vrot.slane %v628_v3, %v10573_v16  ;;  %v10804_v26 = vrot.slane %v669_v22, %v10573_v16  ;;  %v657_v37 = vrot.slane %v629_v21, %v10573_v16  ;;  %v10808_v13 = vrot.slane %v1334_v48, %v10573_v16 }
  0xa1   :  { %v636_v52 = vrot.slane %v620_v57, %v10573_v16  ;;  %v643_v56 = vrot.slane %v627_v53, %v10573_v16  ;;  %v684_v23 = vcombine.high %v10791_v28, %v10791_v28  ;;  %v10814_v55 = vcombine.low %v9694_v46, %v9695_v17 }
  0xa2   :  { %v10816_v59 = vcombine.low %v1293_v10, %v1300_v62  ;;  %v740_v5 = vcombine.high %v739_v39, %v739_v39  ;;  %v10819_v60 = vrot.slane %v739_v39, %v10573_v16  ;;  %v691_v3 = vrot.slane %v10791_v28, %v10573_v16 }
  0xa3   :  { %v1335_v22 = vcombine.low %v636_v52, %v650_v25  ;;  %v698_v21 = vrot.slane %v684_v23, %v10573_v16  ;;  %v10826_v53 = vsel %vm1613_vm6, %v10630_v63, %v3832_v19  ;;  %v9726_v57 = vcombine.high %v636_v52, %v650_v25 }
  0xa4   :  { %13374 = vst [vmem:[#allocation12_spill] sm:$0xff] %v10819_v60  ;;  %v1382_v48 = vcombine.low %v643_v56, %v657_v37  ;;  %v9727_v46 = vcombine.high %v643_v56, %v657_v37  ;;  %v3911_v10 = vcombine.high %v10826_v53, %v10826_v53  ;;  %v699_v62 = vcombine.high %v691_v3, %v691_v3 }
  0xa5   :  { %v700_v17 = vcombine.high %v698_v21, %v698_v21  ;;  %v10831_v39 = vrot.slane %v691_v3, %v10573_v16  ;;  %v714_v50 = vrot.slane %v698_v21, %v10573_v16  ;;  %v754_v33 = vrot.slane %v740_v5, %v10573_v16 }
  0xa6   :  { %v1009_v63 = vunpack.i.h.s16 %v10819_v60  ;;  %v3918_v25 = vrot.slane %v10826_v53, %v10573_v16  ;;  %v10841_v37 = vrot.slane %v1335_v22, %v10573_v16  ;;  %v721_v19 = vrot.slane %v699_v62, %v10573_v16 }
  0xa7   :  { %v728_v52 = vrot.slane %v700_v17, %v10573_v16  ;;  %v3925_v56 = vrot.slane %v3911_v10, %v10573_v16  ;;  %v10847_v3 = vrot.slane %v9726_v57, %v10573_v16  ;;  %v10850_v21 = vrot.slane %v1382_v48, %v10573_v16 }
  0xa8   :  { %v10853_v5 = vrot.slane %v9727_v46, %v10573_v16  ;;  %v729_v23 = vcombine.high %v10831_v39, %v10831_v39  ;;  %v730_v22 = vcombine.high %v714_v50, %v714_v50  ;;  %v731_v31 = vcombine.high %v721_v19, %v721_v19 }
  0xa9   :  { %13375 = vst [vmem:[#allocation13_spill] sm:$0xff] %v10847_v3  ;;  %v993_v62 = vunpack.i.h.s16 %v10831_v39  ;;  %v1001_v15 = vunpack.i.h.s16 %v714_v50  ;;  %v10858_v17 = vpack.i.b16 %v754_v33, %v1009_v63  ;;  %v3926_v10 = vcombine.high %v3918_v25, %v3918_v25 }
  0xaa   :  { %13376 = vst [vmem:[#allocation14_spill] sm:$0xff] %v10853_v5  ;;  %v1138_v57 = vcombine.low %v10697_v35, %v10703_v7  ;;  %v9725_v48 = vcombine.high %v10697_v35, %v10703_v7  ;;  %v10864_v20 = vcombine.high %v728_v52, %v728_v52  ;;  %v995_v46 = vunpack.i.h.s16 %v721_v19 }
  0xab   :  { %v3927_v40 = vcombine.high %v3925_v56, %v3925_v56  ;;  %v3934_v28 = vrot.slane %v3918_v25, %v10573_v16  ;;  %v997_v29 = vunpack.i.h.s16 %v729_v23  ;;  %v1003_v34 = vunpack.i.h.s16 %v728_v52 }
  0xac   :  { %v9704_v33 = vpack.i.b16 %v10831_v39, %v10804_v26  ;;  %v13377_v63 = vcombine.low %v10694_v6, %v10681_v11  ;;  %v999_v61 = vunpack.i.h.s16 %v731_v31  ;;  %v1005_v60 = vunpack.i.h.s16 %v730_v22 }
  0xad   :  { %v10873_v35 = vpack.i.b16 %v721_v19, %v993_v62  ;;  %v10875_v7 = vpack.i.b16 %v728_v52, %v1001_v15  ;;  %v13378_v25 = vcombine.high %v10694_v6, %v10681_v11  ;;  %v1160_v5 = vrot.slane %v1138_v57, %v10573_v16 }
  0xae   :  { %v1146_v51 = vrot.slane %v13377_v63, %v10573_v16  ;;  %v1167_v26 = vrot.slane %v9725_v48, %v10573_v16  ;;  %v10885_v39 = vsel %vm280_vm5, %v10322_v47, %v273_v58  ;;  %v10888_v3 = vpack.i.b16 %v729_v23, %v995_v46 }
  0xaf   :  { %v1153_v1 = vrot.slane %v13378_v25, %v10573_v16  ;;  %13379 = vst [vmem:[#allocation15_spill] sm:$0xff] %v10885_v39  ;;  %v3948_v15 = vrot.slane %v3926_v10, %v10573_v16  ;;  %v10892_v19 = vrot.slane %v3927_v40, %v10573_v16  ;;  %v10894_v52 = vpack.i.b16 %v731_v31, %v997_v29 }
  0xb0   :  { %v1169_v6 = vcombine.low %v1160_v5, %v1167_v26  ;;  %v755_v62 = vcombine.high %v10885_v39, %v10885_v39  ;;  %v10898_v57 = vpack.i.b16 %v730_v22, %v1003_v34  ;;  %v10901_v47 = vpack.i.b16 %v10864_v20, %v1005_v60  ;;  %v275_v5 = vpop.permute.xlu1 %274 }
  0xb1   :  { %v1168_v11 = vcombine.low %v1146_v51, %v1153_v1  ;;  %v10904_v58 = vrot.slane %v3925_v56, %v10573_v16  ;;  %v762_v23 = vrot.slane %v10885_v39, %v10573_v16  ;;  %v10908_v40 = vpack.i.b16 %v714_v50, %v999_v61 }
  0xb2   :  { %v1183_v1 = vrot.slane %v1169_v6, %v10573_v16  ;;  %v769_v51 = vrot.slane %v755_v62, %v10573_v16  ;;  %v4428_v31 = vcombine.low %v3934_v28, %v3948_v15  ;;  %v9759_v34 = vcombine.high %v3934_v28, %v3948_v15 }
  0xb3   :  { %v1176_v29 = vrot.slane %v1168_v11, %v10573_v16  ;;  %v4430_v60 = vcombine.low %v10904_v58, %v10892_v19  ;;  %v1188_v56 = vcombine.low %v10668_v42, %v10670_v45  ;;  %v770_v10 = vcombine.high %v762_v23, %v762_v23 }
  0xb4   :  { %v1195_v61 = vrot.slane %v10639_v9, %v10573_v16  ;;  %v13380_v50 = vcombine.low %v10634_v32, %v10651_v0  ;;  %v13381_v28 = vrot.slane %v10755_v36, %v10573_v16  ;;  %v771_v42 = vcombine.high %v769_v51, %v769_v51 }
  0xb5   :  { %v1184_v22 = vcombine.low %v1176_v29, %v1183_v1  ;;  %v13382_v45 = vcombine.low %v10653_v43, %v10666_v4  ;;  %v9760_v32 = vcombine.high %v10904_v58, %v10892_v19  ;;  %v1216_v0 = vrot.slane %v1188_v56, %v10573_v16  ;;  %v10118_v4 = vld [vmem:[%s13317_s0 + $0x50] ss:$0 sps:$4 sm:$0x33]   ;;  %v279_v56 = vpop.permute.xlu1 %278 }
  0xb6   :  { %v1202_v48 = vrot.slane %v13380_v50, %v10573_v16  ;;  %v10926_v46 = vcombine.low %v13381_v28, %v9704_v33  ;;  %v277_v33 = vpop.permute.xlu0 %276  ;;  %v10941_v15 = vrot.slane %v4428_v31, %v10573_v16  ;;  %v778_v11 = vrot.slane %v762_v23, %v10573_v16  ;;  %v10102_v28 = vld [vmem:[%s13319_s5] sm:$0xff]  }
  0xb7   :  { %v1209_v26 = vrot.slane %v13382_v45, %v10573_v16  ;;  %9932 = vmatprep.mubr.msk.bf16.mxu0 %vm1613_vm6, %v1184_v22  ;;  %v785_v43 = vrot.slane %v769_v51, %v10573_v16  ;;  %v10949_v6 = vsel %vm280_vm5, %v10118_v4, %v275_v5  ;;  %v10952_v19 = vrot.slane %v9759_v34, %v10573_v16 }
  0xb8   :  { %v1217_v36 = vcombine.low %v1195_v61, %v1202_v48  ;;  %13383 = vst [vmem:[#allocation16_spill] sm:$0xff] %v10949_v6  ;;  %v10955_v62 = vrot.slane %v4430_v60, %v10573_v16  ;;  %v792_v58 = vrot.slane %v770_v10, %v10573_v16  ;;  %v799_v23 = vrot.slane %v771_v42, %v10573_v16  ;;  %v10119_v10 = vld [vmem:[%s13317_s0 + $0x54] sm:$0xff]  }
  0xb9   :  { %v1218_v29 = vcombine.low %v1209_v26, %v1216_v0  ;;  %v810_v51 = vrot.slane %v10949_v6, %v10573_v16  ;;  %v1266_v31 = vcombine.low %v10700_v8, %v10718_v38  ;;  %v13384_v60 = vrot.slane %v10715_v14, %v10573_v16  ;;  %v10120_v8 = vld [vmem:[%s13317_s0 + $0x5c] ss:$0 sps:$4 sm:$0x33]   ;;  %v5877_v63 = vpop.permute.xlu1 %5876 }
  0xba   :  { %v1225_v1 = vrot.slane %v1217_v36, %v10573_v16  ;;  %v13385_v5 = vrot.slane %v10683_v54, %v10573_v16  ;;  %v10975_v61 = vsel %vm280_vm5, %v10119_v10, %v277_v33  ;;  %v10981_v38 = vsel %vm280_vm5, %v10120_v8, %v279_v56  ;;  %v3836_v36 = vpop.permute.xlu0 %3835  ;;  %v10105_v10 = vld [vmem:[%s13319_s5 + $0x8] sm:$0xff]  }
  0xbb   :  { %v1232_v34 = vrot.slane %v1218_v29, %v10573_v16  ;;  %13386 = vst [vmem:[#allocation17_spill] sm:$0xff] %v10975_v61  ;;  %13387 = vst [vmem:[#allocation18_spill] sm:$0xff] %v10981_v38  ;;  %v800_v50 = vcombine.high %v778_v11, %v778_v11  ;;  %v801_v14 = vcombine.high %v785_v43, %v785_v43 }
  0xbc   :  { %v1267_v22 = vcombine.low %v13385_v5, %v13384_v60  ;;  %v1479_v48 = vcombine.low %v10858_v17, %v778_v11  ;;  %v1274_v54 = vrot.slane %v1266_v31, %v10573_v16  ;;  %v826_v26 = vcombine.high %v10975_v61, %v10975_v61 }
  0xbd   :  { %v1233_v42 = vcombine.low %v1225_v1, %v1232_v34  ;;  %v833_v0 = vrot.slane %v10975_v61, %v10573_v16  ;;  %v802_v33 = vcombine.high %v792_v58, %v792_v58  ;;  %v803_v4 = vcombine.high %v799_v23, %v799_v23 }
  0xbe   :  { %v1281_v45 = vrot.slane %v1267_v22, %v10573_v16  ;;  %v811_v29 = vcombine.high %v810_v51, %v810_v51  ;;  %v881_v17 = vrot.slane %v10981_v38, %v10573_v16  ;;  %v840_v1 = vrot.slane %v826_v26, %v10573_v16 }
  0xbf   :  { %9933 = vmatmul.mubr.msk.bf16.vlgmr.msra.gmra.mrb[0].mxu0 %vm1613_vm6, %v1233_v42  ;;  %v841_v31 = vcombine.high %v833_v0, %v833_v0  ;;  %v849_v56 = vrot.slane %v833_v0, %v10573_v16  ;;  %v818_v34 = vrot.slane %v810_v51, %v10573_v16  ;;  %v11004_v22 = vsel %vm1613_vm6, %v10591_v41, %v3836_v36 }
  0xc0   :  { %v1282_v11 = vcombine.low %v1274_v54, %v1281_v45  ;;  %9995 = vmatpush3.bf16.msra.mxu0 %v10102_v28  ;;  %v882_v60 = vcombine.high %v881_v17, %v881_v17  ;;  %v11000_v5 = vrot.slane %v881_v17, %v10573_v16  ;;  %v842_v8 = vcombine.high %v840_v1, %v840_v1 }
  0xc1   :  { %v856_v54 = vrot.slane %v840_v1, %v10573_v16  ;;  %v863_v51 = vrot.slane %v841_v31, %v10573_v16  ;;  %v871_v28 = vcombine.high %v849_v56, %v849_v56  ;;  %v11013_v42 = vrot.slane %v9760_v32, %v10573_v16 }
  0xc2   :  { %9936 = vmatprep.mubr.msk.bf16.mxu0 %vm1613_vm6, %v1282_v11  ;;  %v11015_v45 = vcombine.low %v792_v58, %v800_v50  ;;  %v825_v41 = vrot.slane %v811_v29, %v10573_v16  ;;  %v1031_v26 = vunpack.i.h.s16 %v849_v56  ;;  %v13388_v0 = vmov 0.0  }
  0xc3   :  { %9996 = vmatprep.subr.bf16.mxu0 %v13388_v0  ;;  %v11020_v36 = vrot.slane %v1479_v48, %v10573_v16  ;;  %v870_v17 = vrot.slane %v842_v8, %v10573_v16  ;;  %v873_v11 = vcombine.high %v863_v51, %v863_v51  ;;  %v3974_v1 = vcombine.high %v11004_v22, %v11004_v22  ;;  %v10107_v48 = vld [vmem:[%s13319_s5 + $0x10] sm:$0xff]  }
  0xc4   :  { %v11025_v31 = vcombine.low %v802_v33, %v785_v43  ;;  %v11027_v32 = vcombine.low %v799_v23, %v801_v14  ;;  %v11029_v58 = vcombine.low %v803_v4, %v818_v34  ;;  %v896_v50 = vrot.slane %v882_v60, %v10573_v16  ;;  %9997 = vmatpush3.bf16.msra.mxu0 %v10105_v10 }
  0xc5   :  { %v11035_v29 = vcombine.high %v856_v54, %v856_v54  ;;  %v1033_v8 = vunpack.i.h.s16 %v863_v51  ;;  %v1035_v9 = vunpack.i.h.s16 %v871_v28  ;;  %v1047_v25 = vunpack.i.h.s16 %v11000_v5  ;;  %9998 = vmatprep.subr.bf16.mxu0 %v13388_v0 }
  0xc6   :  { %v1039_v43 = vunpack.i.h.s16 %v856_v54  ;;  %v9714_v23 = vpack.i.b16 %v849_v56, %v825_v41  ;;  %v9715_v14 = vpack.i.b16 %v863_v51, %v1031_v26  ;;  %v11039_v33 = vcombine.high %v870_v17, %v870_v17  ;;  %v10109_v26 = vld [vmem:[%s13319_s5 + $0x18] sm:$0xff]  }
  0xc7   :  { %v1037_v34 = vunpack.i.h.s16 %v873_v11  ;;  %v3981_v60 = vrot.slane %v11004_v22, %v10573_v16  ;;  %v3988_v10 = vrot.slane %v3974_v1, %v10573_v16  ;;  %v1041_v56 = vunpack.i.h.s16 %v870_v17 }
  0xc8   :  { %v13389_v51 = vcombine.low %v10744_v2, %v10759_v12  ;;  %9999 = vmatpush3.bf16.msra.mxu0 %v10107_v48  ;;  %v1043_v1 = vunpack.i.h.s16 %v11035_v29  ;;  %v11058_v4 = vpack.i.b16 %v871_v28, %v1033_v8  ;;  %v11060_v6 = vpack.i.b16 %v873_v11, %v1035_v9 }
  0xc9   :  { %v11062_v38 = vpack.i.b16 %v896_v50, %v1047_v25  ;;  %10000 = vmatprep.subr.bf16.mxu0 %v13388_v0  ;;  %v11065_v61 = vpack.i.b16 %v870_v17, %v1039_v43  ;;  %v11067_v39 = vcombine.low %v9714_v23, %v9715_v14  ;;  %v1045_v2 = vunpack.i.h.s16 %v11039_v33  ;;  %v5881_v14 = vpop.permute.xlu1 %5880 }
  0xca   :  { %v1314_v41 = vrot.slane %v13389_v51, %v10573_v16  ;;  %v13390_v12 = vrot.slane %v10814_v55, %v10573_v16  ;;  %v11073_v51 = vpack.i.b16 %v856_v54, %v1037_v34  ;;  %v3989_v28 = vcombine.high %v3981_v60, %v3981_v60 }
  0xcb   :  { %v3990_v8 = vcombine.high %v3988_v10, %v3988_v10  ;;  %v13391_v25 = vcombine.low %v10768_v49, %v10781_v24  ;;  %v11080_v17 = vpack.i.b16 %v11035_v29, %v1041_v56  ;;  %v1323_v11 = vrot.slane %v10816_v59, %v10573_v16  ;;  %v11098_v59 = vpop.permute.xlu0 %3833 }
  0xcc   :  { %v1316_v48 = vcombine.low %v13390_v12, %v1314_v41  ;;  %v13392_v55 = vcombine.low %v10762_v30, %v10775_v44  ;;  %10001 = vmatpush3.bf16.msra.mxu0 %v10109_v26  ;;  %v3997_v49 = vrot.slane %v3981_v60, %v10573_v16  ;;  %v1365_v24 = vcombine.low %v10808_v13, %v10841_v37 }
  0xcd   :  { %v1342_v9 = vrot.slane %v13391_v25, %v10573_v16  ;;  %v11096_v23 = vsel %vm4887_vm7, %v10826_v53, %v5877_v63  ;;  %v9722_v34 = vpack.i.b16 %v11000_v5, %v1045_v2  ;;  %v4004_v30 = vrot.slane %v3988_v10, %v10573_v16 }
  0xce   :  { %v1330_v50 = vrot.slane %v1316_v48, %v10573_v16  ;;  %v1349_v54 = vrot.slane %v13392_v55, %v10573_v16  ;;  %v4011_v41 = vrot.slane %v3989_v28, %v10573_v16  ;;  %v11104_v60 = vrot.slane %v3990_v8, %v10573_v16 }
  0xcf   :  { %v1379_v13 = vrot.slane %v1365_v24, %v10573_v16  ;;  %v5980_v53 = vcombine.high %v11096_v23, %v11096_v23  ;;  %v5987_v63 = vrot.slane %v11096_v23, %v10573_v16  ;;  %v3866_v5 = vsel %vm1613_vm6, %v10581_v18, %v11098_v59 }
  0xd0   :  { %v1331_v44 = vcombine.low %v1323_v11, %v1330_v50  ;;  %v1364_v56 = vcombine.low %v1342_v9, %v1349_v54  ;;  %v11118_v10 = vsel %vm4887_vm7, %v11004_v22, %v5881_v14  ;;  %v4019_v26 = vcombine.high %v3997_v49, %v3997_v49 }
  0xd1   :  { %13393 = vst [vmem:[#allocation19_spill] sm:$0xff] %v11118_v10  ;;  %v5994_v2 = vrot.slane %v5980_v53, %v10573_v16  ;;  %v3966_v12 = vrot.slane %v3866_v5, %v10573_v16  ;;  %v6043_v48 = vcombine.high %v11118_v10, %v11118_v10  ;;  %v1578_v28 = vcombine.low %v9722_v34, %v11062_v38 }
  0xd2   :  { %9937 = vmatmul.mubr.msk.bf16.gmra.mrb[4].mxu0 %vm1613_vm6, %v1331_v44  ;;  %v1372_v37 = vrot.slane %v1364_v56, %v10573_v16  ;;  %v5995_v25 = vcombine.high %v5987_v63, %v5987_v63  ;;  %v6050_v9 = vrot.slane %v11118_v10, %v10573_v16  ;;  %v4021_v18 = vcombine.high %v4011_v41, %v4011_v41 }
  0xd3   :  { %v5996_v11 = vcombine.high %v5994_v2, %v5994_v2  ;;  %v3973_v22 = vrot.slane %v3966_v12, %v10573_v16  ;;  %v6057_v50 = vrot.slane %v6043_v48, %v10573_v16  ;;  %v6003_v55 = vrot.slane %v5987_v63, %v10573_v16 }
  0xd4   :  { %v1380_v8 = vcombine.low %v1372_v37, %v1379_v13  ;;  %v6017_v54 = vrot.slane %v5995_v25, %v10573_v16  ;;  %v6058_v24 = vcombine.high %v6050_v9, %v6050_v9  ;;  %v11133_v38 = vrot.slane %v6050_v9, %v10573_v16  ;;  %v3840_v25 = vpop.permute.xlu0 %3839 }
  0xd5   :  { %v4020_v14 = vcombine.high %v4004_v30, %v4004_v30  ;;  %v6010_v34 = vrot.slane %v5994_v2, %v10573_v16  ;;  %v6024_v44 = vrot.slane %v5996_v11, %v10573_v16  ;;  %v4477_v56 = vcombine.low %v3973_v22, %v3997_v49 }
  0xd6   :  { %9940 = vmatprep.mubr.msk.bf16.mxu0 %vm1613_vm6, %v1380_v8  ;;  %v4478_v13 = vcombine.low %v4011_v41, %v4019_v26  ;;  %v6703_v53 = vcombine.low %v6003_v55, %v6017_v54  ;;  %v9816_v37 = vcombine.high %v6003_v55, %v6017_v54  ;;  %v11138_v5 = vrot.slane %v6058_v24, %v10573_v16 }
  0xd7   :  { %v6705_v12 = vcombine.low %v6010_v34, %v6024_v44  ;;  %v9817_v63 = vcombine.high %v6010_v34, %v6024_v44  ;;  %v6059_v48 = vcombine.high %v6057_v50, %v6057_v50  ;;  %v6073_v8 = vrot.slane %v6057_v50, %v10573_v16 }
  0xd8   :  { %v11141_v9 = vcombine.low %v4021_v18, %v4004_v30  ;;  %v6713_v43 = vrot.slane %v6703_v53, %v10573_v16  ;;  %v6720_v2 = vrot.slane %v9816_v37, %v10573_v16  ;;  %v6088_v49 = vcombine.high %v11133_v38, %v11133_v38 }
  0xd9   :  { %v11152_v26 = vpack.i.b16 %v11039_v33, %v1043_v1  ;;  %v4487_v11 = vrot.slane %v4477_v56, %v10573_v16  ;;  %v6090_v30 = vcombine.high %v11138_v5, %v11138_v5  ;;  %v11158_v18 = vrot.slane %v1578_v28, %v10573_v16 }
  0xda   :  { %v6727_v22 = vrot.slane %v6705_v12, %v10573_v16  ;;  %v6734_v50 = vrot.slane %v9817_v63, %v10573_v16  ;;  %v11164_v55 = vsel %vm1613_vm6, %v10645_v27, %v3840_v25  ;;  %v11167_v29 = vcombine.low %v11104_v60, %v4020_v14  ;;  %v5804_v27 = vpop.permute.xlu1 %5803 }
  0xdb   :  { %v4494_v33 = vrot.slane %v4478_v13, %v10573_v16  ;;  %v11171_v1 = vrot.slane %v6059_v48, %v10573_v16  ;;  %v11173_v54 = vcombine.high %v6073_v8, %v6073_v8  ;;  %v6735_v24 = vcombine.low %v6713_v43, %v6720_v2  ;;  %v13394_v43 = vld [vmem:[#allocation13_spill] sm:$0xff] }
  0xdc   :  { %v6504_v34 = vunpack.i.h.s16 %v11138_v5  ;;  %v6506_v44 = vunpack.i.h.s16 %v6088_v49  ;;  %v6508_v14 = vunpack.i.h.s16 %v6090_v30  ;;  %v4037_v13 = vcombine.high %v11164_v55, %v11164_v55 }
  0xdd   :  { %v11178_v56 = vcombine.low %v4487_v11, %v4494_v33  ;;  %v6736_v53 = vcombine.low %v6727_v22, %v6734_v50  ;;  %v4044_v37 = vrot.slane %v11164_v55, %v10573_v16  ;;  %v1412_v12 = vrot.slane %v10926_v46, %v10573_v16  ;;  %v11192_v33 = vpop.permute.xlu0 %3837  ;;  %v13395_v46 = vld [vmem:[#allocation14_spill] sm:$0xff] }
  0xde   :  { %v1413_v63 = vcombine.low %v13394_v43, %v10850_v21  ;;  %v6510_v48 = vunpack.i.h.s16 %v6073_v8  ;;  %v6512_v25 = vunpack.i.h.s16 %v11171_v1  ;;  %v4051_v11 = vrot.slane %v4037_v13, %v10573_v16 }
  0xdf   :  { %v11195_v22 = vrot.slane %v6735_v24, %v10573_v16  ;;  %v11197_v50 = vpack.i.b16 %v6088_v49, %v6504_v34  ;;  %v11199_v28 = vpack.i.b16 %v6090_v30, %v6506_v44  ;;  %v1414_v41 = vcombine.low %v13395_v46, %v1412_v12  ;;  %v13396_v24 = vld [vmem:[#allocation3_spill] sm:$0xff] }
  0xe0   :  { %v11202_v21 = vpack.i.b16 %v6073_v8, %v6508_v14  ;;  %v4052_v43 = vcombine.high %v4044_v37, %v4044_v37  ;;  %v4460_v2 = vcombine.low %v10941_v15, %v10952_v19  ;;  %v4461_v13 = vcombine.low %v10955_v62, %v11013_v42  ;;  %v10121_v46 = vld [vmem:[%s13317_s0 + $0x8] ss:$0 sps:$4 sm:$0x33]  }
  0xe1   :  { %v11209_v10 = vrot.slane %v6736_v53, %v10573_v16  ;;  %v1421_v49 = vrot.slane %v1413_v63, %v10573_v16  ;;  %v1428_v30 = vrot.slane %v1414_v41, %v10573_v16  ;;  %v3870_v34 = vsel %vm1613_vm6, %v13396_v24, %v11192_v33  ;;  %v13398_v53 = vld [vmem:[#allocation12_spill] sm:$0xff]  ;;  %v3844_v24 = vpop.permute.xlu0 %3843 }
  0xe2   :  { %v4053_v8 = vcombine.high %v4051_v11, %v4051_v11  ;;  %v4468_v44 = vrot.slane %v4460_v2, %v10573_v16  ;;  %v4475_v14 = vrot.slane %v4461_v13, %v10573_v16  ;;  %v4029_v15 = vrot.slane %v3870_v34, %v10573_v16  ;;  %v10110_v34 = vld [vmem:[%s13321_s7 + $0x8] sm:$0xff]  }
  0xe3   :  { %v11220_v19 = vpack.i.b16 %v11171_v1, %v6510_v48  ;;  %v11223_v62 = vpack.i.b16 %v11173_v54, %v6512_v25  ;;  %v1429_v42 = vcombine.low %v1421_v49, %v1428_v30  ;;  %v13397_v41 = vunpack.i.h.s16 %v10864_v20 }
  0xe4   :  { %v6753_v63 = vcombine.low %v11197_v50, %v11199_v28  ;;  %v4074_v2 = vrot.slane %v4052_v43, %v10573_v16  ;;  %v5909_v48 = vsel %vm280_vm5, %v10121_v46, %v5804_v27  ;;  %v4476_v13 = vcombine.low %v4468_v44, %v4475_v14  ;;  %v5879_v43 = vpop.permute.xlu1 %5878 }
  0xe5   :  { %v9712_v12 = vpack.i.b16 %v13398_v53, %v13397_v41  ;;  %v4060_v25 = vrot.slane %v4044_v37, %v10573_v16  ;;  %v11237_v49 = vrot.slane %v4051_v11, %v10573_v16  ;;  %9941 = vmatmul.mubr.msk.bf16.gmra.mrb[8].mxu0 %vm1613_vm6, %v1429_v42  ;;  %v1432_v20 = vcombine.low %v10875_v7, %v10898_v57 }
  0xe6   :  { %v11247_v27 = vrot.slane %v4053_v8, %v10573_v16  ;;  %9959 = vmatmul.mubr.msk.bf16.vlgmr.msra.gmra.mrb[0].mxu1 %vm4887_vm7, %v4476_v13  ;;  %v4022_v37 = vcombine.high %v11104_v60, %v11104_v60  ;;  %v4036_v11 = vrot.slane %v4029_v15, %v10573_v16  ;;  %v13399_v7 = vcombine.low %v10873_v35, %v10888_v3  ;;  %v13401_v35 = vld [vmem:[#allocation5_spill] sm:$0xff] }
  0xe7   :  { %v1433_v30 = vcombine.low %v10901_v47, %v9712_v12  ;;  %v13400_v47 = vcombine.low %v10894_v52, %v10908_v40  ;;  %v1454_v8 = vrot.slane %v1432_v20, %v10573_v16  ;;  %v5924_v42 = vsel %vm1613_vm6, %v5909_v48, %v11098_v59  ;;  %9962 = vmatprep.mubr.msk.bf16.mxu1 %vm10136_vm3, %v13388_v0  ;;  %v13402_v52 = vld [vmem:[#allocation4_spill] sm:$0xff] }
  0xe8   :  { %v1440_v57 = vrot.slane %v13399_v7, %v10573_v16  ;;  %v4527_v60 = vcombine.low %v4060_v25, %v4074_v2  ;;  %v9761_v15 = vcombine.high %v4060_v25, %v4074_v2  ;;  %v5935_v3 = vsel %vm4887_vm7, %v5924_v42, %v5879_v43  ;;  %10039 = vmatpush3.bf16.msra.mxu1 %v13402_v52  ;;  %v10111_v2 = vld [vmem:[%s13321_s7 + $0x10] sm:$0xff]  }
  0xe9   :  { %v1447_v44 = vrot.slane %v13400_v47, %v10573_v16  ;;  %v1461_v14 = vrot.slane %v1433_v30, %v10573_v16  ;;  %v11270_v41 = vsel %vm1613_vm6, %v13401_v35, %v3844_v24  ;;  %v6035_v12 = vrot.slane %v5935_v3, %v10573_v16  ;;  %10040 = vmatprep.subr.bf16.mxu1 %v10110_v34  ;;  %v10112_v3 = vld [vmem:[%s13321_s7 + $0x18] sm:$0xff]  }
  0xea   :  { %v4100_v59 = vcombine.high %v11270_v41, %v11270_v41  ;;  %v4529_v46 = vcombine.low %v11237_v49, %v11247_v27  ;;  %v4107_v48 = vrot.slane %v11270_v41, %v10573_v16  ;;  %v1510_v13 = vrot.slane %v11027_v32, %v10573_v16 }
  0xeb   :  { %v1462_v40 = vcombine.low %v1440_v57, %v1447_v44  ;;  %v1463_v53 = vcombine.low %v1454_v8, %v1461_v14  ;;  %v13403_v25 = vrot.slane %v11015_v45, %v10573_v16  ;;  %v11289_v30 = vcombine.low %v4022_v37, %v4036_v11  ;;  %v5806_v57 = vpop.permute.xlu1 %5805  ;;  %v11302_v37 = vpop.permute.xlu0 %3841 }
  0xec   :  { %v6042_v7 = vrot.slane %v6035_v12, %v10573_v16  ;;  %v6751_v47 = vcombine.low %v11195_v22, %v11209_v10  ;;  %v6754_v32 = vcombine.low %v11202_v21, %v11220_v19  ;;  %v4114_v44 = vrot.slane %v4100_v59, %v10573_v16  ;;  %10041 = vmatpush3.bf16.msra.mxu1 %v10110_v34 }
  0xed   :  { %v1511_v20 = vcombine.low %v11020_v36, %v13403_v25  ;;  %v1470_v43 = vrot.slane %v1462_v40, %v10573_v16  ;;  %v1477_v24 = vrot.slane %v1463_v53, %v10573_v16  ;;  %v13404_v45 = vrot.slane %v11025_v31, %v10573_v16  ;;  %10042 = vmatprep.subr.bf16.mxu1 %v10111_v2 }
  0xee   :  { %v11305_v11 = vrot.slane %v4527_v60, %v10573_v16  ;;  %v9762_v8 = vcombine.high %v11237_v49, %v11247_v27  ;;  %v4115_v42 = vcombine.high %v4107_v48, %v4107_v48  ;;  %v9780_v35 = vpack.i.b16 %v11133_v38, %v6042_v7 }
  0xef   :  { %v1512_v36 = vcombine.low %v13404_v45, %v1510_v13  ;;  %v1478_v14 = vcombine.low %v1470_v43, %v1477_v24  ;;  %v11314_v31 = vrot.slane %v4107_v48, %v10573_v16  ;;  %v1519_v34 = vrot.slane %v1511_v20, %v10573_v16  ;;  %v5883_v43 = vpop.permute.xlu1 %5882 }
  0xf0   :  { %v11319_v52 = vrot.slane %v9761_v15, %v10573_v16  ;;  %v11322_v49 = vrot.slane %v4529_v46, %v10573_v16  ;;  %v4536_v27 = vrot.slane %v11289_v30, %v10573_v16  ;;  %v1545_v40 = vrot.slane %v11067_v39, %v10573_v16  ;;  %v10122_v15 = vld [vmem:[%s13317_s0 + $0x14] ss:$0 sps:$4 sm:$0x33]   ;;  %10043 = vmatpush3.bf16.msra.mxu1 %v10111_v2  ;;  %v10113_v2 = vld [vmem:[%s13321_s7 + $0x20] sm:$0xff]  }
  0xf1   :  { %v1526_v60 = vrot.slane %v1512_v36, %v10573_v16  ;;  %9944 = vmatprep.mubr.msk.bf16.mxu0 %vm1613_vm6, %v1478_v14  ;;  %v13405_v53 = vunpack.i.h.s16 %v11133_v38  ;;  %v4116_v59 = vcombine.high %v4114_v44, %v4114_v44  ;;  %v5911_v46 = vsel %vm280_vm5, %v10122_v15, %v5806_v57  ;;  %10044 = vmatprep.subr.bf16.mxu1 %v10112_v3  ;;  %v13409_v57 = vld [vmem:[#allocation7_spill] sm:$0xff] }
  0xf2   :  { %v4130_v13 = vrot.slane %v4114_v44, %v10573_v16  ;;  %v13406_v25 = vcombine.low %v11058_v4, %v11060_v6  ;;  %v13407_v38 = vcombine.low %v11073_v51, %v11065_v61  ;;  %v13408_v20 = vrot.slane %v11029_v58, %v10573_v16  ;;  %v5885_v58 = vpop.permute.xlu0 %5884 }
  0xf3   :  { %v9781_v12 = vpack.i.b16 %v11138_v5, %v13405_v53  ;;  %v1527_v48 = vcombine.low %v1519_v34, %v1526_v60  ;;  %v4137_v6 = vrot.slane %v4115_v42, %v10573_v16  ;;  %v4145_v4 = vcombine.high %v11314_v31, %v11314_v31 }
  0xf4   :  { %v1552_v39 = vrot.slane %v13406_v25, %v10573_v16  ;;  %v1559_v5 = vrot.slane %v13407_v38, %v10573_v16  ;;  %v1560_v30 = vcombine.low %v13408_v20, %v1545_v40  ;;  %v4508_v61 = vrot.slane %v11167_v29, %v10573_v16  ;;  %10045 = vmatpush3.bf16.msra.mxu1 %v10112_v3  ;;  %v5889_v38 = vpop.permute.xlu1 %5888 }
  0xf5   :  { %v11351_v24 = vcombine.low %v9780_v35, %v9781_v12  ;;  %9945 = vmatmul.mubr.msk.bf16.gmra.mrb[12].mxu0 %vm1613_vm6, %v1527_v48  ;;  %v4517_v7 = vrot.slane %v11178_v56, %v10573_v16  ;;  %v3874_v44 = vsel %vm1613_vm6, %v13409_v57, %v11302_v37  ;;  %v5925_v45 = vsel %vm1613_vm6, %v5911_v46, %v11192_v33 }
  0xf6   :  { %v1561_v51 = vcombine.low %v1552_v39, %v1559_v5  ;;  %v1568_v36 = vrot.slane %v1560_v30, %v10573_v16  ;;  %v13410_v14 = vrot.slane %v11141_v9, %v10573_v16  ;;  %v4092_v29 = vrot.slane %v3874_v44, %v10573_v16  ;;  %10046 = vmatprep.subr.bf16.mxu1 %v10113_v2 }
  0xf7   :  { %v5939_v35 = vsel %vm4887_vm7, %v5925_v45, %v5883_v43  ;;  %v6091_v34 = vcombine.high %v11171_v1, %v11171_v1  ;;  %v11378_v33 = vsel %vm4887_vm7, %v11164_v55, %v5885_v58  ;;  %v11387_v12 = vrot.slane %v4116_v59, %v10573_v16 }
  0xf8   :  { %v4510_v42 = vcombine.low %v13410_v14, %v4508_v61  ;;  %v1575_v56 = vrot.slane %v1561_v51, %v10573_v16  ;;  %v6098_v60 = vrot.slane %v5939_v35, %v10573_v16  ;;  %v4099_v40 = vrot.slane %v4092_v29, %v10573_v16  ;;  %10047 = vmatpush3.bf16.msra.mxu1 %v10113_v2 }
  0xf9   :  { %v6106_v53 = vcombine.high %v11378_v33, %v11378_v33  ;;  %v6113_v3 = vrot.slane %v11378_v33, %v10573_v16  ;;  %v4146_v1 = vcombine.high %v4130_v13, %v4130_v13  ;;  %v4147_v55 = vcombine.high %v4137_v6, %v4137_v6  ;;  %10064 = vmatprep.subr.bf16.mxu1 %v13388_v0 }
  0xfa   :  { %v4524_v9 = vrot.slane %v4510_v42, %v10573_v16  ;;  %v1576_v48 = vcombine.low %v1568_v36, %v1575_v56  ;;  %v6105_v15 = vrot.slane %v6098_v60, %v10573_v16  ;;  %v11392_v5 = vrot.slane %v9762_v8, %v10573_v16  ;;  %v5808_v42 = vpop.permute.xlu1 %5807 }
  0xfb   :  { %v6120_v25 = vrot.slane %v6106_v53, %v10573_v16  ;;  %v6121_v39 = vcombine.high %v6113_v3, %v6113_v3  ;;  %v6516_v20 = vunpack.i.h.s16 %v6091_v34  ;;  %v6129_v59 = vrot.slane %v6113_v3, %v10573_v16 }
  0xfc   :  { %v4525_v46 = vcombine.low %v4517_v7, %v4524_v9  ;;  %9948 = vmatprep.mubr.msk.bf16.mxu0 %vm1613_vm6, %v1576_v48  ;;  %v1577_v30 = vcombine.low %v11080_v17, %v11152_v26  ;;  %v4558_v43 = vcombine.low %v4536_v27, %v11305_v11  ;;  %v11399_v61 = vcombine.low %v4137_v6, %v4145_v4  ;;  %v3848_v6 = vpop.permute.xlu0 %3847 }
  0xfd   :  { %v4576_v58 = vcombine.low %v4099_v40, %v11314_v31  ;;  %v6143_v2 = vrot.slane %v6121_v39, %v10573_v16  ;;  %v6762_v8 = vrot.slane %v11351_v24, %v10573_v16  ;;  %v9788_v51 = vpack.i.b16 %v6105_v15, %v6516_v20 }
  0xfe   :  { %9963 = vmatmul.mubr.msk.bf16.gmra.mrb[4].mxu1 %vm4887_vm7, %v4525_v46  ;;  %v1585_v7 = vrot.slane %v1577_v30, %v10573_v16  ;;  %v11409_v57 = vsel %vm4887_vm7, %v11270_v41, %v5889_v38  ;;  %v11413_v17 = vcombine.low %v4147_v55, %v4130_v13  ;;  %v11416_v26 = vcombine.low %v11387_v12, %v4146_v1 }
  0xff   :  { %9966 = vmatprep.mubr.msk.bf16.mxu1 %vm10136_vm3, %v13388_v0  ;;  %v13411_v11 = vunpack.i.h.s16 %v11173_v54  ;;  %v6122_v27 = vcombine.high %v6120_v25, %v6120_v25  ;;  %v6136_v4 = vrot.slane %v6120_v25, %v10573_v16  ;;  %v6151_v41 = vcombine.high %v6129_v59, %v6129_v59 }
 0x100   :  { %v1593_v44 = vcombine.low %v1585_v7, %v11158_v18  ;;  %v6169_v13 = vcombine.high %v11409_v57, %v11409_v57  ;;  %v11428_v45 = vrot.slane %v4576_v58, %v10573_v16  ;;  %v6153_v36 = vcombine.high %v6143_v2, %v6143_v2  ;;  %v11457_v25 = vpop.permute.xlu0 %3845 }
 0x101   :  { %v11420_v31 = vpack.i.b16 %v6091_v34, %v13411_v11  ;;  %v6176_v54 = vrot.slane %v11409_v57, %v10573_v16  ;;  %v4559_v14 = vcombine.low %v11319_v52, %v11322_v49  ;;  %v6801_v29 = vcombine.low %v9788_v51, %v6129_v59  ;;  %v13412_v49 = vld [vmem:[#allocation9_spill] sm:$0xff] }
 0x102   :  { %v1600_v35 = vrot.slane %v1593_v44, %v10573_v16  ;;  %v6183_v56 = vrot.slane %v6169_v13, %v10573_v16  ;;  %v4566_v18 = vrot.slane %v4558_v43, %v10573_v16  ;;  %v11438_v34 = vrot.slane %v6122_v27, %v10573_v16 }
 0x103   :  { %v6184_v60 = vcombine.high %v6176_v54, %v6176_v54  ;;  %v11441_v9 = vrot.slane %v6176_v54, %v10573_v16  ;;  %v4573_v40 = vrot.slane %v4559_v14, %v10573_v16  ;;  %v6152_v53 = vcombine.high %v6136_v4, %v6136_v4 }
 0x104   :  { %v11444_v3 = vcombine.low %v6143_v2, %v6151_v41  ;;  %9949 = vmatmul.mubr.msk.bf16.gmra.mrb[16].mxu0 %vm1613_vm6, %v1600_v35  ;;  %v6185_v52 = vcombine.high %v6183_v56, %v6183_v56  ;;  %v11449_v1 = vsel %vm1613_vm6, %v13412_v49, %v3848_v6  ;;  %v11451_v48 = vcombine.low %v6153_v36, %v6136_v4 }
 0x105   :  { %v6199_v15 = vrot.slane %v6183_v56, %v10573_v16  ;;  %v6206_v55 = vrot.slane %v6184_v60, %v10573_v16  ;;  %v4574_v46 = vcombine.low %v4566_v18, %v4573_v40  ;;  %10002 = vmatprep.mubr.msk.bf16.mxu0 %vm10136_vm3, %v13388_v0  ;;  %v4599_v39 = vrot.slane %v11399_v61, %v10573_v16  ;;  %v3852_v61 = vpop.permute.xlu1 %3851  ;;  %v5887_v56 = vpop.permute.xlu0 %5886  ;;  %v13413_v40 = vld [vmem:[#allocation6_spill] sm:$0xff] }
 0x106   :  { %v4606_v38 = vrot.slane %v11413_v17, %v10573_v16  ;;  %v6755_v20 = vcombine.low %v11223_v62, %v11420_v31  ;;  %v4163_v59 = vcombine.high %v11449_v1, %v11449_v1  ;;  %v4607_v30 = vcombine.low %v11392_v5, %v11428_v45 }
 0x107   :  { %v6214_v43 = vcombine.high %v11441_v9, %v11441_v9  ;;  %v6216_v58 = vcombine.high %v6206_v55, %v6206_v55  ;;  %v6536_v2 = vunpack.i.h.s16 %v11441_v9  ;;  %9967 = vmatmul.mubr.msk.bf16.gmra.mrb[8].mxu1 %vm4887_vm7, %v4574_v46  ;;  %v11474_v51 = vrot.slane %v6801_v29, %v10573_v16  ;;  %v10123_v29 = vld [vmem:[%s13317_s0 + $0x20] ss:$0 sps:$4 sm:$0x33]  }
 0x108   :  { %v11477_v7 = vrot.slane %v6185_v52, %v10573_v16  ;;  %v4170_v17 = vrot.slane %v11449_v1, %v10573_v16  ;;  %v4177_v5 = vrot.slane %v4163_v59, %v10573_v16  ;;  %9970 = vmatprep.mubr.msk.bf16.mxu1 %vm10136_vm3, %v13388_v0  ;;  %v11485_v11 = vcombine.low %v11438_v34, %v6152_v53 }
 0x109   :  { %v6818_v27 = vrot.slane %v11444_v3, %v10573_v16  ;;  %v6825_v6 = vrot.slane %v11451_v48, %v10573_v16  ;;  %v6544_v4 = vunpack.i.h.s16 %v6199_v15  ;;  %v6538_v41 = vunpack.i.h.s16 %v6206_v55  ;;  %v5810_v59 = vpop.permute.xlu1 %5809 }
 0x10a   :  { %v6542_v44 = vunpack.i.h.s16 %v6216_v58  ;;  %v4178_v13 = vcombine.high %v4170_v17, %v4170_v17  ;;  %v4179_v45 = vcombine.high %v4177_v5, %v4177_v5  ;;  %v11491_v36 = vcombine.high %v6199_v15, %v6199_v15 }
 0x10b   :  { %v6540_v54 = vunpack.i.h.s16 %v6214_v43  ;;  %v11493_v14 = vpack.i.b16 %v6206_v55, %v6536_v2  ;;  %v5913_v35 = vsel %vm280_vm5, %v10123_v29, %v5808_v42  ;;  %v6546_v18 = vunpack.i.h.s16 %v11477_v7  ;;  %v13414_v42 = vld [vmem:[#allocation11_spill] sm:$0xff] }
 0x10c   :  { %v4200_v60 = vrot.slane %v4178_v13, %v10573_v16  ;;  %v3878_v53 = vsel %vm1613_vm6, %v13413_v40, %v11457_v25  ;;  %v4186_v52 = vrot.slane %v4170_v17, %v10573_v16  ;;  %v4207_v49 = vrot.slane %v4179_v45, %v10573_v16  ;;  %10003 = vmatmul.mubr.msk.bf16.vlgmr.msra.gmra.mrb[20].mxu0 %vm7143_vm8, %v6751_v47 }
 0x10d   :  { %v4155_v55 = vrot.slane %v3878_v53, %v10573_v16  ;;  %v11513_v46 = vsel %vm1613_vm6, %v13414_v42, %v3852_v61  ;;  %v11515_v2 = vpack.i.b16 %v6214_v43, %v6538_v41  ;;  %v11517_v13 = vpack.i.b16 %v6199_v15, %v6542_v44  ;;  %10006 = vmatprep.mubr.msk.bf16.mxu0 %vm10136_vm3, %v13388_v0  ;;  %v11538_v44 = vpop.permute.xlu0 %3849 }
 0x10e   :  { %v11520_v17 = vpack.i.b16 %v11477_v7, %v6544_v4  ;;  %v4608_v45 = vcombine.low %v4599_v39, %v4606_v38  ;;  %v4193_v10 = vrot.slane %v4177_v5, %v10573_v16  ;;  %v4626_v22 = vcombine.low %v4186_v52, %v4200_v60 }
 0x10f   :  { %v4162_v47 = vrot.slane %v4155_v55, %v10573_v16  ;;  %v4233_v61 = vrot.slane %v11513_v46, %v10573_v16  ;;  %v11528_v29 = vpack.i.b16 %v6216_v58, %v6540_v54  ;;  %v4148_v15 = vcombine.high %v11387_v12, %v11387_v12 }
 0x110   :  { %v4226_v43 = vcombine.high %v11513_v46, %v11513_v46  ;;  %v4615_v39 = vrot.slane %v4607_v30, %v10573_v16  ;;  %v11536_v38 = vpack.i.b16 %v11491_v36, %v6546_v18  ;;  %v9763_v5 = vcombine.high %v4186_v52, %v4200_v60  ;;  %v5891_v52 = vpop.permute.xlu1 %5890 }
 0x111   :  { %v4673_v4 = vcombine.low %v4193_v10, %v4207_v49  ;;  %v9764_v41 = vcombine.high %v4193_v10, %v4207_v49  ;;  %v6851_v58 = vcombine.low %v11493_v14, %v11515_v2  ;;  %v6852_v54 = vcombine.low %v11528_v29, %v11517_v13  ;;  %v13415_v10 = vld [vmem:[#allocation8_spill] sm:$0xff]  ;;  %v5893_v31 = vpop.permute.xlu0 %5892 }
 0x112   :  { %v4634_v12 = vrot.slane %v11416_v26, %v10573_v16  ;;  %v4622_v40 = vrot.slane %v4608_v45, %v10573_v16  ;;  %v11548_v30 = vrot.slane %v4626_v22, %v10573_v16  ;;  %v4625_v18 = vcombine.low %v4148_v15, %v4162_v47 }
 0x113   :  { %v4241_v60 = vcombine.high %v4233_v61, %v4233_v61  ;;  %v5926_v53 = vsel %vm1613_vm6, %v5913_v35, %v11302_v37  ;;  %v4240_v49 = vrot.slane %v4226_v43, %v10573_v16  ;;  %v3882_v26 = vsel %vm1613_vm6, %v13415_v10, %v11538_v44 }
 0x114   :  { %v4623_v55 = vcombine.low %v4615_v39, %v4622_v40  ;;  %v5943_v42 = vsel %vm4887_vm7, %v5926_v53, %v5887_v56  ;;  %v11558_v45 = vrot.slane %v9763_v5, %v10573_v16  ;;  %v11561_v22 = vrot.slane %v4673_v4, %v10573_v16  ;;  %v10124_v56 = vld [vmem:[%s13317_s0 + $0x2c] ss:$0 sps:$4 sm:$0x33]  }
 0x115   :  { %v11564_v47 = vrot.slane %v9764_v41, %v10573_v16  ;;  %v4249_v37 = vrot.slane %v4233_v61, %v10573_v16  ;;  %v6161_v35 = vrot.slane %v5943_v42, %v10573_v16  ;;  %v5915_v15 = vsel %vm280_vm5, %v10124_v56, %v5810_v59 }
 0x116   :  { %9971 = vmatmul.mubr.msk.bf16.gmra.mrb[12].mxu1 %vm4887_vm7, %v4623_v55  ;;  %v4218_v43 = vrot.slane %v3882_v26, %v10573_v16  ;;  %v6769_v39 = vrot.slane %v6753_v63, %v10573_v16  ;;  %v4641_v5 = vrot.slane %v4625_v18, %v10573_v16  ;;  %v4263_v61 = vrot.slane %v4241_v60, %v10573_v16 }
 0x117   :  { %v6776_v4 = vrot.slane %v6754_v32, %v10573_v16  ;;  %v6783_v59 = vrot.slane %v6755_v20, %v10573_v16  ;;  %9974 = vmatprep.mubr.msk.bf16.mxu1 %vm10136_vm3, %v13388_v0  ;;  %v4242_v41 = vcombine.high %v4240_v49, %v4240_v49  ;;  %v6154_v28 = vcombine.high %v11438_v34, %v11438_v34  ;;  %v5897_v20 = vpop.permute.xlu1 %5896 }
 0x118   :  { %v6168_v50 = vrot.slane %v6161_v35, %v10573_v16  ;;  %v6784_v63 = vcombine.low %v6762_v8, %v6769_v39  ;;  %v4256_v21 = vrot.slane %v4240_v49, %v10573_v16  ;;  %v5927_v62 = vsel %vm1613_vm6, %v5915_v15, %v11457_v25 }
 0x119   :  { %v6785_v19 = vcombine.low %v6776_v4, %v6783_v59  ;;  %v6217_v32 = vcombine.high %v11477_v7, %v11477_v7  ;;  %v4271_v40 = vcombine.high %v4249_v37, %v4249_v37  ;;  %v4225_v34 = vrot.slane %v4218_v43, %v10573_v16 }
 0x11a   :  { %v6792_v18 = vrot.slane %v6784_v63, %v10573_v16  ;;  %v5947_v60 = vsel %vm4887_vm7, %v5927_v62, %v5891_v52  ;;  %v11604_v24 = vcombine.low %v4634_v12, %v4641_v5  ;;  %v4273_v8 = vcombine.high %v4263_v61, %v4263_v61 }
 0x11b   :  { %v6799_v53 = vrot.slane %v6785_v19, %v10573_v16  ;;  %v6224_v49 = vrot.slane %v5947_v60, %v10573_v16  ;;  %v9789_v25 = vpack.i.b16 %v11441_v9, %v6168_v50  ;;  %v6548_v7 = vunpack.i.h.s16 %v11491_v36  ;;  %v3856_v19 = vpop.permute.xlu0 %3855 }
 0x11c   :  { %v11612_v55 = vsel %vm4887_vm7, %v11449_v1, %v5893_v31  ;;  %v11616_v42 = vsel %vm4887_vm7, %v11513_v46, %v5897_v20  ;;  %v6550_v10 = vunpack.i.h.s16 %v6217_v32  ;;  %v11622_v35 = vrot.slane %v4242_v41, %v10573_v16 }
 0x11d   :  { %v6800_v52 = vcombine.low %v6792_v18, %v6799_v53  ;;  %v6231_v12 = vrot.slane %v6224_v49, %v10573_v16  ;;  %v6232_v26 = vcombine.high %v11612_v55, %v11612_v55  ;;  %v4675_v9 = vcombine.low %v4225_v34, %v4249_v37 }
 0x11e   :  { %v6239_v36 = vrot.slane %v11612_v55, %v10573_v16  ;;  %v6295_v1 = vcombine.high %v11616_v42, %v11616_v42  ;;  %v4272_v56 = vcombine.high %v4256_v21, %v4256_v21  ;;  %v6302_v43 = vrot.slane %v11616_v42, %v10573_v16 }
 0x11f   :  { %10007 = vmatmul.mubr.msk.bf16.gmra.mrb[24].mxu0 %vm7143_vm8, %v6800_v52  ;;  %v9797_v46 = vpack.i.b16 %v6231_v12, %v6550_v10  ;;  %v6246_v15 = vrot.slane %v6232_v26, %v10573_v16  ;;  %v4676_v39 = vcombine.low %v4263_v61, %v4271_v40  ;;  %v11632_v5 = vcombine.low %v4273_v8, %v4256_v21  ;;  %v5812_v52 = vpop.permute.xlu1 %5811 }
 0x120   :  { %v6247_v4 = vcombine.high %v6239_v36, %v6239_v36  ;;  %v6309_v37 = vrot.slane %v6295_v1, %v10573_v16  ;;  %10010 = vmatprep.mubr.msk.bf16.mxu0 %vm10136_vm3, %v13388_v0  ;;  %v11637_v59 = vcombine.low %v6154_v28, %v9789_v25  ;;  %v9796_v41 = vpack.i.b16 %v6217_v32, %v6548_v7  ;;  %v11671_v1 = vpop.permute.xlu0 %3853 }
 0x121   :  { %v6248_v50 = vcombine.high %v6246_v15, %v6246_v15  ;;  %v6310_v63 = vcombine.high %v6302_v43, %v6302_v43  ;;  %v4697_v62 = vrot.slane %v4675_v9, %v10573_v16  ;;  %v6255_v31 = vrot.slane %v6239_v36, %v10573_v16 }
 0x122   :  { %v6269_v61 = vrot.slane %v6247_v4, %v10573_v16  ;;  %v11643_v21 = vrot.slane %v6302_v43, %v10573_v16  ;;  %v6899_v20 = vcombine.low %v9796_v41, %v9797_v46  ;;  %v4657_v28 = vcombine.low %v11548_v30, %v11558_v45  ;;  %v13416_v41 = vld [vmem:[#allocation15_spill] sm:$0xff] }
 0x123   :  { %v6276_v40 = vrot.slane %v6248_v50, %v10573_v16  ;;  %v11647_v34 = vrot.slane %v6310_v63, %v10573_v16  ;;  %v11652_v32 = vcombine.low %v11622_v35, %v4272_v56  ;;  %v6311_v60 = vcombine.high %v6309_v37, %v6309_v37 }
 0x124   :  { %v6900_v18 = vcombine.low %v6255_v31, %v6269_v61  ;;  %v6325_v8 = vrot.slane %v6309_v37, %v10573_v16  ;;  %v4704_v53 = vrot.slane %v4676_v39, %v10573_v16  ;;  %v6262_v49 = vrot.slane %v6246_v15, %v10573_v16 }
 0x125   :  { %v9818_v25 = vcombine.high %v6255_v31, %v6269_v61  ;;  %v4664_v7 = vrot.slane %v11604_v24, %v10573_v16  ;;  %v6860_v30 = vrot.slane %v11637_v59, %v10573_v16  ;;  %v6340_v45 = vcombine.high %v11643_v21, %v11643_v21 }
 0x126   :  { %v6342_v10 = vcombine.high %v11647_v34, %v11647_v34  ;;  %v4706_v26 = vcombine.low %v4697_v62, %v4704_v53  ;;  %v11668_v9 = vrot.slane %v6899_v20, %v10573_v16  ;;  %v6902_v36 = vcombine.low %v6262_v49, %v6276_v40 }
 0x127   :  { %v4671_v24 = vrot.slane %v4657_v28, %v10573_v16  ;;  %v11674_v56 = vrot.slane %v6900_v18, %v10573_v16  ;;  %v9819_v46 = vcombine.high %v6262_v49, %v6276_v40  ;;  %v11677_v15 = vrot.slane %v6311_v60, %v10573_v16  ;;  %v11704_v18 = vpop.permute.xlu1 %3857 }
 0x128   :  { %v11679_v43 = vcombine.high %v6325_v8, %v6325_v8  ;;  %v11682_v39 = vrot.slane %v9818_v25, %v10573_v16  ;;  %v6572_v4 = vunpack.i.h.s16 %v11647_v34  ;;  %v11687_v50 = vsel %vm1613_vm6, %v13416_v41, %v3856_v19 }
 0x129   :  { %v4672_v37 = vcombine.low %v4664_v7, %v4671_v24  ;;  %v6574_v63 = vunpack.i.h.s16 %v6340_v45  ;;  %v6576_v62 = vunpack.i.h.s16 %v6342_v10  ;;  %v4289_v31 = vcombine.high %v11687_v50, %v11687_v50 }
 0x12a   :  { %v4296_v61 = vrot.slane %v11687_v50, %v10573_v16  ;;  %v11694_v20 = vrot.slane %v6902_v36, %v10573_v16  ;;  %v6570_v40 = vunpack.i.h.s16 %v11643_v21  ;;  %v6832_v28 = vrot.slane %v11485_v11, %v10573_v16  ;;  %v5895_v36 = vpop.permute.xlu0 %5894 }
 0x12b   :  { %9975 = vmatmul.mubr.msk.bf16.gmra.mrb[16].mxu1 %vm4887_vm7, %v4672_v37  ;;  %v6833_v19 = vcombine.low %v11474_v51, %v6818_v27  ;;  %v11707_v60 = vrot.slane %v9819_v46, %v10573_v16  ;;  %v6578_v53 = vunpack.i.h.s16 %v6325_v8  ;;  %v4303_v49 = vrot.slane %v4289_v31, %v10573_v16  ;;  %v13417_v51 = vld [vmem:[#allocation10_spill] sm:$0xff] }
 0x12c   :  { %v4304_v25 = vcombine.high %v4296_v61, %v4296_v61  ;;  %9978 = vmatprep.mubr.msk.bf16.mxu1 %vm10136_vm3, %v13388_v0  ;;  %v6580_v7 = vunpack.i.h.s16 %v11677_v15  ;;  %v6582_v11 = vunpack.i.h.s16 %v11679_v43  ;;  %v6834_v3 = vcombine.low %v6825_v6, %v6832_v28 }
 0x12d   :  { %v3886_v27 = vsel %vm1613_vm6, %v13417_v51, %v11671_v1  ;;  %v11720_v24 = vpack.i.b16 %v6340_v45, %v6572_v4  ;;  %v11722_v46 = vpack.i.b16 %v6342_v10, %v6574_v63  ;;  %v11724_v37 = vpack.i.b16 %v6325_v8, %v6576_v62  ;;  %v10125_v8 = vld [vmem:[%s13317_s0 + $0x38] ss:$0 sps:$4 sm:$0x33]  }
 0x12e   :  { %v4281_v41 = vrot.slane %v3886_v27, %v10573_v16  ;;  %v6841_v31 = vrot.slane %v6833_v19, %v10573_v16  ;;  %v6848_v12 = vrot.slane %v6834_v3, %v10573_v16  ;;  %v4705_v48 = vcombine.low %v11561_v22, %v11564_v47 }
 0x12f   :  { %v4720_v6 = vrot.slane %v4706_v26, %v10573_v16  ;;  %v11733_v28 = vpack.i.b16 %v11677_v15, %v6578_v53  ;;  %v4305_v45 = vcombine.high %v4303_v49, %v4303_v49  ;;  %v4326_v10 = vrot.slane %v4304_v25, %v10573_v16  ;;  %v5814_v26 = vpop.permute.xlu1 %5813 }
 0x130   :  { %v5917_v4 = vsel %vm280_vm5, %v10125_v8, %v5812_v52  ;;  %v11741_v63 = vpack.i.b16 %v11679_v43, %v6580_v7  ;;  %v6849_v62 = vcombine.low %v6841_v31, %v6848_v12  ;;  %v4288_v22 = vrot.slane %v4281_v41, %v10573_v16  ;;  %v13418_v12 = vld [vmem:[#allocation16_spill] sm:$0xff]  ;;  %v3860_v41 = vpop.permute.xlu0 %3859 }
 0x131   :  { %v4713_v47 = vrot.slane %v4705_v48, %v10573_v16  ;;  %v6950_v19 = vcombine.low %v11720_v24, %v11722_v46  ;;  %v6951_v53 = vcombine.low %v11724_v37, %v11733_v28  ;;  %v4312_v25 = vrot.slane %v4296_v61, %v10573_v16 }
 0x132   :  { %v4274_v52 = vcombine.high %v11622_v35, %v11622_v35  ;;  %v4319_v7 = vrot.slane %v4303_v49, %v10573_v16  ;;  %10011 = vmatmul.mubr.msk.bf16.gmra.mrb[28].mxu0 %vm7143_vm8, %v6849_v62  ;;  %v3890_v3 = vsel %vm1613_vm6, %v13418_v12, %v11704_v18  ;;  %v5928_v27 = vsel %vm1613_vm6, %v5917_v4, %v11538_v44  ;;  %v13419_v4 = vld [vmem:[#allocation17_spill] sm:$0xff] }
 0x133   :  { %v4721_v51 = vcombine.low %v4713_v47, %v4720_v6  ;;  %v4333_v31 = vrot.slane %v4305_v45, %v10573_v16  ;;  %v4725_v48 = vcombine.low %v4312_v25, %v4326_v10  ;;  %10014 = vmatprep.mubr.msk.bf16.mxu0 %vm10136_vm3, %v13388_v0  ;;  %v5951_v35 = vsel %vm4887_vm7, %v5928_v27, %v5895_v36 }
 0x134   :  { %v6853_v61 = vcombine.low %v11520_v17, %v11536_v38  ;;  %v4724_v49 = vcombine.low %v4274_v52, %v4288_v22  ;;  %v6287_v6 = vrot.slane %v5951_v35, %v10573_v16  ;;  %v6867_v44 = vrot.slane %v6851_v58, %v10573_v16  ;;  %v10126_v17 = vld [vmem:[%s13317_s0 + $0x44] ss:$0 sps:$4 sm:$0x33]   ;;  %v5899_v58 = vpop.permute.xlu1 %5898 }
 0x135   :  { %9979 = vmatmul.mubr.msk.bf16.gmra.mrb[20].mxu1 %vm4887_vm7, %v4721_v51  ;;  %v6874_v45 = vrot.slane %v6852_v54, %v10573_v16  ;;  %v9765_v8 = vcombine.high %v4312_v25, %v4326_v10  ;;  %v5919_v38 = vsel %vm280_vm5, %v10126_v17, %v5814_v26  ;;  %v11782_v62 = vsel %vm1613_vm6, %v13419_v4, %v3860_v41  ;;  %v5901_v51 = vpop.permute.xlu0 %5900 }
 0x136   :  { %v6881_v36 = vrot.slane %v6853_v61, %v10573_v16  ;;  %9982 = vmatprep.mubr.msk.bf16.mxu1 %vm10136_vm3, %v13388_v0  ;;  %v4344_v14 = vrot.slane %v3890_v3, %v10573_v16  ;;  %v6294_v2 = vrot.slane %v6287_v6, %v10573_v16  ;;  %v6882_v13 = vcombine.low %v6860_v30, %v6867_v44 }
 0x137   :  { %v4352_v29 = vcombine.high %v11782_v62, %v11782_v62  ;;  %v4772_v54 = vcombine.low %v4319_v7, %v4333_v31  ;;  %v9766_v10 = vcombine.high %v4319_v7, %v4333_v31  ;;  %v4359_v47 = vrot.slane %v11782_v62, %v10573_v16 }
 0x138   :  { %v6883_v22 = vcombine.low %v6874_v45, %v6881_v36  ;;  %v4746_v26 = vrot.slane %v4724_v49, %v10573_v16  ;;  %v6890_v25 = vrot.slane %v6882_v13, %v10573_v16  ;;  %v5929_v59 = vsel %vm1613_vm6, %v5919_v38, %v11671_v1  ;;  %v11824_v4 = vpop.permute.xlu1 %3861 }
 0x139   :  { %v4366_v52 = vrot.slane %v4352_v29, %v10573_v16  ;;  %v4367_v12 = vcombine.high %v4359_v47, %v4359_v47  ;;  %v4375_v3 = vrot.slane %v4359_v47, %v10573_v16  ;;  %v5955_v7 = vsel %vm4887_vm7, %v5929_v59, %v5899_v58  ;;  %v13420_v47 = vld [vmem:[#allocation18_spill] sm:$0xff] }
 0x13a   :  { %v6897_v30 = vrot.slane %v6883_v22, %v10573_v16  ;;  %v4753_v27 = vrot.slane %v4725_v48, %v10573_v16  ;;  %v11805_v41 = vrot.slane %v9765_v8, %v10573_v16  ;;  %v9798_v31 = vpack.i.b16 %v11643_v21, %v6294_v2 }
 0x13b   :  { %v6343_v35 = vcombine.high %v11677_v15, %v11677_v15  ;;  %v4368_v1 = vcombine.high %v4366_v52, %v4366_v52  ;;  %v4382_v49 = vrot.slane %v4366_v52, %v10573_v16  ;;  %v4389_v6 = vrot.slane %v4367_v12, %v10573_v16 }
 0x13c   :  { %v6898_v61 = vcombine.low %v6890_v25, %v6897_v30  ;;  %v11813_v44 = vrot.slane %v4772_v54, %v10573_v16  ;;  %v4351_v45 = vrot.slane %v4344_v14, %v10573_v16  ;;  %v9799_v48 = vpack.i.b16 %v11647_v34, %v6570_v40  ;;  %v5905_v54 = vpop.permute.xlu0 %5904 }
 0x13d   :  { %v6350_v8 = vrot.slane %v5955_v7, %v10573_v16  ;;  %v11821_v36 = vrot.slane %v9766_v10, %v10573_v16  ;;  %v4755_v15 = vcombine.low %v4746_v26, %v4753_v27  ;;  %v4397_v17 = vcombine.high %v4375_v3, %v4375_v3 }
 0x13e   :  { %10015 = vmatmul.mubr.msk.bf16.gmra.mrb[32].mxu0 %vm7143_vm8, %v6898_v61  ;;  %v4399_v38 = vcombine.high %v4389_v6, %v4389_v6  ;;  %v11826_v2 = vcombine.low %v9798_v31, %v9799_v48  ;;  %v6584_v13 = vunpack.i.h.s16 %v6343_v35  ;;  %v11832_v21 = vsel %vm4887_vm7, %v11687_v50, %v5901_v51 }
 0x13f   :  { %10018 = vmatprep.mubr.msk.bf16.mxu0 %vm10136_vm3, %v13388_v0  ;;  %v6931_v34 = vcombine.low %v11668_v9, %v11674_v56  ;;  %v4396_v40 = vrot.slane %v4368_v1, %v10573_v16  ;;  %v4398_v14 = vcombine.high %v4382_v49, %v4382_v49  ;;  %v6358_v29 = vcombine.high %v11832_v21, %v11832_v21 }
 0x140   :  { %v6365_v58 = vrot.slane %v11832_v21, %v10573_v16  ;;  %v4774_v10 = vcombine.low %v4351_v45, %v4375_v3  ;;  %v6357_v22 = vrot.slane %v6350_v8, %v10573_v16  ;;  %v6932_v50 = vcombine.low %v11682_v39, %v11694_v20 }
 0x141   :  { %v3894_v9 = vsel %vm1613_vm6, %v13420_v47, %v11824_v4  ;;  %v11847_v56 = vcombine.low %v4389_v6, %v4397_v17  ;;  %v11849_v26 = vcombine.low %v4399_v38, %v4382_v49  ;;  %v11853_v25 = vpack.i.b16 %v6343_v35, %v6582_v11  ;;  %v5816_v6 = vpop.permute.xlu0 %5815 }
 0x142   :  { %v6373_v52 = vcombine.high %v6365_v58, %v6365_v58  ;;  %v6939_v59 = vrot.slane %v6931_v34, %v10573_v16  ;;  %v6946_v30 = vrot.slane %v6932_v50, %v10573_v16  ;;  %v4407_v12 = vrot.slane %v3894_v9, %v10573_v16  ;;  %v5903_v50 = vpop.permute.xlu1 %5902 }
 0x143   :  { %v4739_v39 = vrot.slane %v11652_v32, %v10573_v16  ;;  %v6965_v20 = vrot.slane %v11826_v2, %v10573_v16  ;;  %v11862_v3 = vcombine.low %v4396_v40, %v4398_v14  ;;  %v6372_v7 = vrot.slane %v6358_v29, %v10573_v16 }
 0x144   :  { %v6381_v43 = vrot.slane %v6365_v58, %v10573_v16  ;;  %v11867_v11 = vrot.slane %v4774_v10, %v10573_v16  ;;  %v9806_v51 = vpack.i.b16 %v6357_v22, %v6584_v13  ;;  %v6947_v27 = vcombine.low %v6939_v59, %v6946_v30 }
 0x145   :  { %v13421_v31 = vrot.slane %v11632_v5, %v10573_v16  ;;  %v4830_v32 = vrot.slane %v11847_v56, %v10573_v16  ;;  %v6997_v61 = vcombine.low %v11741_v63, %v11853_v25  ;;  %v6395_v1 = vrot.slane %v6373_v52, %v10573_v16 }
 0x146   :  { %v4400_v49 = vcombine.high %v4396_v40, %v4396_v40  ;;  %v4837_v45 = vrot.slane %v11849_v26, %v10573_v16  ;;  %10019 = vmatmul.mubr.msk.bf16.gmra.mrb[36].mxu0 %vm7143_vm8, %v6947_v27  ;;  %v4414_v48 = vrot.slane %v4407_v12, %v10573_v16  ;;  %v4769_v8 = vrot.slane %v4755_v15, %v10573_v16  ;;  %v10127_v15 = vld [vmem:[%s13317_s0 + $0x50] ss:$0 sps:$4 sm:$0x33]  }
 0x147   :  { %v4754_v35 = vcombine.low %v13421_v31, %v4739_v39  ;;  %v6374_v17 = vcombine.high %v6372_v7, %v6372_v7  ;;  %v6388_v38 = vrot.slane %v6372_v7, %v10573_v16  ;;  %v6403_v2 = vcombine.high %v6381_v43, %v6381_v43  ;;  %10022 = vmatprep.mubr.msk.bf16.mxu0 %vm10136_vm3, %v13388_v0 }
 0x148   :  { %v4844_v13 = vrot.slane %v11862_v3, %v10573_v16  ;;  %v6998_v34 = vcombine.low %v9806_v51, %v6381_v43  ;;  %v11890_v14 = vsel %vm4887_vm7, %v11782_v62, %v5905_v54  ;;  %v5921_v29 = vsel %vm280_vm5, %v10127_v15, %v5816_v6 }
 0x149   :  { %v4762_v5 = vrot.slane %v4754_v35, %v10573_v16  ;;  %v6405_v58 = vcombine.high %v6395_v1, %v6395_v1  ;;  %v6421_v10 = vcombine.high %v11890_v14, %v11890_v14  ;;  %v6428_v22 = vrot.slane %v11890_v14, %v10573_v16 }
 0x14a   :  { %v5930_v47 = vsel %vm1613_vm6, %v5921_v29, %v11704_v18  ;;  %v4823_v9 = vcombine.low %v4400_v49, %v4414_v48  ;;  %v6972_v54 = vrot.slane %v6950_v19, %v10573_v16  ;;  %v6979_v52 = vrot.slane %v6951_v53, %v10573_v16 }
 0x14b   :  { %v4770_v40 = vcombine.low %v4762_v5, %v4769_v8  ;;  %v5959_v62 = vsel %vm4887_vm7, %v5930_v47, %v5903_v50  ;;  %v6435_v59 = vrot.slane %v6421_v10, %v10573_v16  ;;  %v6436_v30 = vcombine.high %v6428_v22, %v6428_v22 }
 0x14c   :  { %v6444_v18 = vrot.slane %v6428_v22, %v10573_v16  ;;  %v6413_v12 = vrot.slane %v5959_v62, %v10573_v16  ;;  %v6402_v39 = vrot.slane %v6374_v17, %v10573_v16  ;;  %v6404_v3 = vcombine.high %v6388_v38, %v6388_v38 }
 0x14d   :  { %9983 = vmatmul.mubr.msk.bf16.gmra.mrb[24].mxu1 %vm4887_vm7, %v4770_v40  ;;  %v6980_v24 = vcombine.low %v11707_v60, %v6965_v20  ;;  %v6981_v46 = vcombine.low %v6972_v54, %v6979_v52  ;;  %v6999_v19 = vcombine.low %v6395_v1, %v6403_v2  ;;  %v6437_v7 = vcombine.high %v6435_v59, %v6435_v59 }
 0x14e   :  { %9986 = vmatprep.mubr.msk.bf16.mxu1 %vm10136_vm3, %v13388_v0  ;;  %v6458_v37 = vrot.slane %v6436_v30, %v10573_v16  ;;  %v6466_v28 = vcombine.high %v6444_v18, %v6444_v18  ;;  %v7000_v53 = vcombine.low %v6405_v58, %v6388_v38  ;;  %v7014_v43 = vrot.slane %v6998_v34, %v10573_v16 }
 0x14f   :  { %v4851_v51 = vrot.slane %v4823_v9, %v10573_v16  ;;  %v6420_v27 = vrot.slane %v6413_v12, %v10573_v16  ;;  %v6988_v49 = vrot.slane %v6980_v24, %v10573_v16  ;;  %v4803_v60 = vcombine.low %v11805_v41, %v11813_v44  ;;  %v5818_v44 = vpop.permute.xlu0 %5817 }
 0x150   :  { %v6468_v31 = vcombine.high %v6458_v37, %v6458_v37  ;;  %v6606_v35 = vunpack.i.h.s16 %v6458_v37  ;;  %v11927_v20 = vrot.slane %v6435_v59, %v10573_v16  ;;  %v6604_v1 = vunpack.i.h.s16 %v6444_v18  ;;  %v5907_v59 = vpop.permute.xlu1 %5906 }
 0x151   :  { %v6995_v6 = vrot.slane %v6981_v46, %v10573_v16  ;;  %v4804_v48 = vcombine.low %v11821_v36, %v11867_v11  ;;  %v11933_v5 = vrot.slane %v6437_v7, %v10573_v16  ;;  %v6608_v8 = vunpack.i.h.s16 %v6466_v28 }
 0x152   :  { %v6610_v17 = vunpack.i.h.s16 %v6468_v31  ;;  %v9807_v38 = vpack.i.b16 %v6444_v18, %v6420_v27  ;;  %v6406_v2 = vcombine.high %v6402_v39, %v6402_v39  ;;  %v7021_v34 = vrot.slane %v6999_v19, %v10573_v16 }
 0x153   :  { %v7046_v40 = vcombine.low %v6402_v39, %v6404_v3  ;;  %v9809_v41 = vpack.i.b16 %v6466_v28, %v6606_v35  ;;  %v7028_v15 = vrot.slane %v7000_v53, %v10573_v16  ;;  %v4853_v29 = vcombine.low %v4844_v13, %v4851_v51  ;;  %v10128_v13 = vld [vmem:[%s13317_s0 + $0x5c] ss:$0 sps:$4 sm:$0x33]   ;;  %v9177_v35 = vpop.permute.xlu0 %9176 }
 0x154   :  { %v9811_v58 = vpack.i.b16 %v11927_v20, %v6610_v17  ;;  %v6996_v10 = vcombine.low %v6988_v49, %v6995_v6  ;;  %v6467_v36 = vcombine.high %v11927_v20, %v11927_v20  ;;  %v9808_v11 = vpack.i.b16 %v6458_v37, %v6604_v1 }
 0x155   :  { %v4811_v22 = vrot.slane %v4803_v60, %v10573_v16  ;;  %v4818_v50 = vrot.slane %v4804_v48, %v10573_v16  ;;  %v6469_v47 = vcombine.high %v11933_v5, %v11933_v5  ;;  %v9810_v9 = vpack.i.b16 %v6468_v31, %v6608_v8 }
 0x156   :  { %v7047_v62 = vcombine.low %v6406_v2, %v9807_v38  ;;  %10023 = vmatmul.mubr.msk.bf16.gmra.mrb[40].mxu0 %vm7143_vm8, %v6996_v10  ;;  %v5923_v54 = vsel %vm280_vm5, %v10128_v13, %v5818_v44  ;;  %v7048_v52 = vcombine.low %v9808_v11, %v9809_v41  ;;  %v4852_v12 = vcombine.low %v4830_v32, %v4837_v45  ;;  %v9179_v41 = vpop.permute.xlu1 %9178 }
 0x157   :  { %v4819_v30 = vcombine.low %v4811_v22, %v4818_v50  ;;  %v5931_v18 = vsel %vm1613_vm6, %v5923_v54, %v11824_v4  ;;  %10026 = vmatprep.mubr.msk.bf16.mxu0 %vm10136_vm3, %v13388_v0  ;;  %v7049_v39 = vcombine.low %v9810_v9, %v9811_v58  ;;  %v7007_v24 = vrot.slane %v6997_v61, %v10573_v16  ;;  %v9181_v44 = vpop.permute.xlu0 %9180 }
 0x158   :  { %v5963_v3 = vsel %vm4887_vm7, %v5931_v18, %v5907_v59  ;;  %v7030_v46 = vcombine.low %v7021_v34, %v7028_v15  ;;  %v4867_v19 = vrot.slane %v4853_v29, %v10573_v16  ;;  %v6614_v26 = vunpack.i.h.s16 %v11933_v5  ;;  %v13422_v29 = vld [vmem:[#allocation19_spill] sm:$0xff] }
 0x159   :  { %9987 = vmatmul.mubr.msk.bf16.gmra.mrb[28].mxu1 %vm4887_vm7, %v4819_v30  ;;  %v6476_v4 = vrot.slane %v5963_v3, %v10573_v16  ;;  %v6616_v7 = vunpack.i.h.s16 %v6467_v36  ;;  %v7029_v56 = vcombine.low %v7007_v24, %v7014_v43  ;;  %v6618_v45 = vunpack.i.h.s16 %v6469_v47 }
 0x15a   :  { %9990 = vmatprep.mubr.msk.bf16.mxu1 %vm10136_vm3, %v13388_v0  ;;  %v7044_v32 = vrot.slane %v7030_v46, %v10573_v16  ;;  %v4860_v25 = vrot.slane %v4852_v12, %v10573_v16  ;;  %v7056_v61 = vrot.slane %v7046_v40, %v10573_v16  ;;  %v7063_v28 = vrot.slane %v7047_v62, %v10573_v16 }
 0x15b   :  { %v6483_v63 = vrot.slane %v6476_v4, %v10573_v16  ;;  %v7037_v37 = vrot.slane %v7029_v56, %v10573_v16  ;;  %v7070_v53 = vrot.slane %v7048_v52, %v10573_v16  ;;  %v7077_v51 = vrot.slane %v7049_v39, %v10573_v16  ;;  %v9185_v11 = vpop.permute.xlu0 %9184 }
 0x15c   :  { %v6612_v27 = vunpack.i.h.s16 %v11927_v20  ;;  %v4868_v43 = vcombine.low %v4860_v25, %v4867_v19  ;;  %v7078_v60 = vcombine.low %v7056_v61, %v7063_v28  ;;  %v9813_v6 = vpack.i.b16 %v6467_v36, %v6614_v26  ;;  %v9183_v36 = vpop.permute.xlu1 %9182 }
 0x15d   :  { %v9815_v31 = vpack.i.b16 %v6483_v63, %v6618_v45  ;;  %v7045_v49 = vcombine.low %v7037_v37, %v7044_v32  ;;  %v7079_v1 = vcombine.low %v7070_v53, %v7077_v51  ;;  %v9814_v48 = vpack.i.b16 %v6469_v47, %v6616_v7 }
 0x15e   :  { %v7086_v8 = vrot.slane %v7078_v60, %v10573_v16  ;;  %v9193_v38 = vsel %vm7143_vm8, %v11096_v23, %v9177_v35  ;;  %v9812_v20 = vpack.i.b16 %v11933_v5, %v6612_v27  ;;  %v9195_v58 = vsel %vm7143_vm8, %v13422_v29, %v9179_v41 }
 0x15f   :  { %10027 = vmatmul.mubr.msk.bf16.gmra.mrb[44].mxu0 %vm7143_vm8, %v7045_v49  ;;  %v7093_v17 = vrot.slane %v7079_v1, %v10573_v16  ;;  %v7096_v2 = vcombine.low %v9814_v48, %v9815_v31  ;;  %v9197_v10 = vsel %vm7143_vm8, %v11378_v33, %v9181_v44  ;;  %v9199_v50 = vsel %vm7143_vm8, %v11409_v57, %v9183_v36  ;;  %v9189_v9 = vpop.permute.xlu0 %9188 }
 0x160   :  { %10030 = vmatprep.mubr.msk.bf16.mxu0 %vm10136_vm3, %v13388_v0  ;;  %v7095_v40 = vcombine.low %v9812_v20, %v9813_v6  ;;  %v9201_v33 = vsel %vm7143_vm8, %v11612_v55, %v9185_v11  ;;  %v9187_v47 = vpop.permute.xlu1 %9186  ;;  %v9205_v13 = vsel %vm7143_vm8, %v11832_v21, %v9189_v9  ;;  %v10139_v18 = vmov 1983009808  }
 0x161   :  { %9991 = vmatmul.mubr.msk.bf16.gmra.mrb[32].mxu1 %vm4887_vm7, %v4868_v43  ;;  %v7094_v34 = vcombine.low %v7086_v8, %v7093_v17  ;;  %v7110_v15 = vrot.slane %v7096_v2, %v10573_v16  ;;  %v9203_v62 = vsel %vm7143_vm8, %v11616_v42, %v9187_v47  ;;  %v12022_v42 = vld [vmem:[%s13322_s2] ss:$0 sm:$0xff]  ;;  %v5058_v12 = vunpack.c.l.s4 %v10139_v18 }
 0x162   :  { %10048 = vmatprep.mubr.msk.bf16.mxu1 %vm9255_vm9, %v9193_v38  ;;  %v7103_v23 = vrot.slane %v7095_v40, %v10573_v16 }
 0x163   :  { %v5059_v32 = vunpack.c.0.s8 %v5058_v12 }
 0x164   :  { %v7111_v5 = vcombine.low %v7103_v23, %v7110_v15  ;;  %v9191_v57 = vpop.permute.xlu1 %9190 }
 0x165   :  { %v9207_v55 = vsel %vm7143_vm8, %v11890_v14, %v9191_v57 }
 0x166   :  { %v7118_v22 = vrot.slane %v7111_v5, %v10573_v16 }
 0x167   :  { %10031 = vmatmul.mubr.msk.bf16.gmra.mrb[48].mxu0 %vm7143_vm8, %v7094_v34 }
 0x168   :  { %10034 = vmatprep.mubr.msk.bf16.mxu0 %vm10136_vm3, %v13388_v0 }
 0x169   :  { %10049 = vmatmul.mubr.msk.bf16.vlgmr.msra.gmra.mrb[36].mxu1 %vm9255_vm9, %v9195_v58 }
 0x16a   :  { %10052 = vmatprep.mubr.msk.bf16.mxu1 %vm9255_vm9, %v9197_v10 }
 0x16f   :  { %10035 = vmatmul.mubr.msk.bf16.gmra.mrb[52].mxu0 %vm7143_vm8, %v7118_v22 }
 0x171   :  { %10053 = vmatmul.mubr.msk.bf16.gmra.mrb[40].mxu1 %vm9255_vm9, %v9199_v50 }
 0x172   :  { %10056 = vmatprep.mubr.msk.bf16.mxu1 %vm9255_vm9, %v9201_v33 }
 0x179   :  { %10057 = vmatmul.mubr.msk.bf16.gmra.mrb[44].mxu1 %vm9255_vm9, %v9203_v62 }
 0x17a   :  { %10060 = vmatprep.mubr.msk.bf16.mxu1 %vm9255_vm9, %v9205_v13 }
 0x181   :  { %10061 = vmatmul.mubr.msk.bf16.gmra.mrb[48].mxu1 %vm9255_vm9, %v9207_v55 }
 0x182   :  { %10072 = vmatprep.mubr.msk.bf16.mxu1 %vm10136_vm3, %v13388_v0  ;;  %vm9477_vm3 = vcmask 1047559  }
 0x192   :  { %v9934_v54 = vpop.f32.mrb[0].mxu0 }
 0x193   :  { %v1687_v21 = vadd.f32 %v9934_v54, %v12022_v42  ;;  %v1678_v52 = vpop.f32.mrb[1].mxu0  ;;  %v13423_v54 = vld [vmem:[#allocation2_spill] sm:$0xff] }
 0x194   :  { %v1679_v59 = vadd.f32 %v12022_v42, %v1678_v52  ;;  %v9935_v30 = vpop.f32.mrb[2].mxu0 }
 0x195   :  { %v1758_v14 = vmax.f32 %v1687_v21, 0.0  ;;  %v1690_v39 = vadd.f32 %v9935_v30, %v12022_v42  ;;  %v1681_v3 = vpop.f32.mrb[3].mxu0  ;;  %v12055_v21 = vsub.s32 %v5059_v32, %v13423_v54 }
 0x196   :  { %v1756_v24 = vmax.f32 %v1679_v59, 0.0  ;;  %v1682_v46 = vadd.f32 %v12022_v42, %v1681_v3 }
 0x197   :  { %v1892_v4 = vcombine.high %v1758_v14, %v1758_v14  ;;  %v1899_v19 = vrot.slane %v1758_v14, %v10573_v16  ;;  %v1759_v26 = vmax.f32 %v1690_v39, 0.0 }
 0x198   :  { %v1794_v7 = vcombine.high %v1756_v24, %v1756_v24  ;;  %v1801_v56 = vrot.slane %v1756_v24, %v10573_v16  ;;  %v12032_v61 = vmax.f32 %v1682_v46, 0.0 }
 0x199   :  { %v1906_v45 = vrot.slane %v1892_v4, %v10573_v16  ;;  %v1907_v63 = vcombine.high %v1899_v19, %v1899_v19  ;;  %v1915_v25 = vrot.slane %v1899_v19, %v10573_v16  ;;  %v1941_v51 = vcombine.high %v1759_v26, %v1759_v26 }
 0x19a   :  { %v1808_v37 = vrot.slane %v1794_v7, %v10573_v16  ;;  %v1809_v28 = vcombine.high %v1801_v56, %v1801_v56  ;;  %v1817_v53 = vrot.slane %v1801_v56, %v10573_v16  ;;  %v1948_v6 = vrot.slane %v1759_v26, %v10573_v16 }
 0x19b   :  { %v1908_v27 = vcombine.high %v1906_v45, %v1906_v45  ;;  %v1922_v43 = vrot.slane %v1906_v45, %v10573_v16  ;;  %v1929_v31 = vrot.slane %v1907_v63, %v10573_v16  ;;  %v1937_v35 = vcombine.high %v1915_v25, %v1915_v25 }
 0x19c   :  { %v1810_v49 = vcombine.high %v1808_v37, %v1808_v37  ;;  %v1824_v60 = vrot.slane %v1808_v37, %v10573_v16  ;;  %v1831_v1 = vrot.slane %v1809_v28, %v10573_v16  ;;  %v1955_v40 = vrot.slane %v1941_v51, %v10573_v16 }
 0x19d   :  { %v1936_v48 = vrot.slane %v1908_v27, %v10573_v16  ;;  %v1938_v8 = vcombine.high %v1922_v43, %v1922_v43  ;;  %v1939_v17 = vcombine.high %v1929_v31, %v1929_v31  ;;  %v2823_v38 = vcombine.low %v1915_v25, %v1929_v31 }
 0x19e   :  { %v1838_v20 = vrot.slane %v1810_v49, %v10573_v16  ;;  %v2725_v2 = vcombine.low %v1817_v53, %v1831_v1  ;;  %v9740_v34 = vcombine.high %v1817_v53, %v1831_v1  ;;  %v2837_v44 = vrot.slane %v1937_v35, %v10573_v16 }
 0x19f   :  { %v2830_v41 = vrot.slane %v2823_v38, %v10573_v16  ;;  %v2846_v15 = vcombine.low %v1939_v17, %v1922_v43  ;;  %v2847_v29 = vcombine.low %v1936_v48, %v1938_v8  ;;  %v1956_v50 = vcombine.high %v1948_v6, %v1948_v6 }
 0x1a0   :  { %v2727_v58 = vcombine.low %v1824_v60, %v1838_v20  ;;  %v9741_v23 = vcombine.high %v1824_v60, %v1838_v20  ;;  %v2735_v10 = vrot.slane %v2725_v2, %v10573_v16  ;;  %v2742_v5 = vrot.slane %v9740_v34, %v10573_v16 }
 0x1a1   :  { %v2838_v36 = vcombine.low %v2830_v41, %v2837_v44  ;;  %v2856_v11 = vrot.slane %v2846_v15, %v10573_v16  ;;  %v2863_v22 = vrot.slane %v2847_v29, %v10573_v16  ;;  %v1940_v9 = vcombine.high %v1936_v48, %v1936_v48 }
 0x1a2   :  { %v2749_v33 = vrot.slane %v2727_v58, %v10573_v16  ;;  %v2756_v47 = vrot.slane %v9741_v23, %v10573_v16  ;;  %v1957_v62 = vcombine.high %v1955_v40, %v1955_v40  ;;  %v1964_v13 = vrot.slane %v1948_v6, %v10573_v16 }
 0x1a3   :  { %v1971_v57 = vrot.slane %v1955_v40, %v10573_v16  ;;  %v2757_v52 = vcombine.low %v2735_v10, %v2742_v5  ;;  %v1978_v30 = vrot.slane %v1956_v50, %v10573_v16  ;;  %v2845_v14 = vrot.slane %v2838_v36, %v10573_v16 }
 0x1a4   :  { %v2758_v59 = vcombine.low %v2749_v33, %v2756_v47  ;;  %v12059_v18 = vrot.slane %v1957_v62, %v10573_v16  ;;  %v2878_v39 = vcombine.low %v2856_v11, %v2863_v22  ;;  %v1986_v3 = vcombine.high %v1964_v13, %v1964_v13 }
 0x1a5   :  { %v9938_v55 = vpop.f32.mrb[4].mxu0  ;;  %v1987_v24 = vcombine.high %v1971_v57, %v1971_v57  ;;  %v1988_v19 = vcombine.high %v1978_v30, %v1978_v30  ;;  %v2848_v26 = vcombine.low %v1940_v9, %v1964_v13  ;;  %v1843_v7 = vcombine.high %v12032_v61, %v12032_v61 }
 0x1a6   :  { %v1694_v12 = vpop.f32.mrb[5].mxu0  ;;  %v2772_v4 = vrot.slane %v2758_v59, %v10573_v16  ;;  %v2849_v32 = vcombine.low %v1978_v30, %v1986_v3  ;;  %v1850_v63 = vrot.slane %v12032_v61, %v10573_v16  ;;  %v1703_v25 = vadd.f32 %v9938_v55, %v12022_v42 }
 0x1a7   :  { %v9939_v46 = vpop.f32.mrb[6].mxu0  ;;  %v2896_v45 = vcombine.low %v12059_v18, %v1987_v24  ;;  %v2765_v37 = vrot.slane %v2757_v52, %v10573_v16  ;;  %v2870_v28 = vrot.slane %v2848_v26, %v10573_v16  ;;  %v2895_v53 = vcombine.low %v1988_v19, %v1971_v57 }
 0x1a8   :  { %v1697_v56 = vpop.f32.mrb[7].mxu0  ;;  %v1857_v51 = vrot.slane %v1843_v7, %v10573_v16  ;;  %v2886_v27 = vrot.slane %v2878_v39, %v10573_v16  ;;  %v2877_v43 = vrot.slane %v2849_v32, %v10573_v16  ;;  %v1858_v35 = vcombine.high %v1850_v63, %v1850_v63 }
 0x1a9   :  { %v2912_v31 = vrot.slane %v2896_v45, %v10573_v16  ;;  %v12076_v49 = vsel %vm3720_vm10, %v2845_v14, -inf  ;;  %v2773_v61 = vcombine.low %v2765_v37, %v2772_v4  ;;  %v2905_v60 = vrot.slane %v2895_v53, %v10573_v16 }
 0x1aa   :  { %v1859_v1 = vcombine.high %v1857_v51, %v1857_v51  ;;  %v2879_v6 = vcombine.low %v2870_v28, %v2877_v43  ;;  %v1866_v48 = vrot.slane %v1850_v63, %v10573_v16  ;;  %v1880_v8 = vrot.slane %v1858_v35, %v10573_v16 }
 0x1ab   :  { %v1762_v17 = vmax.f32 %v1703_v25, 0.0  ;;  %v12081_v38 = vcombine.low %v2905_v60, %v2912_v31  ;;  %v1873_v20 = vrot.slane %v1857_v51, %v10573_v16  ;;  %v1695_v34 = vadd.f32 %v12022_v42, %v1694_v12 }
 0x1ac   :  { %v1887_v2 = vrot.slane %v1859_v1, %v10573_v16  ;;  %v2893_v40 = vrot.slane %v2879_v6, %v10573_v16  ;;  %v2774_v41 = vcombine.low %v1866_v48, %v1880_v8  ;;  %v9742_v44 = vcombine.high %v1866_v48, %v1880_v8 }
 0x1ad   :  { %v2088_v15 = vcombine.high %v1762_v17, %v1762_v17  ;;  %v2095_v23 = vrot.slane %v1762_v17, %v10573_v16  ;;  %v1706_v10 = vadd.f32 %v9939_v46, %v12022_v42  ;;  %v3717_v50 = vsel %vm280_vm5, %v2773_v61, -inf }
 0x1ae   :  { %v2776_v29 = vcombine.low %v1873_v20, %v1887_v2  ;;  %v9743_v58 = vcombine.high %v1873_v20, %v1887_v2  ;;  %v2894_v5 = vcombine.low %v2886_v27, %v2893_v40  ;;  %v2784_v36 = vrot.slane %v2774_v41, %v10573_v16 }
 0x1af   :  { %v2791_v11 = vrot.slane %v9742_v44, %v10573_v16  ;;  %v2102_v22 = vrot.slane %v2088_v15, %v10573_v16  ;;  %v2103_v9 = vcombine.high %v2095_v23, %v2095_v23  ;;  %v2111_v57 = vrot.slane %v2095_v23, %v10573_v16 }
 0x1b0   :  { %v2798_v33 = vrot.slane %v2776_v29, %v10573_v16  ;;  %v2805_v47 = vrot.slane %v9743_v58, %v10573_v16  ;;  %v1989_v55 = vcombine.high %v12059_v18, %v12059_v18  ;;  %v1760_v59 = vmax.f32 %v1695_v34, 0.0 }
 0x1b1   :  { %v2806_v62 = vcombine.low %v2784_v36, %v2791_v11  ;;  %v2104_v13 = vcombine.high %v2102_v22, %v2102_v22  ;;  %v2125_v52 = vrot.slane %v2103_v9, %v10573_v16  ;;  %v1763_v30 = vmax.f32 %v1706_v10, 0.0 }
 0x1b2   :  { %v2807_v54 = vcombine.low %v2798_v33, %v2805_v47  ;;  %v2935_v12 = vrot.slane %v12081_v38, %v10573_v16  ;;  %v12102_v14 = vsel %vm280_vm5, %v2894_v5, -inf  ;;  %v2118_v39 = vrot.slane %v2102_v22, %v10573_v16 }
 0x1b3   :  { %v2132_v3 = vrot.slane %v2104_v13, %v10573_v16  ;;  %v2814_v24 = vrot.slane %v2806_v62, %v10573_v16  ;;  %v9747_v18 = vcombine.high %v2111_v57, %v2125_v52  ;;  %v1990_v4 = vcombine.high %v1760_v59, %v1760_v59 }
 0x1b4   :  { %v2821_v46 = vrot.slane %v2807_v54, %v10573_v16  ;;  %v1997_v26 = vrot.slane %v1760_v59, %v10573_v16  ;;  %v2137_v7 = vcombine.high %v1763_v30, %v1763_v30  ;;  %v1698_v32 = vadd.f32 %v12022_v42, %v1697_v56 }
 0x1b5   :  { %v3019_v19 = vcombine.low %v2118_v39, %v2132_v3  ;;  %v3017_v63 = vcombine.low %v2111_v57, %v2125_v52  ;;  %v9748_v25 = vcombine.high %v2118_v39, %v2132_v3  ;;  %v2004_v37 = vrot.slane %v1990_v4, %v10573_v16 }
 0x1b6   :  { %v2822_v45 = vcombine.low %v2814_v24, %v2821_v46  ;;  %v2005_v53 = vcombine.high %v1997_v26, %v1997_v26  ;;  %v2013_v51 = vrot.slane %v1997_v26, %v10573_v16  ;;  %v2144_v27 = vrot.slane %v1763_v30, %v10573_v16 }
 0x1b7   :  { %v3047_v28 = vrot.slane %v3019_v19, %v10573_v16  ;;  %v3040_v31 = vrot.slane %v9747_v18, %v10573_v16  ;;  %v2006_v35 = vcombine.high %v2004_v37, %v2004_v37  ;;  %v2151_v61 = vrot.slane %v2137_v7, %v10573_v16 }
 0x1b8   :  { %v3718_v43 = vsel %vm280_vm5, %v2822_v45, -inf  ;;  %v2020_v60 = vrot.slane %v2004_v37, %v10573_v16  ;;  %v2027_v1 = vrot.slane %v2005_v53, %v10573_v16  ;;  %v2035_v6 = vcombine.high %v2013_v51, %v2013_v51  ;;  %v9942_v48 = vpop.f32.mrb[8].mxu0 }
 0x1b9   :  { %v3719_v56 = vmax.f32 %v3717_v50, %v3718_v43  ;;  %v3049_v8 = vcombine.low %v3040_v31, %v3047_v28  ;;  %v2034_v17 = vrot.slane %v2006_v35, %v10573_v16  ;;  %v2897_v20 = vcombine.low %v1989_v55, %v2013_v51  ;;  %v1710_v34 = vpop.f32.mrb[9].mxu0  ;;  %v12120_v40 = vpop.f32.mrb[0].mxu1 }
 0x1ba   :  { %v2152_v2 = vcombine.high %v2144_v27, %v2144_v27  ;;  %v12124_v44 = vrot.slane %v3017_v63, %v10573_v16  ;;  %v2037_v15 = vcombine.high %v2027_v1, %v2027_v1  ;;  %v2898_v29 = vcombine.low %v2027_v1, %v2035_v6  ;;  %v12126_v58 = vpop.f32.mrb[10].mxu0  ;;  %v9960_v23 = vpop.f32.mrb[1].mxu1 }
 0x1bb   :  { %v3722_v41 = vmax.f32 %v3719_v56, %v12076_v49  ;;  %v2919_v10 = vrot.slane %v2897_v20, %v10573_v16  ;;  %v9744_v5 = vcombine.high %v2020_v60, %v2034_v17  ;;  %v2153_v36 = vcombine.high %v2151_v61, %v2151_v61  ;;  %v12130_v22 = vpop.f32.mrb[11].mxu0  ;;  %v12132_v50 = vpop.f32.mrb[2].mxu1 }
 0x1bc   :  { %v2160_v11 = vrot.slane %v2144_v27, %v10573_v16  ;;  %v2926_v49 = vrot.slane %v2898_v29, %v10573_v16  ;;  %v2944_v47 = vcombine.low %v2037_v15, %v2020_v60  ;;  %v2167_v9 = vrot.slane %v2151_v61, %v10573_v16  ;;  %v9961_v62 = vpop.f32.mrb[3].mxu1 }
 0x1bd   :  { %v3723_v33 = vrot.slane %v3722_v41, 4  ;;  %v12137_v13 = vrot.slane %v3049_v8, %v10573_v16  ;;  %v2958_v57 = vrot.slane %v2034_v17, %v10573_v16  ;;  %v2174_v55 = vrot.slane %v2152_v2, %v10573_v16 }
 0x1be   :  { %v2182_v54 = vcombine.high %v2160_v11, %v2160_v11  ;;  %v2928_v59 = vcombine.low %v2919_v10, %v2926_v49  ;;  %v2951_v30 = vrot.slane %v2944_v47, %v10573_v16  ;;  %v12145_v39 = vrot.slane %v9744_v5, %v10573_v16 }
 0x1bf   :  { %v12141_v52 = vmax.f32 %v3722_v41, %v3723_v33  ;;  %v12148_v3 = vrot.slane %v2153_v36, %v10573_v16  ;;  %v2184_v24 = vcombine.high %v2174_v55, %v2174_v55  ;;  %v3072_v46 = vrot.slane %v9748_v25, %v10573_v16 }
 0x1c0   :  { %v3079_v18 = vrot.slane %v2160_v11, %v10573_v16  ;;  %v2942_v4 = vrot.slane %v2928_v59, %v10573_v16  ;;  %v2959_v19 = vcombine.low %v2951_v30, %v2958_v57  ;;  %v2183_v26 = vcombine.high %v2167_v9, %v2167_v9 }
 0x1c1   :  { %13424 = vst [vmem:[#allocation13_spill] sm:$0xff] %v12141_v52  ;;  %v3088_v7 = vcombine.low %v2174_v55, %v2182_v54  ;;  %v3089_v37 = vcombine.low %v2184_v24, %v2167_v9  ;;  %v1761_v28 = vmax.f32 %v1698_v32, 0.0  ;;  %v1719_v25 = vadd.f32 %v9942_v48, %v12022_v42 }
 0x1c2   :  { %v3080_v63 = vcombine.low %v3072_v46, %v3079_v18  ;;  %v2943_v53 = vcombine.low %v2935_v12, %v2942_v4  ;;  %v2966_v51 = vrot.slane %v2959_v19, %v10573_v16  ;;  %v1711_v27 = vadd.f32 %v12022_v42, %v1710_v34 }
 0x1c3   :  { %v3105_v31 = vrot.slane %v3089_v37, %v10573_v16  ;;  %v2039_v35 = vcombine.high %v1761_v28, %v1761_v28  ;;  %v2046_v61 = vrot.slane %v1761_v28, %v10573_v16  ;;  %v12165_v32 = vcombine.low %v12148_v3, %v2183_v26 }
 0x1c4   :  { %v3087_v43 = vrot.slane %v3080_v63, %v10573_v16  ;;  %v3730_v56 = vsel %vm280_vm5, %v2943_v53, -inf  ;;  %v3098_v38 = vrot.slane %v3088_v7, %v10573_v16  ;;  %v1766_v12 = vmax.f32 %v1719_v25, 0.0 }
 0x1c5   :  { %v3731_v60 = vmax.f32 %v12102_v14, %v3730_v56  ;;  %v3732_v1 = vsel %vm3720_vm10, %v2966_v51, -inf  ;;  %v2053_v6 = vrot.slane %v2039_v35, %v10573_v16  ;;  %v1764_v48 = vmax.f32 %v1711_v27, 0.0 }
 0x1c6   :  { %v12173_v17 = vcombine.low %v3098_v38, %v3105_v31  ;;  %v2054_v20 = vcombine.high %v2046_v61, %v2046_v61  ;;  %v2284_v2 = vcombine.high %v1766_v12, %v1766_v12  ;;  %v2291_v34 = vrot.slane %v1766_v12, %v10573_v16 }
 0x1c7   :  { %v3733_v15 = vmax.f32 %v3731_v60, %v3732_v1  ;;  %v12179_v29 = vsel %vm3720_vm10, %v3087_v43, -inf  ;;  %v2055_v14 = vcombine.high %v2053_v6, %v2053_v6  ;;  %v2062_v23 = vrot.slane %v2046_v61, %v10573_v16 }
 0x1c8   :  { %v12171_v8 = vpop.f32.mrb[12].mxu0  ;;  %v2069_v5 = vrot.slane %v2053_v6, %v10573_v16  ;;  %v2076_v36 = vrot.slane %v2054_v20, %v10573_v16  ;;  %v2298_v11 = vrot.slane %v2284_v2, %v10573_v16  ;;  %v2299_v33 = vcombine.high %v2291_v34, %v2291_v34 }
 0x1c9   :  { %v12176_v41 = vpop.f32.mrb[13].mxu0  ;;  %v3734_v47 = vrot.slane %v3733_v15, 4  ;;  %v2083_v9 = vrot.slane %v2055_v14, %v10573_v16  ;;  %v2307_v62 = vrot.slane %v2291_v34, %v10573_v16  ;;  %v2186_v57 = vcombine.high %v1764_v48, %v1764_v48 }
 0x1ca   :  { %v12182_v10 = vpop.f32.mrb[14].mxu0  ;;  %v2968_v55 = vcombine.low %v2062_v23, %v2076_v36  ;;  %v9745_v54 = vcombine.high %v2062_v23, %v2076_v36  ;;  %v2300_v59 = vcombine.high %v2298_v11, %v2298_v11  ;;  %v2314_v30 = vrot.slane %v2298_v11, %v10573_v16 }
 0x1cb   :  { %v12187_v49 = vpop.f32.mrb[15].mxu0  ;;  %v3735_v24 = vmax.f32 %v3733_v15, %v3734_v47  ;;  %v2970_v46 = vcombine.low %v2069_v5, %v2083_v9  ;;  %v9746_v18 = vcombine.high %v2069_v5, %v2083_v9  ;;  %v2321_v4 = vrot.slane %v2299_v33, %v10573_v16 }
 0x1cc   :  { %v2984_v19 = vrot.slane %v2968_v55, %v10573_v16  ;;  %v2991_v26 = vrot.slane %v9745_v54, %v10573_v16  ;;  %v2328_v7 = vrot.slane %v2300_v59, %v10573_v16  ;;  %v2193_v63 = vrot.slane %v1764_v48, %v10573_v16 }
 0x1cd   :  { %v3736_v37 = vrot.slane %v3735_v24, 2  ;;  %v2998_v28 = vrot.slane %v2970_v46, %v10573_v16  ;;  %v3026_v53 = vrot.slane %v9746_v18, %v10573_v16  ;;  %v3211_v51 = vcombine.low %v2307_v62, %v2321_v4 }
 0x1ce   :  { %v2999_v27 = vcombine.low %v12145_v39, %v2984_v19  ;;  %v9750_v43 = vcombine.high %v2307_v62, %v2321_v4  ;;  %v3258_v31 = vcombine.low %v2314_v30, %v2328_v7  ;;  %v9751_v35 = vcombine.high %v2314_v30, %v2328_v7  ;;  %v12228_v30 = vld [vmem:[%s13323_s4] ss:$0 sm:$0xff] }
 0x1cf   :  { %v3128_v56 = vrot.slane %v12173_v17, %v10573_v16  ;;  %v3000_v38 = vcombine.low %v2991_v26, %v2998_v28  ;;  %v3048_v12 = vcombine.low %v3026_v53, %v12124_v44  ;;  %v3233_v60 = vrot.slane %v3211_v51, %v10573_v16 }
 0x1d0   :  { %v3007_v6 = vrot.slane %v2999_v27, %v10573_v16  ;;  %v3240_v48 = vrot.slane %v9750_v43, %v10573_v16  ;;  %v3268_v39 = vrot.slane %v3258_v31, %v10573_v16  ;;  %v3275_v20 = vrot.slane %v9751_v35, %v10573_v16 }
 0x1d1   :  { %v12199_v25 = vpop.f32.mrb[4].mxu1  ;;  %v3014_v34 = vrot.slane %v3000_v38, %v10573_v16  ;;  %v3056_v15 = vrot.slane %v3048_v12, %v10573_v16  ;;  %v2200_v14 = vrot.slane %v2186_v57, %v10573_v16  ;;  %v2201_v44 = vcombine.high %v2193_v63, %v2193_v63 }
 0x1d2   :  { %v9964_v61 = vpop.f32.mrb[5].mxu1  ;;  %v12215_v23 = vmax.f32 %v3735_v24, %v3736_v37  ;;  %v3242_v5 = vcombine.low %v3233_v60, %v3240_v48  ;;  %v2185_v36 = vcombine.high %v12148_v3, %v12148_v3  ;;  %v2209_v11 = vrot.slane %v2193_v63, %v10573_v16 }
 0x1d3   :  { %v12206_v1 = vpop.f32.mrb[6].mxu1  ;;  %v3015_v33 = vcombine.low %v3007_v6, %v3014_v34  ;;  %v3064_v47 = vcombine.low %v3056_v15, %v12137_v13  ;;  %v2202_v9 = vcombine.high %v2200_v14, %v2200_v14  ;;  %v2216_v62 = vrot.slane %v2200_v14, %v10573_v16 }
 0x1d4   :  { %v9965_v2 = vpop.f32.mrb[7].mxu1  ;;  %13425 = vst [vmem:[#allocation14_spill] sm:$0xff] %v12215_v23  ;;  %v3290_v55 = vcombine.low %v3268_v39, %v3275_v20  ;;  %v2223_v54 = vrot.slane %v2201_v44, %v10573_v16  ;;  %v2231_v59 = vcombine.high %v2209_v11, %v2209_v11  ;;  %v3112_v57 = vrot.slane %v12165_v32, %v10573_v16 }
 0x1d5   :  { %v3740_v24 = vsel %vm280_vm5, %v3015_v33, -inf  ;;  %v3741_v13 = vsel %vm280_vm5, %v3064_v47, -inf  ;;  %v12235_v46 = vrot.slane %v2202_v9, %v10573_v16  ;;  %v2232_v18 = vcombine.high %v2216_v62, %v2216_v62 }
 0x1d6   :  { %v3742_v19 = vmax.f32 %v3740_v24, %v3741_v13  ;;  %v2233_v26 = vcombine.high %v2223_v54, %v2223_v54  ;;  %v3091_v32 = vcombine.low %v2185_v36, %v2209_v11  ;;  %v3137_v7 = vcombine.low %v2223_v54, %v2231_v59 }
 0x1d7   :  { %v12230_v3 = vpop.f32.mrb[16].mxu0  ;;  %v12240_v37 = vrot.slane %v3242_v5, %v10573_v16  ;;  %v1722_v28 = vadd.f32 %v12126_v58, %v12022_v42  ;;  %v4950_v53 = vadd.f32 %v12228_v30, %v12120_v40  ;;  %v1714_v51 = vadd.f32 %v12022_v42, %v12130_v22 }
 0x1d8   :  { %v12237_v4 = vpop.f32.mrb[17].mxu0  ;;  %v3744_v31 = vmax.f32 %v3742_v19, %v12179_v29  ;;  %v12254_v35 = vrot.slane %v3290_v55, %v10573_v16  ;;  %v3119_v61 = vrot.slane %v3091_v32, %v10573_v16  ;;  %v3138_v38 = vcombine.low %v2233_v26, %v2216_v62 }
 0x1d9   :  { %v9951_v63 = vpop.f32.mrb[18].mxu0  ;;  %v12258_v58 = vcombine.low %v12235_v46, %v2232_v18  ;;  %v1767_v40 = vmax.f32 %v1722_v28, 0.0  ;;  %v5020_v60 = vmax.f32 %v4950_v53, 0.0  ;;  %v1765_v6 = vmax.f32 %v1714_v51, 0.0 }
 0x1da   :  { %v12248_v27 = vpop.f32.mrb[19].mxu0  ;;  %v12250_v43 = vpop.f32.mrb[8].mxu1  ;;  %v3121_v48 = vcombine.low %v3112_v57, %v3119_v61  ;;  %v3147_v39 = vrot.slane %v3137_v7, %v10573_v16  ;;  %v3154_v29 = vrot.slane %v3138_v38, %v10573_v16  ;;  %v2234_v20 = vcombine.high %v12235_v46, %v12235_v46 }
 0x1db   :  { %v9968_v12 = vpop.f32.mrb[9].mxu1  ;;  %v2333_v34 = vcombine.high %v1767_v40, %v1767_v40  ;;  %v2340_v15 = vrot.slane %v1767_v40, %v10573_v16  ;;  %v5056_v14 = vcombine.high %v5020_v60, %v5020_v60  ;;  %v5063_v44 = vrot.slane %v5020_v60, %v12055_v21 }
 0x1dc   :  { %v12260_v22 = vpop.f32.mrb[10].mxu1  ;;  %v3745_v5 = vrot.slane %v3744_v31, 4  ;;  %v3135_v36 = vrot.slane %v3121_v48, %v10573_v16  ;;  %v12269_v11 = vcombine.low %v3147_v39, %v3154_v29  ;;  %v2235_v33 = vcombine.high %v1765_v6, %v1765_v6 }
 0x1dd   :  { %v9969_v2 = vpop.f32.mrb[11].mxu1  ;;  %v2347_v47 = vrot.slane %v2333_v34, %v10573_v16  ;;  %v2348_v9 = vcombine.high %v2340_v15, %v2340_v15  ;;  %v5070_v62 = vrot.slane %v5056_v14, %v12055_v21  ;;  %v3161_v55 = vrot.slane %v12258_v58, %v10573_v16 }
 0x1de   :  { %v3136_v59 = vcombine.low %v3128_v56, %v3135_v36  ;;  %v2356_v57 = vrot.slane %v2340_v15, %v10573_v16  ;;  %v5071_v24 = vcombine.high %v5063_v44, %v5063_v44  ;;  %v2242_v13 = vrot.slane %v1765_v6, %v10573_v16 }
 0x1df   :  { %v12275_v54 = vpop.f32.mrb[20].mxu0  ;;  %v2349_v18 = vcombine.high %v2347_v47, %v2347_v47  ;;  %v2363_v19 = vrot.slane %v2347_v47, %v10573_v16  ;;  %v2370_v26 = vrot.slane %v2348_v9, %v10573_v16  ;;  %v5072_v32 = vcombine.high %v5070_v62, %v5070_v62 }
 0x1e0   :  { %v10004_v46 = vpop.f32.mrb[21].mxu0  ;;  %v12286_v63 = vmax.f32 %v3744_v31, %v3745_v5  ;;  %v3177_v17 = vrot.slane %v12269_v11, %v10573_v16  ;;  %v2249_v56 = vrot.slane %v2235_v33, %v10573_v16  ;;  %v2250_v28 = vcombine.high %v2242_v13, %v2242_v13 }
 0x1e1   :  { %v12284_v7 = vpop.f32.mrb[22].mxu0  ;;  %v12292_v51 = vrot.slane %v2349_v18, %v10573_v16  ;;  %v2379_v61 = vcombine.high %v2363_v19, %v2363_v19  ;;  %v3260_v38 = vcombine.low %v2356_v57, %v2370_v26  ;;  %v9752_v12 = vcombine.high %v2356_v57, %v2370_v26 }
 0x1e2   :  { %13426 = vst [vmem:[#allocation3_spill] sm:$0xff] %v12286_v63  ;;  %v10005_v53 = vpop.f32.mrb[23].mxu0  ;;  %v12295_v58 = vsel %vm280_vm5, %v3136_v59, -inf  ;;  %v5363_v40 = vcombine.low %v5070_v62, %v5072_v32  ;;  %v2251_v60 = vcombine.high %v2249_v56, %v2249_v56  ;;  %v2258_v31 = vrot.slane %v2242_v13, %v10573_v16 }
 0x1e3   :  { %v3282_v6 = vrot.slane %v3260_v38, %v10573_v16  ;;  %v3289_v48 = vrot.slane %v9752_v12, %v10573_v16  ;;  %v3307_v39 = vcombine.low %v2363_v19, %v12292_v51  ;;  %v5362_v29 = vcombine.low %v5063_v44, %v5071_v24 }
 0x1e4   :  { %v3321_v2 = vrot.slane %v2379_v61, %v10573_v16  ;;  %v2265_v34 = vrot.slane %v2249_v56, %v10573_v16  ;;  %v2272_v15 = vrot.slane %v2250_v28, %v10573_v16  ;;  %v2279_v14 = vrot.slane %v2251_v60, %v10573_v16 }
 0x1e5   :  { %v3291_v5 = vcombine.low %v3282_v6, %v3289_v48  ;;  %v3314_v36 = vrot.slane %v3307_v39, %v10573_v16  ;;  %v2280_v11 = vcombine.high %v2258_v31, %v2258_v31  ;;  %v3140_v33 = vcombine.low %v2234_v20, %v2258_v31 }
 0x1e6   :  { %v5377_v47 = vrot.slane %v5363_v40, %v12055_v21  ;;  %v2282_v9 = vcombine.high %v2272_v15, %v2272_v15  ;;  %v3209_v62 = vcombine.low %v2265_v34, %v2279_v14  ;;  %v9749_v59 = vcombine.high %v2265_v34, %v2279_v14 }
 0x1e7   :  { %v3305_v44 = vrot.slane %v3291_v5, %v10573_v16  ;;  %v3322_v24 = vcombine.low %v3314_v36, %v3321_v2  ;;  %v3168_v13 = vrot.slane %v3140_v33, %v10573_v16  ;;  %v3186_v46 = vcombine.low %v2272_v15, %v2280_v11 }
 0x1e8   :  { %v3200_v19 = vrot.slane %v2282_v9, %v10573_v16  ;;  %v3219_v26 = vrot.slane %v3209_v62, %v10573_v16  ;;  %v3226_v20 = vrot.slane %v9749_v59, %v10573_v16  ;;  %v4953_v32 = vadd.f32 %v12228_v30, %v12132_v50 }
 0x1e9   :  { %v12307_v57 = vpop.f32.mrb[12].mxu1  ;;  %v3306_v28 = vcombine.low %v12254_v35, %v3305_v44  ;;  %v5370_v53 = vrot.slane %v5362_v29, %v12055_v21  ;;  %v3170_v61 = vcombine.low %v3161_v55, %v3168_v13  ;;  %v3193_v38 = vrot.slane %v3186_v46, %v10573_v16 }
 0x1ea   :  { %v9972_v18 = vpop.f32.mrb[13].mxu1  ;;  %v3241_v40 = vcombine.low %v3219_v26, %v3226_v20  ;;  %v5021_v60 = vmax.f32 %v4953_v32, 0.0  ;;  %v1735_v31 = vadd.f32 %v12171_v8, %v12022_v42  ;;  %v1727_v6 = vadd.f32 %v12022_v42, %v12176_v41 }
 0x1eb   :  { %v12316_v56 = vpop.f32.mrb[14].mxu1  ;;  %v3329_v50 = vrot.slane %v3322_v24, %v10573_v16  ;;  %v12326_v48 = vcombine.low %v5370_v53, %v5377_v47  ;;  %v3184_v35 = vrot.slane %v3170_v61, %v10573_v16  ;;  %v3201_v39 = vcombine.low %v3193_v38, %v3200_v19 }
 0x1ec   :  { %v9973_v12 = vpop.f32.mrb[15].mxu1  ;;  %v3249_v55 = vrot.slane %v3241_v40, %v10573_v16  ;;  %v5073_v29 = vcombine.high %v5021_v60, %v5021_v60  ;;  %v5080_v2 = vrot.slane %v5021_v60, %v12055_v21  ;;  %v1770_v34 = vmax.f32 %v1735_v31, 0.0 }
 0x1ed   :  { %v12332_v15 = vsel %vm280_vm5, %v3306_v28, -inf  ;;  %v3185_v8 = vcombine.low %v3177_v17, %v3184_v35  ;;  %v3208_v14 = vrot.slane %v3201_v39, %v10573_v16  ;;  %v1768_v41 = vmax.f32 %v1727_v6, 0.0 }
 0x1ee   :  { %13427 = vst [vmem:[#allocation12_spill] sm:$0xff] %v12332_v15  ;;  %v3257_v5 = vcombine.low %v3249_v55, %v12240_v37  ;;  %v5087_v36 = vrot.slane %v5073_v29, %v12055_v21  ;;  %v5088_v11 = vcombine.high %v5080_v2, %v5080_v2  ;;  %v2480_v33 = vcombine.high %v1770_v34, %v1770_v34 }
 0x1ef   :  { %v12338_v47 = vsel %vm3720_vm10, %v3329_v50, -inf  ;;  %v3752_v9 = vsel %vm280_vm5, %v3185_v8, -inf  ;;  %v2487_v62 = vrot.slane %v1770_v34, %v10573_v16  ;;  %v2382_v59 = vcombine.high %v1768_v41, %v1768_v41 }
 0x1f0   :  { %13428 = vst [vmem:[#allocation5_spill] sm:$0xff] %v12338_v47  ;;  %v3753_v17 = vmax.f32 %v12295_v58, %v3752_v9  ;;  %v12346_v24 = vsel %vm280_vm5, %v3257_v5, -inf  ;;  %v5089_v37 = vcombine.high %v5087_v36, %v5087_v36  ;;  %v5379_v13 = vcombine.low %v5080_v2, %v5088_v11 }
 0x1f1   :  { %13429 = vst [vmem:[#allocation4_spill] sm:$0xff] %v12346_v24  ;;  %v3754_v18 = vsel %vm3720_vm10, %v3208_v14, -inf  ;;  %v2494_v26 = vrot.slane %v2480_v33, %v10573_v16  ;;  %v2495_v20 = vcombine.high %v2487_v62, %v2487_v62  ;;  %v2381_v58 = vcombine.high %v12292_v51, %v12292_v51 }
 0x1f2   :  { %v12342_v44 = vpop.f32.mrb[24].mxu0  ;;  %v3755_v28 = vmax.f32 %v3753_v17, %v3754_v18  ;;  %v5380_v53 = vcombine.low %v5087_v36, %v5089_v37  ;;  %v2389_v61 = vrot.slane %v1768_v41, %v10573_v16  ;;  %v12358_v40 = vrot.slane %v2487_v62, %v10573_v16 }
 0x1f3   :  { %v10008_v46 = vpop.f32.mrb[25].mxu0  ;;  %v2496_v12 = vcombine.high %v2494_v26, %v2494_v26  ;;  %v12361_v60 = vrot.slane %v2495_v20, %v10573_v16  ;;  %v2396_v31 = vrot.slane %v2382_v59, %v10573_v16  ;;  %v5387_v50 = vrot.slane %v5379_v13, %v12055_v21 }
 0x1f4   :  { %v12352_v32 = vpop.f32.mrb[26].mxu0  ;;  %v3756_v6 = vrot.slane %v3755_v28, 4  ;;  %v2397_v35 = vcombine.high %v2389_v61, %v2389_v61  ;;  %v2405_v39 = vrot.slane %v2389_v61, %v10573_v16  ;;  %v5394_v51 = vrot.slane %v5380_v53, %v12055_v21 }
 0x1f5   :  { %v10009_v38 = vpop.f32.mrb[27].mxu0  ;;  %v2510_v55 = vrot.slane %v2494_v26, %v10573_v16  ;;  %v2524_v29 = vrot.slane %v2496_v12, %v10573_v16  ;;  %v2398_v2 = vcombine.high %v2396_v31, %v2396_v31  ;;  %v3442_v34 = vrot.slane %v12361_v60, %v10573_v16 }
 0x1f6   :  { %v9753_v8 = vcombine.high %v12358_v40, %v12361_v60  ;;  %v2412_v14 = vrot.slane %v2396_v31, %v10573_v16  ;;  %v2419_v41 = vrot.slane %v2397_v35, %v10573_v16  ;;  %v12375_v5 = vmax.f32 %v3755_v28, %v3756_v6 }
 0x1f7   :  { %v3452_v36 = vcombine.low %v2510_v55, %v2524_v29  ;;  %v9754_v11 = vcombine.high %v2510_v55, %v2524_v29  ;;  %v2426_v33 = vrot.slane %v2398_v2, %v10573_v16  ;;  %v2427_v9 = vcombine.high %v2405_v39, %v2405_v39 }
 0x1f8   :  { %13430 = vst [vmem:[#allocation7_spill] sm:$0xff] %v12375_v5  ;;  %v2428_v62 = vcombine.high %v2412_v14, %v2412_v14  ;;  %v2429_v59 = vcombine.high %v2419_v41, %v2419_v41  ;;  %v3330_v17 = vcombine.low %v2381_v58, %v2405_v39  ;;  %v12378_v37 = vcombine.low %v5387_v50, %v5394_v51 }
 0x1f9   :  { %v3468_v13 = vrot.slane %v3452_v36, %v10573_v16  ;;  %v1738_v46 = vadd.f32 %v12182_v10, %v12022_v42  ;;  %v1730_v18 = vadd.f32 %v12022_v42, %v12187_v49  ;;  %v3461_v26 = vrot.slane %v9753_v8, %v10573_v16 }
 0x1fa   :  { %v3331_v20 = vcombine.low %v2419_v41, %v2427_v9  ;;  %v3332_v28 = vcombine.low %v2429_v59, %v2412_v14  ;;  %v3333_v53 = vcombine.low %v2426_v33, %v2428_v62  ;;  %v12387_v61 = vrot.slane %v9754_v11, %v10573_v16 }
 0x1fb   :  { %v3340_v58 = vrot.slane %v3330_v17, %v10573_v16  ;;  %v1771_v38 = vmax.f32 %v1738_v46, 0.0  ;;  %v1769_v12 = vmax.f32 %v1730_v18, 0.0  ;;  %v3483_v6 = vcombine.low %v3461_v26, %v3468_v13 }
 0x1fc   :  { %v3347_v10 = vrot.slane %v3331_v20, %v10573_v16  ;;  %v3354_v50 = vrot.slane %v3332_v28, %v10573_v16  ;;  %v3361_v42 = vrot.slane %v3333_v53, %v10573_v16  ;;  %v2430_v51 = vcombine.high %v2426_v33, %v2426_v33 }
 0x1fd   :  { %v2529_v35 = vcombine.high %v1771_v38, %v1771_v38  ;;  %v2536_v39 = vrot.slane %v1771_v38, %v10573_v16  ;;  %v2431_v55 = vcombine.high %v1769_v12, %v1769_v12  ;;  %v2438_v14 = vrot.slane %v1769_v12, %v10573_v16 }
 0x1fe   :  { %v12390_v31 = vpop.f32.mrb[16].mxu1  ;;  %v3362_v2 = vcombine.low %v3340_v58, %v3347_v10  ;;  %v3363_v8 = vcombine.low %v3354_v50, %v3361_v42  ;;  %v4958_v41 = vadd.f32 %v12228_v30, %v12199_v25 }
 0x1ff   :  { %v9976_v49 = vpop.f32.mrb[17].mxu1  ;;  %v2543_v11 = vrot.slane %v2529_v35, %v10573_v16  ;;  %v2544_v9 = vcombine.high %v2536_v39, %v2536_v39  ;;  %v2552_v62 = vrot.slane %v2536_v39, %v10573_v16  ;;  %v2445_v59 = vrot.slane %v2431_v55, %v10573_v16 }
 0x200   :  { %v12396_v29 = vpop.f32.mrb[18].mxu1  ;;  %v3370_v33 = vrot.slane %v3362_v2, %v10573_v16  ;;  %v3377_v17 = vrot.slane %v3363_v8, %v10573_v16  ;;  %v2446_v13 = vcombine.high %v2438_v14, %v2438_v14  ;;  %v2454_v46 = vrot.slane %v2438_v14, %v10573_v16 }
 0x201   :  { %v9977_v36 = vpop.f32.mrb[19].mxu1  ;;  %v2545_v18 = vcombine.high %v2543_v11, %v2543_v11  ;;  %v2559_v26 = vrot.slane %v2543_v11, %v10573_v16  ;;  %v2566_v25 = vrot.slane %v2544_v9, %v10573_v16  ;;  %v2447_v20 = vcombine.high %v2445_v59, %v2445_v59 }
 0x202   :  { %v3378_v28 = vcombine.low %v3370_v33, %v3377_v17  ;;  %v2461_v53 = vrot.slane %v2445_v59, %v10573_v16  ;;  %v2468_v58 = vrot.slane %v2446_v13, %v10573_v16  ;;  %v2476_v38 = vcombine.high %v2454_v46, %v2454_v46 }
 0x203   :  { %v2573_v12 = vrot.slane %v2545_v18, %v10573_v16  ;;  %v3454_v10 = vcombine.low %v2552_v62, %v2566_v25  ;;  %v9755_v50 = vcombine.high %v2552_v62, %v2566_v25  ;;  %v2475_v42 = vrot.slane %v2447_v20, %v10573_v16 }
 0x204   :  { %v3491_v35 = vrot.slane %v3483_v6, %v10573_v16  ;;  %v2477_v39 = vcombine.high %v2461_v53, %v2461_v53  ;;  %v2478_v55 = vcombine.high %v2468_v58, %v2468_v58  ;;  %v3379_v2 = vcombine.low %v2430_v51, %v2454_v46 }
 0x205   :  { %v12413_v49 = vpop.f32.mrb[28].mxu0  ;;  %v3482_v14 = vrot.slane %v3454_v10, %v10573_v16  ;;  %v3501_v36 = vcombine.low %v2559_v26, %v2573_v12  ;;  %v9756_v11 = vcombine.high %v2559_v26, %v2573_v12  ;;  %v5022_v9 = vmax.f32 %v4958_v41, 0.0 }
 0x206   :  { %v10012_v8 = vpop.f32.mrb[29].mxu0  ;;  %v2479_v62 = vcombine.high %v2475_v42, %v2475_v42  ;;  %v3380_v17 = vcombine.low %v2468_v58, %v2476_v38  ;;  %v3381_v13 = vcombine.low %v2478_v55, %v2461_v53  ;;  %v3382_v18 = vcombine.low %v2475_v42, %v2477_v39 }
 0x207   :  { %v12417_v59 = vpop.f32.mrb[30].mxu0  ;;  %v3484_v20 = vcombine.low %v12387_v61, %v3482_v14  ;;  %v3510_v51 = vrot.slane %v9755_v50, %v10573_v16  ;;  %v3517_v46 = vrot.slane %v3501_v36, %v10573_v16  ;;  %v3389_v10 = vrot.slane %v3379_v2, %v10573_v16 }
 0x208   :  { %v12419_v33 = vpop.f32.mrb[20].mxu1  ;;  %v10013_v25 = vpop.f32.mrb[31].mxu0  ;;  %v3396_v41 = vrot.slane %v3380_v17, %v10573_v16  ;;  %v3403_v12 = vrot.slane %v3381_v13, %v10573_v16  ;;  %v3410_v58 = vrot.slane %v3382_v18, %v10573_v16  ;;  %v3428_v53 = vcombine.low %v2479_v62, %v12358_v40 }
 0x209   :  { %v9980_v6 = vpop.f32.mrb[21].mxu1  ;;  %v3498_v42 = vrot.slane %v3484_v20, %v10573_v16  ;;  %v3532_v61 = vcombine.low %v3510_v51, %v3517_v46  ;;  %v5090_v39 = vcombine.high %v5022_v9, %v5022_v9  ;;  %v5097_v50 = vrot.slane %v5022_v9, %v12055_v21 }
 0x20a   :  { %v12425_v26 = vpop.f32.mrb[22].mxu1  ;;  %v12434_v55 = vsel %vm280_vm5, %v3378_v28, -inf  ;;  %v3411_v2 = vcombine.low %v3389_v10, %v3396_v41  ;;  %v3412_v8 = vcombine.low %v3403_v12, %v3410_v58  ;;  %v3435_v14 = vrot.slane %v3428_v53, %v10573_v16 }
 0x20b   :  { %v9981_v38 = vpop.f32.mrb[23].mxu1  ;;  %13431 = vst [vmem:[#allocation9_spill] sm:$0xff] %v12434_v55  ;;  %v3499_v36 = vcombine.low %v3491_v35, %v3498_v42  ;;  %v12438_v17 = vrot.slane %v9756_v11, %v10573_v16  ;;  %v5104_v40 = vrot.slane %v5090_v39, %v12055_v21  ;;  %v5105_v62 = vcombine.high %v5097_v50, %v5097_v50 }
 0x20c   :  { %v3419_v13 = vrot.slane %v3411_v2, %v10573_v16  ;;  %v3426_v18 = vrot.slane %v3412_v8, %v10573_v16  ;;  %v12446_v28 = vcombine.low %v3435_v14, %v3442_v34  ;;  %v5402_v9 = vrot.slane %v5097_v50, %v12055_v21 }
 0x20d   :  { %v12450_v25 = vrot.slane %v3532_v61, %v10573_v16  ;;  %v5714_v35 = vsel %vm280_vm5, %v12326_v48, -inf  ;;  %v5715_v11 = vsel %vm280_vm5, %v12378_v37, -inf  ;;  %v4961_v6 = vadd.f32 %v12228_v30, %v12206_v1  ;;  %v10129_v48 = vld [vmem:[%s13322_s2] ss:$0 sm:$0xff] }
 0x20e   :  { %13432 = vst [vmem:[#allocation6_spill] sm:$0xff] %v12446_v28  ;;  %v12459_v20 = vsel %vm280_vm5, %v3499_v36, -inf  ;;  %v3427_v60 = vcombine.low %v3419_v13, %v3426_v18  ;;  %v5403_v34 = vcombine.low %v5105_v62, %v5104_v40  ;;  %v5716_v51 = vmax.f32 %v5714_v35, %v5715_v11 }
 0x20f   :  { %v5718_v10 = vsel %vm5717_vm11, %v5402_v9, -inf  ;;  %v5023_v41 = vmax.f32 %v4961_v6, 0.0  ;;  %v5106_v12 = vcombine.high %v5104_v40, %v5104_v40  ;;  %v1751_v37 = vadd.f32 %v10129_v48, %v12230_v3 }
 0x210   :  { %v12469_v1 = vsel %vm280_vm5, %v3427_v60, -inf  ;;  %v5719_v53 = vmax.f32 %v5716_v51, %v5718_v10  ;;  %v1743_v38 = vadd.f32 %v10129_v48, %v12237_v4  ;;  %v1746_v42 = vadd.f32 %v10129_v48, %v12248_v27 }
 0x211   :  { %v12461_v46 = vpop.f32.mrb[32].mxu0  ;;  %13433 = vst [vmem:[#allocation11_spill] sm:$0xff] %v12469_v1  ;;  %v5107_v50 = vcombine.high %v5023_v41, %v5023_v41  ;;  %v5114_v2 = vrot.slane %v5023_v41, %v12055_v21  ;;  %v1774_v8 = vmax.f32 %v1751_v37, 0.0  ;;  %v5411_v36 = vrot.slane %v5403_v34, %v12055_v21 }
 0x212   :  { %v10016_v58 = vpop.f32.mrb[33].mxu0  ;;  %v5720_v40 = vrot.slane %v5719_v53, 4  ;;  %v1772_v62 = vmax.f32 %v1743_v38, 0.0  ;;  %v1773_v10 = vmax.f32 %v1746_v42, 0.0  ;;  %v4966_v34 = vadd.f32 %v12228_v30, %v12250_v43 }
 0x213   :  { %v12473_v61 = vpop.f32.mrb[34].mxu0  ;;  %v12482_v4 = vrot.slane %v5107_v50, %v12055_v21  ;;  %v5122_v27 = vcombine.high %v5114_v2, %v5114_v2  ;;  %v5404_v13 = vcombine.low %v5106_v12, %v5114_v2  ;;  %v2676_v18 = vcombine.high %v1774_v8, %v1774_v8 }
 0x214   :  { %v10017_v14 = vpop.f32.mrb[35].mxu0  ;;  %v5721_v9 = vmax.f32 %v5719_v53, %v5720_v40  ;;  %v2683_v35 = vrot.slane %v1774_v8, %v10573_v16  ;;  %v2578_v11 = vcombine.high %v1772_v62, %v1772_v62  ;;  %v2585_v6 = vrot.slane %v1772_v62, %v10573_v16 }
 0x215   :  { %v5418_v60 = vrot.slane %v5404_v13, %v12055_v21  ;;  %v2690_v51 = vrot.slane %v2676_v18, %v10573_v16  ;;  %v12495_v53 = vcombine.low %v5122_v27, %v12482_v4  ;;  %v2627_v18 = vcombine.high %v1773_v10, %v1773_v10 }
 0x216   :  { %v5722_v41 = vrot.slane %v5721_v9, 2  ;;  %v2691_v48 = vcombine.high %v2683_v35, %v2683_v35  ;;  %v12491_v37 = vrot.slane %v2683_v35, %v10573_v16  ;;  %v2592_v12 = vrot.slane %v2578_v11, %v10573_v16 }
 0x217   :  { %v5419_v58 = vcombine.low %v5411_v36, %v5418_v60  ;;  %v2692_v38 = vcombine.high %v2690_v51, %v2690_v51  ;;  %v2706_v50 = vrot.slane %v2690_v51, %v10573_v16  ;;  %v2593_v14 = vcombine.high %v2585_v6, %v2585_v6 }
 0x218   :  { %v5723_v42 = vmax.f32 %v5721_v9, %v5722_v41  ;;  %v2713_v8 = vrot.slane %v2691_v48, %v10573_v16  ;;  %v2721_v43 = vcombine.high %v12491_v37, %v12491_v37  ;;  %v2594_v36 = vcombine.high %v2592_v12, %v2592_v12 }
 0x219   :  { %v12498_v2 = vpop.f32.mrb[36].mxu0  ;;  %v2720_v62 = vrot.slane %v2692_v38, %v10573_v16  ;;  %v2722_v13 = vcombine.high %v2706_v50, %v2706_v50  ;;  %v2601_v51 = vrot.slane %v2585_v6, %v10573_v16  ;;  %v2608_v39 = vrot.slane %v2592_v12, %v10573_v16 }
 0x21a   :  { %v10020_v40 = vpop.f32.mrb[37].mxu0  ;;  %v5724_v35 = vrot.slane %v5723_v42, 1  ;;  %v2723_v11 = vcombine.high %v2713_v8, %v2713_v8  ;;  %v3623_v60 = vcombine.low %v2713_v8, %v2721_v43  ;;  %v2615_v3 = vrot.slane %v2593_v14, %v10573_v16 }
 0x21b   :  { %v12504_v27 = vpop.f32.mrb[38].mxu0  ;;  %v2724_v41 = vcombine.high %v2720_v62, %v2720_v62  ;;  %v3670_v48 = vcombine.low %v2720_v62, %v2722_v13  ;;  %v12514_v19 = vsel %vm280_vm5, %v5419_v58, -inf  ;;  %v2622_v8 = vrot.slane %v2594_v36, %v10573_v16 }
 0x21c   :  { %v10021_v9 = vpop.f32.mrb[39].mxu0  ;;  %v3624_v45 = vcombine.low %v2723_v11, %v2706_v50  ;;  %v2624_v13 = vcombine.high %v2608_v39, %v2608_v39  ;;  %v3503_v12 = vcombine.low %v2601_v51, %v2615_v3  ;;  %v12521_v14 = vmax.f32 %v5723_v42, %v5724_v35 }
 0x21d   :  { %v3677_v6 = vrot.slane %v3670_v48, %v10573_v16  ;;  %v3684_v62 = vrot.slane %v2724_v41, %v10573_v16  ;;  %v3645_v1 = vrot.slane %v3623_v60, %v10573_v16  ;;  %v9757_v58 = vcombine.high %v2601_v51, %v2615_v3 }
 0x21e   :  { %13434 = vst [vmem:[#allocation8_spill] sm:$0xff] %v12521_v14  ;;  %v3652_v38 = vrot.slane %v3624_v45, %v10573_v16  ;;  %v3531_v50 = vrot.slane %v3503_v12, %v10573_v16  ;;  %v3563_v36 = vrot.slane %v2608_v39, %v10573_v16  ;;  %v2626_v11 = vcombine.high %v2622_v8, %v2622_v8 }
 0x21f   :  { %v2634_v48 = vrot.slane %v1773_v10, %v10573_v16  ;;  %v12528_v41 = vcombine.low %v3677_v6, %v3684_v62  ;;  %v3572_v28 = vcombine.low %v2622_v8, %v2624_v13  ;;  %v2641_v42 = vrot.slane %v2627_v18, %v10573_v16 }
 0x220   :  { %v12509_v40 = vpop.f32.mrb[24].mxu1  ;;  %v12532_v35 = vcombine.low %v3645_v1, %v3652_v38  ;;  %v3533_v45 = vcombine.low %v12438_v17, %v3531_v50  ;;  %v5024_v12 = vmax.f32 %v4966_v34, 0.0 }
 0x221   :  { %v9984_v43 = vpop.f32.mrb[25].mxu1  ;;  %13435 = vst [vmem:[#allocation15_spill] sm:$0xff] %v12528_v41  ;;  %v2642_v3 = vcombine.high %v2634_v48, %v2634_v48  ;;  %v2643_v51 = vcombine.high %v2641_v42, %v2641_v42  ;;  %v2657_v39 = vrot.slane %v2641_v42, %v10573_v16  ;;  %v3582_v17 = vrot.slane %v3572_v28, %v10573_v16 }
 0x222   :  { %v12519_v9 = vpop.f32.mrb[26].mxu1  ;;  %v3556_v43 = vrot.slane %v9757_v58, %v10573_v16  ;;  %v3547_v10 = vrot.slane %v3533_v45, %v10573_v16 }
 0x223   :  { %v9985_v55 = vpop.f32.mrb[27].mxu1  ;;  %v2664_v6 = vrot.slane %v2642_v3, %v10573_v16  ;;  %v2671_v1 = vrot.slane %v2643_v51, %v10573_v16  ;;  %v2673_v38 = vcombine.high %v2657_v39, %v2657_v39 }
 0x224   :  { %v2650_v55 = vrot.slane %v2634_v48, %v10573_v16  ;;  %v3564_v60 = vcombine.low %v3556_v43, %v3563_v36  ;;  %v3548_v13 = vcombine.low %v12450_v25, %v3547_v10  ;;  %v12554_v25 = vld [vmem:[%s13324_s6] ss:$0 sm:$0xff] }
 0x225   :  { %v2674_v58 = vcombine.high %v2664_v6, %v2664_v6  ;;  %v2675_v48 = vcombine.high %v2671_v1, %v2671_v1  ;;  %v3621_v43 = vcombine.low %v2671_v1, %v2673_v38  ;;  %v4969_v1 = vadd.f32 %v12228_v30, %v12260_v22 }
 0x226   :  { %v2672_v62 = vcombine.high %v2650_v55, %v2650_v55  ;;  %v3573_v8 = vcombine.low %v2626_v11, %v2650_v55  ;;  %v3571_v18 = vrot.slane %v3564_v60, %v10573_v16  ;;  %v5123_v11 = vcombine.high %v12482_v4, %v12482_v4 }
 0x227   :  { %v3785_v45 = vsel %vm280_vm5, %v3548_v13, -inf  ;;  %v3575_v3 = vcombine.low %v2674_v58, %v2657_v39  ;;  %v3622_v10 = vcombine.low %v2675_v48, %v12491_v37  ;;  %v3631_v4 = vrot.slane %v3621_v43, %v10573_v16 }
 0x228   :  { %v3574_v50 = vcombine.low %v2664_v6, %v2672_v62  ;;  %v3589_v36 = vrot.slane %v3573_v8, %v10573_v16  ;;  %v3787_v34 = vsel %vm3720_vm10, %v3571_v18, -inf  ;;  %v3786_v51 = vmax.f32 %v12459_v20, %v3785_v45 }
 0x229   :  { %v12547_v42 = vpop.f32.mrb[40].mxu0  ;;  %v5124_v6 = vcombine.high %v5024_v12, %v5024_v12  ;;  %v3603_v39 = vrot.slane %v3575_v3, %v10573_v16  ;;  %v5131_v18 = vrot.slane %v5024_v12, %v12055_v21  ;;  %v3638_v37 = vrot.slane %v3622_v10, %v10573_v16 }
 0x22a   :  { %v3596_v28 = vrot.slane %v3574_v50, %v10573_v16  ;;  %v3604_v55 = vcombine.low %v3582_v17, %v3589_v36  ;;  %v10024_v60 = vpop.f32.mrb[41].mxu0  ;;  %v12568_v20 = vmax.f32 %v3786_v51, %v3787_v34  ;;  %v7206_v58 = vadd.f32 %v12554_v25, %v12275_v54 }
 0x22b   :  { %v12559_v62 = vpop.f32.mrb[42].mxu0  ;;  %v5138_v13 = vrot.slane %v5124_v6, %v12055_v21  ;;  %v5139_v48 = vcombine.high %v5131_v18, %v5131_v18  ;;  %v5421_v43 = vcombine.low %v5123_v11, %v5131_v18  ;;  %v5025_v12 = vmax.f32 %v4969_v1, 0.0 }
 0x22c   :  { %v3612_v8 = vrot.slane %v3604_v55, %v10573_v16  ;;  %v12566_v38 = vpop.f32.mrb[28].mxu1  ;;  %v10025_v17 = vpop.f32.mrb[43].mxu0  ;;  %13436 = vst [vmem:[#allocation10_spill] sm:$0xff] %v12568_v20  ;;  %v3605_v36 = vcombine.low %v3596_v28, %v3603_v39  ;;  %v3668_v22 = vrot.slane %v12532_v35, %v10573_v16  ;;  %v3653_v3 = vcombine.low %v3631_v4, %v3638_v37 }
 0x22d   :  { %v9988_v50 = vpop.f32.mrb[29].mxu1  ;;  %v5140_v34 = vcombine.high %v5138_v13, %v5138_v13  ;;  %v7275_v55 = vmax.f32 %v7206_v58, 0.0  ;;  %v5435_v10 = vrot.slane %v5421_v43, %v12055_v21  ;;  %v5443_v54 = vrot.slane %v5139_v48, %v12055_v21 }
 0x22e   :  { %v12574_v45 = vpop.f32.mrb[30].mxu1  ;;  %v3619_v51 = vrot.slane %v3605_v36, %v10573_v16  ;;  %v5141_v6 = vcombine.high %v5025_v12, %v5025_v12  ;;  %v3661_v28 = vrot.slane %v3653_v3, %v10573_v16  ;;  %v5148_v39 = vrot.slane %v5025_v12, %v12055_v21 }
 0x22f   :  { %v9989_v60 = vpop.f32.mrb[31].mxu1  ;;  %v5444_v11 = vcombine.low %v5138_v13, %v5140_v34  ;;  %v7309_v18 = vcombine.high %v7275_v55, %v7275_v55  ;;  %v13438_v35 = vrot.slane %v12495_v53, %v12055_v21  ;;  %v7209_v37 = vadd.f32 %v12554_v25, %v12284_v7 }
 0x230   :  { %v12583_v1 = vcombine.low %v3612_v8, %v3619_v51  ;;  %v5155_v17 = vrot.slane %v5141_v6, %v12055_v21  ;;  %v12593_v50 = vcombine.low %v3661_v28, %v3668_v22  ;;  %v5156_v13 = vcombine.high %v5148_v39, %v5148_v39 }
 0x231   :  { %v5436_v4 = vcombine.low %v13438_v35, %v5435_v10  ;;  %v7316_v36 = vrot.slane %v7275_v55, %v10573_v16  ;;  %v5729_v53 = vsel %vm5717_vm11, %v5443_v54, -inf  ;;  %v7323_v12 = vrot.slane %v7309_v18, %v10573_v16 }
 0x232   :  { %13437 = vst [vmem:[#allocation16_spill] sm:$0xff] %v12583_v1  ;;  %13439 = vst [vmem:[#allocation17_spill] sm:$0xff] %v12593_v50  ;;  %v12596_v48 = vpop.f32.mrb[44].mxu0  ;;  %v5157_v43 = vcombine.high %v5155_v17, %v5155_v17  ;;  %v5452_v34 = vrot.slane %v5444_v11, %v12055_v21  ;;  %v5445_v60 = vcombine.low %v5148_v39, %v5156_v13  ;;  %v7276_v35 = vmax.f32 %v7209_v37, 0.0 }
 0x233   :  { %v5727_v8 = vsel %vm280_vm5, %v5436_v4, -inf  ;;  %v10028_v7 = vpop.f32.mrb[45].mxu0  ;;  %v7324_v51 = vcombine.high %v7316_v36, %v7316_v36  ;;  %v7325_v6 = vcombine.high %v7323_v12, %v7323_v12  ;;  %v7332_v28 = vrot.slane %v7316_v36, %v10573_v16 }
 0x234   :  { %v12601_v3 = vpop.f32.mrb[32].mxu1  ;;  %v5728_v22 = vmax.f32 %v12514_v19, %v5727_v8  ;;  %v12605_v55 = vcombine.low %v5155_v17, %v5157_v43  ;;  %v5459_v18 = vrot.slane %v5445_v60, %v12055_v21  ;;  %v7339_v7 = vrot.slane %v7323_v12, %v10573_v16 }
 0x235   :  { %v9992_v10 = vpop.f32.mrb[33].mxu1  ;;  %v7346_v11 = vrot.slane %v7324_v51, %v10573_v16  ;;  %v7353_v19 = vrot.slane %v7325_v6, %v10573_v16  ;;  %v7358_v39 = vcombine.high %v7276_v35, %v7276_v35  ;;  %v7365_v17 = vrot.slane %v7276_v35, %v10573_v16 }
 0x236   :  { %v12608_v54 = vpop.f32.mrb[34].mxu1  ;;  %v5730_v4 = vmax.f32 %v5728_v22, %v5729_v53  ;;  %v4974_v13 = vadd.f32 %v12228_v30, %v12307_v57  ;;  %v5460_v37 = vcombine.low %v5452_v34, %v5459_v18 }
 0x237   :  { %v9993_v58 = vpop.f32.mrb[35].mxu1  ;;  %v8142_v8 = vcombine.low %v7332_v28, %v7346_v11  ;;  %v9833_v43 = vcombine.high %v7332_v28, %v7346_v11  ;;  %v8144_v53 = vcombine.low %v7339_v7, %v7353_v19  ;;  %v9834_v22 = vcombine.high %v7339_v7, %v7353_v19  ;;  %v12627_v19 = vpop.f32.mrb[46].mxu0 }
 0x238   :  { %v5731_v36 = vrot.slane %v5730_v4, 4  ;;  %v7372_v60 = vrot.slane %v7358_v39, %v10573_v16  ;;  %v7373_v12 = vcombine.high %v7365_v17, %v7365_v17  ;;  %v5469_v58 = vrot.slane %v12605_v55, %v12055_v21 }
 0x239   :  { %v8152_v51 = vrot.slane %v8142_v8, %v10573_v16  ;;  %v8159_v6 = vrot.slane %v9833_v43, %v10573_v16  ;;  %v8166_v35 = vrot.slane %v8144_v53, %v10573_v16  ;;  %v8173_v57 = vrot.slane %v9834_v22, %v10573_v16  ;;  %v10029_v43 = vpop.f32.mrb[47].mxu0 }
 0x23a   :  { %v5732_v10 = vmax.f32 %v5730_v4, %v5731_v36  ;;  %v7374_v34 = vcombine.high %v7372_v60, %v7372_v60  ;;  %v7381_v28 = vrot.slane %v7365_v17, %v10573_v16  ;;  %v7388_v11 = vrot.slane %v7372_v60, %v10573_v16 }
 0x23b   :  { %v8174_v7 = vcombine.low %v8152_v51, %v8159_v6  ;;  %v7395_v4 = vrot.slane %v7373_v12, %v10573_v16  ;;  %v8175_v55 = vcombine.low %v8166_v35, %v8173_v57  ;;  %v5026_v36 = vmax.f32 %v4974_v13, 0.0 }
 0x23c   :  { %v5733_v18 = vrot.slane %v5732_v10, 2  ;;  %v7402_v39 = vrot.slane %v7374_v34, %v10573_v16  ;;  %v4977_v8 = vadd.f32 %v12228_v30, %v12316_v56  ;;  %v5737_v35 = vsel %vm280_vm5, %v5460_v37, -inf }
 0x23d   :  { %v8182_v17 = vrot.slane %v8174_v7, %v10573_v16  ;;  %v8191_v22 = vcombine.low %v7381_v28, %v7395_v4  ;;  %v9835_v51 = vcombine.high %v7381_v28, %v7395_v4  ;;  %v8189_v60 = vrot.slane %v8175_v55, %v10573_v16 }
 0x23e   :  { %v12632_v53 = vmax.f32 %v5732_v10, %v5733_v18  ;;  %v8193_v6 = vcombine.low %v7388_v11, %v7402_v39  ;;  %v9836_v12 = vcombine.high %v7388_v11, %v7402_v39  ;;  %v5158_v41 = vcombine.high %v5026_v36, %v5026_v36 }
 0x23f   :  { %v8201_v57 = vrot.slane %v8191_v22, %v10573_v16  ;;  %v8208_v13 = vrot.slane %v9835_v51, %v10573_v16  ;;  %v5165_v30 = vrot.slane %v5026_v36, %v12055_v21  ;;  %v8190_v56 = vcombine.low %v8182_v17, %v8189_v60 }
 0x240   :  { %v8215_v10 = vrot.slane %v8193_v6, %v10573_v16  ;;  %v8222_v34 = vrot.slane %v9836_v12, %v10573_v16  ;;  %v5172_v28 = vrot.slane %v5158_v41, %v12055_v21  ;;  %v5735_v18 = vrot.slane %v12632_v53, 1 }
 0x241   :  { %v8223_v7 = vcombine.low %v8201_v57, %v8208_v13  ;;  %v5173_v11 = vcombine.high %v5165_v30, %v5165_v30  ;;  %v5027_v4 = vmax.f32 %v4977_v8, 0.0  ;;  %v7214_v43 = vadd.f32 %v12554_v25, %v12342_v44 }
 0x242   :  { %v8224_v55 = vcombine.low %v8215_v10, %v8222_v34  ;;  %v5484_v37 = vrot.slane %v5172_v28, %v12055_v21  ;;  %v5174_v39 = vcombine.high %v5172_v28, %v5172_v28  ;;  %v9062_v8 = vsel %vm280_vm5, %v8190_v56, -inf }
 0x243   :  { %v8231_v36 = vrot.slane %v8223_v7, %v10573_v16  ;;  %v5462_v17 = vcombine.low %v5165_v30, %v5173_v11  ;;  %v5175_v22 = vcombine.high %v5027_v4, %v5027_v4  ;;  %v5182_v51 = vrot.slane %v5027_v4, %v12055_v21  ;;  %v12661_v4 = vpop.f32.mrb[48].mxu0 }
 0x244   :  { %v8238_v41 = vrot.slane %v8224_v55, %v10573_v16  ;;  %v5740_v60 = vsel %vm5717_vm11, %v5484_v37, -inf  ;;  %v7277_v6 = vmax.f32 %v7214_v43, 0.0  ;;  %v7217_v56 = vadd.f32 %v12554_v25, %v12352_v32  ;;  %v12663_v55 = vpop.f32.mrb[36].mxu1 }
 0x245   :  { %v5476_v12 = vrot.slane %v5462_v17, %v12055_v21  ;;  %v12654_v57 = vrot.slane %v5175_v22, %v12055_v21  ;;  %v5190_v13 = vcombine.high %v5182_v51, %v5182_v51  ;;  %v5485_v44 = vcombine.low %v5174_v39, %v5182_v51  ;;  %v10032_v17 = vpop.f32.mrb[49].mxu0  ;;  %v12673_v1 = vpop.f32.mrb[37].mxu1 }
 0x246   :  { %v8239_v10 = vcombine.low %v8231_v36, %v8238_v41  ;;  %v7407_v34 = vcombine.high %v7277_v6, %v7277_v6  ;;  %v7414_v30 = vrot.slane %v7277_v6, %v10573_v16  ;;  %v7278_v41 = vmax.f32 %v7217_v56, 0.0 }
 0x247   :  { %v5477_v28 = vcombine.low %v5469_v58, %v5476_v12  ;;  %v5486_v7 = vcombine.low %v5190_v13, %v12654_v57  ;;  %v5493_v11 = vrot.slane %v5485_v44, %v12055_v21 }
 0x248   :  { %v7421_v37 = vrot.slane %v7407_v34, %v10573_v16  ;;  %v7422_v39 = vcombine.high %v7414_v30, %v7414_v30  ;;  %v7430_v43 = vrot.slane %v7414_v30, %v10573_v16  ;;  %v9063_v36 = vsel %vm280_vm5, %v8239_v10, -inf }
 0x249   :  { %v5738_v58 = vsel %vm280_vm5, %v5477_v28, -inf  ;;  %v5500_v22 = vrot.slane %v5486_v7, %v12055_v21  ;;  %v9064_v51 = vmax.f32 %v9062_v8, %v9063_v36  ;;  %v7456_v30 = vcombine.high %v7278_v41, %v7278_v41 }
 0x24a   :  { %v5739_v6 = vmax.f32 %v5737_v35, %v5738_v58  ;;  %v7423_v32 = vcombine.high %v7421_v37, %v7421_v37  ;;  %v7437_v12 = vrot.slane %v7421_v37, %v10573_v16  ;;  %v7444_v13 = vrot.slane %v7422_v39, %v10573_v16 }
 0x24b   :  { %v5501_v44 = vcombine.low %v5493_v11, %v5500_v22  ;;  %v7452_v34 = vcombine.high %v7430_v43, %v7430_v43  ;;  %v8246_v50 = vrot.slane %v7430_v43, %v10573_v16  ;;  %v12677_v8 = vmax.f32 %v12632_v53, %v5735_v18 }
 0x24c   :  { %v5741_v10 = vmax.f32 %v5739_v6, %v5740_v60  ;;  %v7451_v28 = vrot.slane %v7423_v32, %v10573_v16  ;;  %v7453_v17 = vcombine.high %v7437_v12, %v7437_v12  ;;  %v7454_v7 = vcombine.high %v7444_v13, %v7444_v13  ;;  %v12684_v32 = vpop.f32.mrb[50].mxu0 }
 0x24d   :  { %13440 = vst [vmem:[#allocation18_spill] sm:$0xff] %v12677_v8  ;;  %v8253_v35 = vrot.slane %v8246_v50, %v10573_v16  ;;  %v8254_v56 = vcombine.low %v7444_v13, %v7452_v34  ;;  %v7463_v37 = vrot.slane %v7278_v41, %v10573_v16  ;;  %v7470_v22 = vrot.slane %v7456_v30, %v10573_v16  ;;  %v10033_v41 = vpop.f32.mrb[51].mxu0 }
 0x24e   :  { %v5742_v11 = vrot.slane %v5741_v10, 4  ;;  %v8255_v39 = vcombine.low %v7454_v7, %v7437_v12  ;;  %v8256_v36 = vcombine.low %v7451_v28, %v7453_v17  ;;  %v7455_v43 = vcombine.high %v7451_v28, %v7451_v28  ;;  %v12693_v7 = vpop.f32.mrb[38].mxu1 }
 0x24f   :  { %v8264_v58 = vrot.slane %v8254_v56, %v10573_v16  ;;  %v9066_v60 = vsel %vm9065_vm12, %v8253_v35, -inf  ;;  %v7471_v6 = vcombine.high %v7463_v37, %v7463_v37  ;;  %v7479_v13 = vrot.slane %v7463_v37, %v10573_v16  ;;  %v12697_v15 = vpop.f32.mrb[39].mxu1 }
 0x250   :  { %v5743_v53 = vmax.f32 %v5741_v10, %v5742_v11  ;;  %v8271_v18 = vrot.slane %v8255_v39, %v10573_v16  ;;  %v9067_v50 = vmax.f32 %v9064_v51, %v9066_v60  ;;  %v12689_v12 = vsel %vm280_vm5, %v5501_v44, -inf }
 0x251   :  { %v7472_v34 = vcombine.high %v7470_v22, %v7470_v22  ;;  %v7486_v28 = vrot.slane %v7470_v22, %v10573_v16  ;;  %v7493_v17 = vrot.slane %v7471_v6, %v10573_v16  ;;  %v7501_v10 = vcombine.high %v7479_v13, %v7479_v13 }
 0x252   :  { %v5744_v30 = vrot.slane %v5743_v53, 2  ;;  %v8286_v35 = vcombine.low %v8264_v58, %v8271_v18  ;;  %v9068_v56 = vrot.slane %v9067_v50, 4  ;;  %v8257_v37 = vcombine.low %v7455_v43, %v7479_v13  ;;  %v12704_v58 = vld [vmem:[%s13323_s4] ss:$0 sm:$0xff] }
 0x253   :  { %v7500_v11 = vrot.slane %v7472_v34, %v10573_v16  ;;  %v7502_v51 = vcombine.high %v7486_v28, %v7486_v28  ;;  %v7503_v39 = vcombine.high %v7493_v17, %v7493_v17  ;;  %v8278_v44 = vrot.slane %v8256_v36, %v10573_v16 }
 0x254   :  { %v5745_v60 = vmax.f32 %v5743_v53, %v5744_v30  ;;  %v9069_v41 = vmax.f32 %v9067_v50, %v9068_v56  ;;  %v8303_v20 = vcombine.low %v7493_v17, %v7501_v10  ;;  %v8294_v22 = vrot.slane %v8286_v35, %v10573_v16 }
 0x255   :  { %v8285_v6 = vrot.slane %v8257_v37, %v10573_v16  ;;  %v8304_v24 = vcombine.low %v7503_v39, %v7486_v28  ;;  %v4982_v43 = vadd.f32 %v12704_v58, %v12390_v31  ;;  %v8305_v50 = vcombine.low %v7500_v11, %v7502_v51 }
 0x256   :  { %v5746_v53 = vrot.slane %v5745_v60, 1  ;;  %v9070_v18 = vrot.slane %v9069_v41, 2  ;;  %v8313_v36 = vrot.slane %v8303_v20, %v10573_v16  ;;  %v7222_v28 = vadd.f32 %v12554_v25, %v12413_v49 }
 0x257   :  { %v8287_v13 = vcombine.low %v8278_v44, %v8285_v6  ;;  %v8320_v34 = vrot.slane %v8304_v24, %v10573_v16  ;;  %v5028_v17 = vmax.f32 %v4982_v43, 0.0  ;;  %v5191_v56 = vcombine.high %v12654_v57, %v12654_v57 }
 0x258   :  { %v12712_v30 = vmax.f32 %v5745_v60, %v5746_v53  ;;  %v9071_v35 = vmax.f32 %v9069_v41, %v9070_v18  ;;  %v7504_v10 = vcombine.high %v7500_v11, %v7500_v11  ;;  %v7279_v44 = vmax.f32 %v7222_v28, 0.0 }
 0x259   :  { %v8301_v31 = vrot.slane %v8287_v13, %v10573_v16  ;;  %v8335_v39 = vcombine.low %v8313_v36, %v8320_v34  ;;  %v5192_v51 = vcombine.high %v5028_v17, %v5028_v17  ;;  %v5199_v20 = vrot.slane %v5028_v17, %v12055_v21 }
 0x25a   :  { %13441 = vst [vmem:[#allocation19_spill] sm:$0xff] %v12712_v30  ;;  %v9072_v37 = vrot.slane %v9071_v35, 1  ;;  %v8327_v24 = vrot.slane %v8305_v50, %v10573_v16  ;;  %v4985_v49 = vadd.f32 %v12704_v58, %v12396_v29  ;;  %v7225_v57 = vadd.f32 %v12554_v25, %v12417_v59 }
 0x25b   :  { %v8302_v60 = vcombine.low %v8294_v22, %v8301_v31  ;;  %v5206_v41 = vrot.slane %v5192_v51, %v12055_v21  ;;  %v5207_v6 = vcombine.high %v5199_v20, %v5199_v20  ;;  %v8343_v11 = vrot.slane %v8335_v39, %v10573_v16 }
 0x25c   :  { %v5502_v43 = vcombine.low %v5191_v56, %v5199_v20  ;;  %v7505_v53 = vcombine.high %v7279_v44, %v7279_v44  ;;  %v7512_v18 = vrot.slane %v7279_v44, %v10573_v16  ;;  %v12726_v36 = vmax.f32 %v9071_v35, %v9072_v37 }
 0x25d   :  { %v5208_v13 = vcombine.high %v5206_v41, %v5206_v41  ;;  %v5503_v50 = vcombine.low %v5207_v6, %v5206_v41  ;;  %v5029_v34 = vmax.f32 %v4985_v49, 0.0  ;;  %v9074_v28 = vsel %vm280_vm5, %v8302_v60, -inf }
 0x25e   :  { %13442 = vst [vmem:[#allocation2_spill] sm:$0xff] %v12726_v36  ;;  %v7519_v29 = vrot.slane %v7505_v53, %v10573_v16  ;;  %v7520_v22 = vcombine.high %v7512_v18, %v7512_v18  ;;  %v7528_v17 = vrot.slane %v7512_v18, %v10573_v16  ;;  %v5510_v59 = vrot.slane %v5502_v43, %v12055_v21 }
 0x25f   :  { %v5517_v31 = vrot.slane %v5503_v50, %v12055_v21  ;;  %v5209_v56 = vcombine.high %v5029_v34, %v5029_v34  ;;  %v5216_v39 = vrot.slane %v5029_v34, %v12055_v21  ;;  %v5525_v35 = vrot.slane %v5208_v13, %v12055_v21 }
 0x260   :  { %v7521_v51 = vcombine.high %v7519_v29, %v7519_v29  ;;  %v7542_v20 = vrot.slane %v7520_v22, %v10573_v16  ;;  %v8306_v37 = vcombine.low %v7504_v10, %v7528_v17  ;;  %v7535_v49 = vrot.slane %v7519_v29, %v10573_v16 }
 0x261   :  { %v5518_v44 = vcombine.low %v5510_v59, %v5517_v31  ;;  %v5223_v41 = vrot.slane %v5209_v56, %v12055_v21  ;;  %v5224_v6 = vcombine.high %v5216_v39, %v5216_v39  ;;  %v7280_v47 = vmax.f32 %v7225_v57, 0.0 }
 0x262   :  { %v7549_v60 = vrot.slane %v7521_v51, %v10573_v16  ;;  %v8334_v43 = vrot.slane %v8306_v37, %v10573_v16  ;;  %v8358_v53 = vrot.slane %v7542_v20, %v10573_v16  ;;  %v9837_v18 = vcombine.high %v7528_v17, %v7542_v20 }
 0x263   :  { %v5749_v50 = vsel %vm280_vm5, %v5518_v44, -inf  ;;  %v5225_v13 = vcombine.high %v5223_v41, %v5223_v41  ;;  %v5526_v34 = vcombine.low %v5216_v39, %v5224_v6  ;;  %v5751_v31 = vsel %vm5717_vm11, %v5525_v35, -inf }
 0x264   :  { %v5750_v10 = vmax.f32 %v12689_v12, %v5749_v50  ;;  %v8336_v22 = vcombine.low %v8327_v24, %v8334_v43  ;;  %v8365_v29 = vrot.slane %v8358_v53, %v10573_v16  ;;  %v8367_v59 = vcombine.low %v7535_v49, %v7549_v60  ;;  %v12758_v50 = vpop.f32.mrb[52].mxu0 }
 0x265   :  { %v9838_v56 = vcombine.high %v7535_v49, %v7549_v60  ;;  %v8376_v51 = vrot.slane %v9837_v18, %v10573_v16  ;;  %v5527_v37 = vcombine.low %v5223_v41, %v5225_v13  ;;  %v5534_v39 = vrot.slane %v5526_v34, %v12055_v21 }
 0x266   :  { %v5752_v5 = vmax.f32 %v5750_v10, %v5751_v31  ;;  %v8350_v17 = vrot.slane %v8336_v22, %v10573_v16  ;;  %v8383_v20 = vrot.slane %v8367_v59, %v10573_v16  ;;  %v9077_v57 = vsel %vm9065_vm12, %v8365_v29, -inf }
 0x267   :  { %v5541_v12 = vrot.slane %v5527_v37, %v12055_v21  ;;  %v7554_v24 = vcombine.high %v7280_v47, %v7280_v47  ;;  %v7561_v44 = vrot.slane %v7280_v47, %v10573_v16  ;;  %v8390_v49 = vrot.slane %v9838_v56, %v10573_v16 }
 0x268   :  { %v5753_v6 = vrot.slane %v5752_v5, 4  ;;  %v8351_v35 = vcombine.low %v8343_v11, %v8350_v17  ;;  %v4990_v41 = vadd.f32 %v12704_v58, %v12419_v33  ;;  %v8398_v60 = vcombine.low %v8376_v51, %v8383_v20  ;;  %v10036_v11 = vpop.f32.mrb[53].mxu0 }
 0x269   :  { %v12755_v43 = vcombine.low %v5534_v39, %v5541_v12  ;;  %v7568_v53 = vrot.slane %v7554_v24, %v10573_v16  ;;  %v7569_v18 = vcombine.high %v7561_v44, %v7561_v44  ;;  %v7577_v47 = vrot.slane %v7561_v44, %v10573_v16  ;;  %v7272_v31 = vpop.f32.mrb[54].mxu0 }
 0x26a   :  { %v5754_v13 = vmax.f32 %v5752_v5, %v5753_v6  ;;  %v9075_v34 = vsel %vm280_vm5, %v8351_v35, -inf  ;;  %v5030_v10 = vmax.f32 %v4990_v41, 0.0  ;;  %v7230_v5 = vadd.f32 %v12554_v25, %v12461_v46  ;;  %v10037_v17 = vpop.f32.mrb[55].mxu0 }
 0x26b   :  { %v9076_v22 = vmax.f32 %v9074_v28, %v9075_v34  ;;  %v7570_v29 = vcombine.high %v7568_v53, %v7568_v53  ;;  %v7584_v59 = vrot.slane %v7568_v53, %v10573_v16  ;;  %v7591_v33 = vrot.slane %v7569_v18, %v10573_v16  ;;  %v12768_v28 = vpop.f32.mrb[40].mxu1 }
 0x26c   :  { %v5755_v56 = vrot.slane %v5754_v13, 2  ;;  %v5226_v51 = vcombine.high %v5030_v10, %v5030_v10  ;;  %v5233_v37 = vrot.slane %v5030_v10, %v12055_v21  ;;  %v12771_v44 = vrot.slane %v8398_v60, %v10573_v16  ;;  %v12774_v53 = vpop.f32.mrb[41].mxu1 }
 0x26d   :  { %v9078_v20 = vmax.f32 %v9076_v22, %v9077_v57  ;;  %v7598_v39 = vrot.slane %v7570_v29, %v10573_v16  ;;  %v8369_v12 = vcombine.low %v7577_v47, %v7591_v33  ;;  %v9839_v24 = vcombine.high %v7577_v47, %v7591_v33  ;;  %v12779_v10 = vpop.f32.mrb[42].mxu1 }
 0x26e   :  { %v5240_v6 = vrot.slane %v5226_v51, %v12055_v21  ;;  %v5241_v35 = vcombine.high %v5233_v37, %v5233_v37  ;;  %v7281_v41 = vmax.f32 %v7230_v5, 0.0  ;;  %v12776_v18 = vmax.f32 %v5754_v13, %v5755_v56 }
 0x26f   :  { %v9079_v46 = vrot.slane %v9078_v20, 4  ;;  %v8397_v57 = vrot.slane %v8369_v12, %v10573_v16  ;;  %v8416_v34 = vcombine.low %v7584_v59, %v7598_v39  ;;  %v9840_v47 = vcombine.high %v7584_v59, %v7598_v39 }
 0x270   :  { %13443 = vst [vmem:[#allocation20_spill] sm:$0xff] %v12776_v18  ;;  %v5242_v11 = vcombine.high %v5240_v6, %v5240_v6  ;;  %v5543_v22 = vcombine.low %v5233_v37, %v5241_v35  ;;  %v7603_v29 = vcombine.high %v7281_v41, %v7281_v41  ;;  %v8425_v31 = vrot.slane %v9839_v24, %v10573_v16 }
 0x271   :  { %v9080_v60 = vmax.f32 %v9078_v20, %v9079_v46  ;;  %v8399_v33 = vcombine.low %v8390_v49, %v8397_v57  ;;  %v8432_v51 = vrot.slane %v8416_v34, %v10573_v16  ;;  %v7610_v56 = vrot.slane %v7281_v41, %v10573_v16 }
 0x272   :  { %v5544_v5 = vcombine.low %v5240_v6, %v5242_v11  ;;  %v5551_v13 = vrot.slane %v5543_v22, %v12055_v21  ;;  %v7617_v17 = vrot.slane %v7603_v29, %v10573_v16  ;;  %v4993_v37 = vadd.f32 %v12704_v58, %v12425_v26 }
 0x273   :  { %v9081_v12 = vrot.slane %v9080_v60, 2  ;;  %v8413_v63 = vrot.slane %v8399_v33, %v10573_v16  ;;  %v8447_v59 = vcombine.low %v8425_v31, %v8432_v51  ;;  %v7618_v20 = vcombine.high %v7610_v56, %v7610_v56 }
 0x274   :  { %v5558_v49 = vrot.slane %v5544_v5, %v12055_v21  ;;  %v7619_v39 = vcombine.high %v7617_v17, %v7617_v17  ;;  %v7626_v24 = vrot.slane %v7610_v56, %v10573_v16  ;;  %v8439_v41 = vrot.slane %v9840_v47, %v10573_v16 }
 0x275   :  { %v12791_v6 = vmax.f32 %v9080_v60, %v9081_v12  ;;  %v8414_v35 = vcombine.low %v12771_v44, %v8413_v63  ;;  %v7633_v46 = vrot.slane %v7617_v17, %v10573_v16  ;;  %v7640_v34 = vrot.slane %v7618_v20, %v10573_v16  ;;  %v12808_v17 = vpop.f32.mrb[43].mxu1 }
 0x276   :  { %v5559_v57 = vcombine.low %v5551_v13, %v5558_v49  ;;  %v12798_v11 = vrot.slane %v7619_v39, %v10573_v16  ;;  %v7648_v26 = vcombine.high %v7626_v24, %v7626_v24  ;;  %v8455_v29 = vrot.slane %v8447_v59, %v10573_v16  ;;  %v12812_v20 = vpop.f32.mrb[44].mxu1 }
 0x277   :  { %13444 = vst [vmem:[#allocation21_spill] sm:$0xff] %v12791_v6  ;;  %v7649_v33 = vcombine.high %v7633_v46, %v7633_v46  ;;  %v5031_v60 = vmax.f32 %v4993_v37, 0.0  ;;  %v7650_v31 = vcombine.high %v7640_v34, %v7640_v34  ;;  %v8418_v51 = vcombine.low %v7626_v24, %v7640_v34 }
 0x278   :  { %v8470_v63 = vrot.slane %v7648_v26, %v10573_v16  ;;  %v5759_v44 = vsel %vm280_vm5, %v12755_v43, -inf  ;;  %v5760_v56 = vsel %vm280_vm5, %v5559_v57, -inf  ;;  %v12819_v26 = vpop.f32.mrb[45].mxu1 }
 0x279   :  { %v8479_v47 = vcombine.low %v12798_v11, %v7649_v33  ;;  %v5243_v5 = vcombine.high %v5031_v60, %v5031_v60  ;;  %v5250_v13 = vrot.slane %v5031_v60, %v12055_v21  ;;  %v8446_v12 = vrot.slane %v8418_v51, %v10573_v16 }
 0x27a   :  { %v8477_v59 = vrot.slane %v8470_v63, %v10573_v16  ;;  %v8478_v37 = vcombine.low %v7650_v31, %v7633_v46  ;;  %v5761_v49 = vmax.f32 %v5759_v44, %v5760_v56  ;;  %v9085_v60 = vsel %vm280_vm5, %v8414_v35, -inf  ;;  %v12825_v31 = vpop.f32.mrb[46].mxu1 }
 0x27b   :  { %v8495_v39 = vrot.slane %v8479_v47, %v10573_v16  ;;  %v12816_v43 = vrot.slane %v5243_v5, %v12055_v21  ;;  %v5258_v24 = vcombine.high %v5250_v13, %v5250_v13  ;;  %v5566_v34 = vrot.slane %v5250_v13, %v12055_v21 }
 0x27c   :  { %v8448_v57 = vcombine.low %v8439_v41, %v8446_v12  ;;  %v8488_v33 = vrot.slane %v8478_v37, %v10573_v16  ;;  %v7233_v46 = vadd.f32 %v12554_v25, %v12473_v61  ;;  %v9088_v51 = vsel %vm9065_vm12, %v8477_v59, -inf  ;;  %v12834_v41 = vpop.f32.mrb[47].mxu1 }
 0x27d   :  { %v12829_v63 = vcombine.low %v5258_v24, %v12816_v43  ;;  %v5762_v44 = vsel %vm5717_vm11, %v5566_v34, -inf  ;;  %v7238_v47 = vadd.f32 %v12554_v25, %v12498_v2  ;;  %v12839_v56 = vpop.f32.mrb[48].mxu1  ;;  %v7651_v59 = vcombine.high %v12798_v11, %v12798_v11 }
 0x27e   :  { %v8462_v5 = vrot.slane %v8448_v57, %v10573_v16  ;;  %v12837_v35 = vcombine.low %v8488_v33, %v8495_v39  ;;  %v5763_v13 = vmax.f32 %v5761_v49, %v5762_v44  ;;  %v7282_v61 = vmax.f32 %v7233_v46, 0.0  ;;  %v12847_v24 = vpop.f32.mrb[49].mxu1 }
 0x27f   :  { %v7283_v37 = vmax.f32 %v7238_v47, 0.0  ;;  %v7241_v2 = vadd.f32 %v12554_v25, %v12504_v27  ;;  %v4998_v49 = vadd.f32 %v12704_v58, %v12509_v40  ;;  %v12851_v33 = vpop.f32.mrb[50].mxu1 }
 0x280   :  { %v8463_v34 = vcombine.low %v8455_v29, %v8462_v5  ;;  %v5764_v57 = vrot.slane %v5763_v13, 4  ;;  %v7652_v39 = vcombine.high %v7282_v61, %v7282_v61  ;;  %v8518_v46 = vrot.slane %v12837_v35, %v10573_v16 }
 0x281   :  { %v7659_v44 = vrot.slane %v7282_v61, %v10573_v16  ;;  %v7701_v11 = vcombine.high %v7283_v37, %v7283_v37  ;;  %v7708_v47 = vrot.slane %v7283_v37, %v10573_v16  ;;  %v7284_v5 = vmax.f32 %v7241_v2, 0.0 }
 0x282   :  { %v9086_v27 = vsel %vm280_vm5, %v8463_v34, -inf  ;;  %v5765_v22 = vmax.f32 %v5763_v13, %v5764_v57  ;;  %v7666_v29 = vrot.slane %v7652_v39, %v10573_v16  ;;  %v12863_v13 = vpop.f32.mrb[51].mxu1 }
 0x283   :  { %v9087_v12 = vmax.f32 %v9085_v60, %v9086_v27  ;;  %v7667_v23 = vcombine.high %v7659_v44, %v7659_v44  ;;  %v7675_v40 = vrot.slane %v7659_v44, %v10573_v16  ;;  %v7715_v52 = vrot.slane %v7701_v11, %v10573_v16 }
 0x284   :  { %v5766_v36 = vrot.slane %v5765_v22, 2  ;;  %v7668_v6 = vcombine.high %v7666_v29, %v7666_v29  ;;  %v7682_v35 = vrot.slane %v7666_v29, %v10573_v16  ;;  %v7716_v61 = vcombine.high %v7708_v47, %v7708_v47 }
 0x285   :  { %v9089_v30 = vmax.f32 %v9087_v12, %v9088_v51  ;;  %v7689_v37 = vrot.slane %v7667_v23, %v10573_v16  ;;  %v7697_v8 = vcombine.high %v7675_v40, %v7675_v40  ;;  %v8480_v34 = vcombine.low %v7651_v59, %v7675_v40 }
 0x286   :  { %v12865_v57 = vmax.f32 %v5765_v22, %v5766_v36  ;;  %v7696_v60 = vrot.slane %v7668_v6, %v10573_v16  ;;  %v7698_v2 = vcombine.high %v7682_v35, %v7682_v35  ;;  %v7717_v39 = vcombine.high %v7715_v52, %v7715_v52 }
 0x287   :  { %v9090_v44 = vrot.slane %v9089_v30, 4  ;;  %v7699_v11 = vcombine.high %v7689_v37, %v7689_v37  ;;  %v8481_v27 = vcombine.low %v7689_v37, %v7697_v8  ;;  %v8502_v14 = vrot.slane %v8480_v34, %v10573_v16 }
 0x288   :  { %v8528_v29 = vcombine.low %v7696_v60, %v7698_v2  ;;  %v7700_v18 = vcombine.high %v7696_v60, %v7696_v60  ;;  %v7724_v51 = vrot.slane %v7708_v47, %v10573_v16  ;;  %v5032_v23 = vmax.f32 %v4998_v49, 0.0 }
 0x289   :  { %v12870_v12 = vmax.f32 %v9089_v30, %v9090_v44  ;;  %v8509_v59 = vrot.slane %v8481_v27, %v10573_v16  ;;  %v8527_v36 = vcombine.low %v7699_v11, %v7682_v35  ;;  %v7731_v22 = vrot.slane %v7715_v52, %v10573_v16 }
 0x28a   :  { %v8544_v6 = vrot.slane %v8528_v29, %v10573_v16  ;;  %v7738_v40 = vrot.slane %v7716_v61, %v10573_v16  ;;  %v7745_v8 = vrot.slane %v7717_v39, %v10573_v16  ;;  %v7746_v37 = vcombine.high %v7724_v51, %v7724_v51 }
 0x28b   :  { %v5768_v34 = vrot.slane %v12865_v57, 1  ;;  %v8511_v60 = vcombine.low %v8502_v14, %v8509_v59  ;;  %v8537_v47 = vrot.slane %v8527_v36, %v10573_v16  ;;  %v8529_v49 = vcombine.low %v7700_v18, %v7724_v51 }
 0x28c   :  { %v7748_v30 = vcombine.high %v7738_v40, %v7738_v40  ;;  %v8530_v2 = vcombine.low %v7738_v40, %v7746_v37  ;;  %v8590_v44 = vcombine.low %v7731_v22, %v7745_v8  ;;  %v9841_v27 = vcombine.high %v7731_v22, %v7745_v8 }
 0x28d   :  { %v9092_v35 = vrot.slane %v12870_v12, 2  ;;  %v8525_v52 = vrot.slane %v8511_v60, %v10573_v16  ;;  %v8559_v11 = vcombine.low %v8537_v47, %v8544_v6  ;;  %v8551_v61 = vrot.slane %v8529_v49, %v10573_v16 }
 0x28e   :  { %v8558_v39 = vrot.slane %v8530_v2, %v10573_v16  ;;  %v8582_v29 = vrot.slane %v7748_v30, %v10573_v16  ;;  %v8600_v14 = vrot.slane %v8590_v44, %v10573_v16  ;;  %v8607_v59 = vrot.slane %v9841_v27, %v10573_v16 }
 0x28f   :  { %v8526_v18 = vcombine.low %v8518_v46, %v8525_v52  ;;  %v8567_v51 = vrot.slane %v8559_v11, %v10573_v16  ;;  %v7750_v36 = vcombine.high %v7284_v5, %v7284_v5  ;;  %v7757_v22 = vrot.slane %v7284_v5, %v10573_v16 }
 0x290   :  { %v8560_v40 = vcombine.low %v8551_v61, %v8558_v39  ;;  %v8589_v8 = vrot.slane %v8582_v29, %v10573_v16  ;;  %v8622_v6 = vcombine.low %v8600_v14, %v8607_v59  ;;  %v5259_v37 = vcombine.high %v12816_v43, %v12816_v43 }
 0x291   :  { %v9096_v60 = vsel %vm280_vm5, %v8526_v18, -inf  ;;  %v7764_v47 = vrot.slane %v7750_v36, %v10573_v16  ;;  %v7765_v49 = vcombine.high %v7757_v22, %v7757_v22  ;;  %v7773_v30 = vrot.slane %v7757_v22, %v10573_v16 }
 0x292   :  { %v8574_v46 = vrot.slane %v8560_v40, %v10573_v16  ;;  %v12896_v2 = vrot.slane %v8622_v6, %v10573_v16  ;;  %v9099_v5 = vsel %vm9065_vm12, %v8589_v8, -inf  ;;  %v5260_v44 = vcombine.high %v5032_v23, %v5032_v23 }
 0x293   :  { %v7766_v27 = vcombine.high %v7764_v47, %v7764_v47  ;;  %v7780_v52 = vrot.slane %v7764_v47, %v10573_v16  ;;  %v7787_v43 = vrot.slane %v7765_v49, %v10573_v16  ;;  %v5267_v11 = vrot.slane %v5032_v23, %v12055_v21 }
 0x294   :  { %v8575_v61 = vcombine.low %v8567_v51, %v8574_v46  ;;  %v5274_v39 = vrot.slane %v5260_v44, %v12055_v21  ;;  %v5001_v29 = vadd.f32 %v12704_v58, %v12519_v9  ;;  %v7246_v14 = vadd.f32 %v12554_v25, %v12547_v42 }
 0x295   :  { %v7794_v59 = vrot.slane %v7766_v27, %v10573_v16  ;;  %v8592_v18 = vcombine.low %v7773_v30, %v7787_v43  ;;  %v9842_v36 = vcombine.high %v7773_v30, %v7787_v43  ;;  %v5275_v22 = vcombine.high %v5267_v11, %v5267_v11  ;;  %v10114_v30 = vld [vmem:[%s13325_s9] sm:$0xff]  }
 0x296   :  { %v9097_v40 = vsel %vm280_vm5, %v8575_v61, -inf  ;;  %v5568_v8 = vcombine.low %v5259_v37, %v5267_v11  ;;  %v5033_v6 = vmax.f32 %v5001_v29, 0.0  ;;  %v5276_v47 = vcombine.high %v5274_v39, %v5274_v39  ;;  %10065 = vmatpush3.bf16.msra.mxu1 %v10114_v30 }
 0x297   :  { %v9098_v23 = vmax.f32 %v9096_v60, %v9097_v40  ;;  %v8614_v51 = vrot.slane %v8592_v18, %v10573_v16  ;;  %v8621_v49 = vrot.slane %v9842_v36, %v10573_v16  ;;  %v8639_v46 = vcombine.low %v7780_v52, %v7794_v59  ;;  %10066 = vmatprep.subr.bf16.mxu1 %v13388_v0 }
 0x298   :  { %v9843_v9 = vcombine.high %v7780_v52, %v7794_v59  ;;  %v5582_v44 = vrot.slane %v5568_v8, %v12055_v21  ;;  %v5584_v42 = vcombine.low %v5275_v22, %v5274_v39  ;;  %v5277_v25 = vcombine.high %v5033_v6, %v5033_v6 }
 0x299   :  { %v9100_v27 = vmax.f32 %v9098_v23, %v9099_v5  ;;  %v8623_v43 = vcombine.low %v8614_v51, %v8621_v49  ;;  %v8649_v37 = vrot.slane %v8639_v46, %v10573_v16  ;;  %v5284_v60 = vrot.slane %v5033_v6, %v12055_v21 }
 0x29a   :  { %v12918_v11 = vmax.f32 %v12870_v12, %v9092_v35  ;;  %v8656_v61 = vrot.slane %v9843_v9, %v10573_v16  ;;  %v13445_v52 = vrot.slane %v12829_v63, %v12055_v21  ;;  %v5291_v29 = vrot.slane %v5277_v25, %v12055_v21 }
 0x29b   :  { %v9101_v59 = vrot.slane %v9100_v27, 4  ;;  %v8637_v5 = vrot.slane %v8623_v43, %v10573_v16  ;;  %v5292_v18 = vcombine.high %v5284_v60, %v5284_v60  ;;  %v5585_v36 = vcombine.low %v5276_v47, %v5284_v60  ;;  %v12950_v60 = vld [vmem:[%s13324_s6] ss:$0 sm:$0xff] }
 0x29c   :  { %v5583_v39 = vcombine.low %v13445_v52, %v5582_v44  ;;  %v8671_v22 = vcombine.low %v8649_v37, %v8656_v61  ;;  %v5592_v12 = vrot.slane %v5584_v42, %v12055_v21  ;;  %v5293_v35 = vcombine.high %v5291_v29, %v5291_v29 }
 0x29d   :  { %v7285_v40 = vmax.f32 %v7246_v14, 0.0  ;;  %v8638_v8 = vcombine.low %v12896_v2, %v8637_v5  ;;  %v5599_v6 = vrot.slane %v5585_v36, %v12055_v21  ;;  %v5607_v23 = vrot.slane %v5292_v18, %v12055_v21 }
 0x29e   :  { %v5770_v63 = vsel %vm280_vm5, %v5583_v39, -inf  ;;  %v12932_v51 = vmax.f32 %v9100_v27, %v9101_v59  ;;  %v12935_v49 = vrot.slane %v8671_v22, %v10573_v16  ;;  %v5608_v44 = vcombine.low %v5291_v29, %v5293_v35 }
 0x29f   :  { %v7799_v47 = vcombine.high %v7285_v40, %v7285_v40  ;;  %v7806_v46 = vrot.slane %v7285_v40, %v10573_v16  ;;  %v5600_v9 = vcombine.low %v5592_v12, %v5599_v6  ;;  %v5773_v14 = vsel %vm5717_vm11, %v5607_v23, -inf }
 0x2a0   :  { %v5006_v2 = vadd.f32 %v12704_v58, %v12566_v38  ;;  %v12944_v27 = vsel %vm280_vm5, %v8638_v8, -inf  ;;  %v7249_v61 = vadd.f32 %v12950_v60, %v12559_v62  ;;  %v5009_v38 = vadd.f32 %v12704_v58, %v12574_v45 }
 0x2a1   :  { %v7813_v42 = vrot.slane %v7799_v47, %v10573_v16  ;;  %v7814_v25 = vcombine.high %v7806_v46, %v7806_v46  ;;  %v7822_v30 = vrot.slane %v7806_v46, %v10573_v16  ;;  %v5771_v43 = vsel %vm280_vm5, %v5600_v9, -inf }
 0x2a2   :  { %v5034_v37 = vmax.f32 %v5006_v2, 0.0  ;;  %v5772_v52 = vmax.f32 %v5770_v63, %v5771_v43  ;;  %v5616_v5 = vrot.slane %v5608_v44, %v12055_v21  ;;  %v7286_v22 = vmax.f32 %v7249_v61, 0.0 }
 0x2a3   :  { %v7815_v39 = vcombine.high %v7813_v42, %v7813_v42  ;;  %v7829_v29 = vrot.slane %v7813_v42, %v10573_v16  ;;  %v7836_v59 = vrot.slane %v7814_v25, %v10573_v16  ;;  %v5035_v9 = vmax.f32 %v5009_v38, 0.0 }
 0x2a4   :  { %v5294_v18 = vcombine.high %v5034_v37, %v5034_v37  ;;  %v5301_v36 = vrot.slane %v5034_v37, %v12055_v21  ;;  %v5774_v12 = vmax.f32 %v5772_v52, %v5773_v14  ;;  %v7855_v37 = vrot.slane %v7286_v22, %v10573_v16 }
 0x2a5   :  { %v7843_v35 = vrot.slane %v7815_v39, %v10573_v16  ;;  %v7845_v40 = vcombine.high %v7829_v29, %v7829_v29  ;;  %v8641_v62 = vcombine.low %v7822_v30, %v7836_v59  ;;  %v9844_v8 = vcombine.high %v7822_v30, %v7836_v59 }
 0x2a6   :  { %v8694_v45 = vrot.slane %v7829_v29, %v10573_v16  ;;  %v5308_v63 = vrot.slane %v5294_v18, %v12055_v21  ;;  %v5309_v6 = vcombine.high %v5301_v36, %v5301_v36  ;;  %v5775_v23 = vrot.slane %v5774_v12, 4 }
 0x2a7   :  { %v8663_v47 = vrot.slane %v8641_v62, %v10573_v16  ;;  %v8702_v46 = vcombine.low %v7843_v35, %v7845_v40  ;;  %v8670_v44 = vrot.slane %v9844_v8, %v10573_v16  ;;  %v7847_v43 = vcombine.high %v7843_v35, %v7843_v35 }
 0x2a8   :  { %v8701_v2 = vrot.slane %v8694_v45, %v10573_v16  ;;  %v5310_v14 = vcombine.high %v5308_v63, %v5308_v63  ;;  %v5609_v42 = vcombine.low %v5301_v36, %v5309_v6  ;;  %v12966_v25 = vmax.f32 %v5774_v12, %v5775_v23 }
 0x2a9   :  { %v7848_v30 = vcombine.high %v7286_v22, %v7286_v22  ;;  %v8672_v61 = vcombine.low %v8663_v47, %v8670_v44  ;;  %v8712_v29 = vrot.slane %v8702_v46, %v10573_v16  ;;  %v7863_v18 = vcombine.high %v7855_v37, %v7855_v37 }
 0x2aa   :  { %v5623_v52 = vrot.slane %v5609_v42, %v12055_v21  ;;  %v5625_v39 = vcombine.low %v5308_v63, %v5310_v14  ;;  %v9110_v38 = vsel %vm9065_vm12, %v8701_v2, -inf  ;;  %v7871_v40 = vrot.slane %v7855_v37, %v10573_v16 }
 0x2ab   :  { %v7862_v59 = vrot.slane %v7848_v30, %v10573_v16  ;;  %v5777_v36 = vrot.slane %v12966_v25, 2  ;;  %v8686_v12 = vrot.slane %v8672_v61, %v10573_v16  ;;  %v5311_v62 = vcombine.high %v5035_v9, %v5035_v9 }
 0x2ac   :  { %v5624_v35 = vcombine.low %v5616_v5, %v5623_v52  ;;  %v7885_v45 = vrot.slane %v7863_v18, %v10573_v16  ;;  %v7893_v63 = vcombine.high %v7871_v40, %v7871_v40  ;;  %v5633_v23 = vrot.slane %v5625_v39, %v12055_v21 }
 0x2ad   :  { %v7864_v22 = vcombine.high %v7862_v59, %v7862_v59  ;;  %v7878_v8 = vrot.slane %v7862_v59, %v10573_v16  ;;  %v8687_v6 = vcombine.low %v12935_v49, %v8686_v12  ;;  %v8703_v47 = vcombine.low %v7847_v43, %v7871_v40 }
 0x2ae   :  { %v5318_v46 = vrot.slane %v5035_v9, %v12055_v21  ;;  %v7895_v14 = vcombine.high %v7885_v45, %v7885_v45  ;;  %v8704_v42 = vcombine.low %v7885_v45, %v7893_v63  ;;  %v5325_v37 = vrot.slane %v5311_v62, %v12055_v21 }
 0x2af   :  { %v7892_v44 = vrot.slane %v7864_v22, %v10573_v16  ;;  %v7894_v2 = vcombine.high %v7878_v8, %v7878_v8  ;;  %v9108_v5 = vsel %vm280_vm5, %v8687_v6, -inf  ;;  %v8719_v30 = vrot.slane %v8703_v47, %v10573_v16 }
 0x2b0   :  { %v5326_v61 = vcombine.high %v5318_v46, %v5318_v46  ;;  %v9109_v52 = vmax.f32 %v12944_v27, %v9108_v5  ;;  %v5781_v49 = vsel %vm280_vm5, %v5624_v35, -inf  ;;  %v8705_v39 = vcombine.low %v7895_v14, %v7878_v8 }
 0x2b1   :  { %v8726_v43 = vrot.slane %v8704_v42, %v10573_v16  ;;  %v8734_v9 = vcombine.low %v8712_v29, %v8719_v30  ;;  %v5648_v18 = vrot.slane %v5325_v37, %v12055_v21  ;;  %v5014_v40 = vadd.f32 %v12704_v58, %v12601_v3 }
 0x2b2   :  { %v5626_v59 = vcombine.low %v5318_v46, %v5326_v61  ;;  %v9111_v12 = vmax.f32 %v9109_v52, %v9110_v38  ;;  %v8733_v22 = vrot.slane %v8705_v39, %v10573_v16  ;;  %v8751_v45 = vcombine.low %v7892_v44, %v7894_v2 }
 0x2b3   :  { %v7254_v62 = vadd.f32 %v12950_v60, %v12596_v48  ;;  %v8742_v27 = vrot.slane %v8734_v9, %v10573_v16  ;;  %v5036_v8 = vmax.f32 %v5014_v40, 0.0  ;;  %v5327_v63 = vcombine.high %v5325_v37, %v5325_v37 }
 0x2b4   :  { %v5640_v35 = vrot.slane %v5626_v59, %v12055_v21  ;;  %v9112_v29 = vrot.slane %v9111_v12, 4  ;;  %v8735_v6 = vcombine.low %v8726_v43, %v8733_v22  ;;  %v5784_v47 = vsel %vm5717_vm11, %v5648_v18, -inf }
 0x2b5   :  { %v7287_v46 = vmax.f32 %v7254_v62, 0.0  ;;  %v5328_v3 = vcombine.high %v5036_v8, %v5036_v8  ;;  %v5335_v38 = vrot.slane %v5036_v8, %v12055_v21  ;;  %v7896_v42 = vcombine.high %v7892_v44, %v7892_v44 }
 0x2b6   :  { %v5641_v14 = vcombine.low %v5633_v23, %v5640_v35  ;;  %v8749_v2 = vrot.slane %v8735_v6, %v10573_v16  ;;  %v8761_v30 = vrot.slane %v8751_v45, %v10573_v16  ;;  %v13004_v18 = vmax.f32 %v9111_v12, %v9112_v29 }
 0x2b7   :  { %v7897_v5 = vcombine.high %v7287_v46, %v7287_v46  ;;  %v7904_v48 = vrot.slane %v7287_v46, %v10573_v16  ;;  %v5342_v37 = vrot.slane %v5328_v3, %v12055_v21  ;;  %v5343_v52 = vcombine.high %v5335_v38, %v5335_v38 }
 0x2b8   :  { %v5782_v61 = vsel %vm280_vm5, %v5641_v14, -inf  ;;  %v5649_v39 = vcombine.low %v5327_v63, %v5335_v38  ;;  %v8750_v43 = vcombine.low %v8742_v27, %v8749_v2  ;;  %v5017_v22 = vadd.f32 %v12704_v58, %v12608_v54 }
 0x2b9   :  { %v5783_v9 = vmax.f32 %v5781_v49, %v5782_v61  ;;  %v7911_v23 = vrot.slane %v7897_v5, %v10573_v16  ;;  %v7912_v59 = vcombine.high %v7904_v48, %v7904_v48  ;;  %v5650_v44 = vcombine.low %v5343_v52, %v5342_v37 }
 0x2ba   :  { %v7920_v40 = vrot.slane %v7904_v48, %v10573_v16  ;;  %v13010_v45 = vsel %vm280_vm5, %v8750_v43, -inf  ;;  %v5657_v35 = vrot.slane %v5649_v39, %v12055_v21  ;;  %v5037_v14 = vmax.f32 %v5017_v22, 0.0 }
 0x2bb   :  { %v5785_v62 = vmax.f32 %v5783_v9, %v5784_v47  ;;  %v7913_v8 = vcombine.high %v7911_v23, %v7911_v23  ;;  %v5664_v49 = vrot.slane %v5650_v44, %v12055_v21  ;;  %v7934_v27 = vrot.slane %v7912_v59, %v10573_v16 }
 0x2bc   :  { %v7942_v63 = vcombine.high %v7920_v40, %v7920_v40  ;;  %v8752_v12 = vcombine.low %v7896_v42, %v7920_v40  ;;  %v7927_v6 = vrot.slane %v7911_v23, %v10573_v16  ;;  %v5344_v5 = vcombine.high %v5342_v37, %v5342_v37 }
 0x2bd   :  { %v5786_v29 = vrot.slane %v5785_v62, 4  ;;  %v7941_v46 = vrot.slane %v7913_v8, %v10573_v16  ;;  %v5665_v54 = vcombine.low %v5657_v35, %v5664_v49  ;;  %v7944_v58 = vcombine.high %v7934_v27, %v7934_v27 }
 0x2be   :  { %v8753_v3 = vcombine.low %v7934_v27, %v7942_v63  ;;  %v8768_v47 = vrot.slane %v8752_v12, %v10573_v16  ;;  %v5345_v48 = vcombine.high %v5037_v14, %v5037_v14  ;;  %v5352_v23 = vrot.slane %v5037_v14, %v12055_v21 }
 0x2bf   :  { %v8806_v38 = vrot.slane %v7941_v46, %v10573_v16  ;;  %v9845_v2 = vcombine.high %v7927_v6, %v7941_v46  ;;  %v13019_v61 = vmax.f32 %v5785_v62, %v5786_v29  ;;  %v5792_v42 = vsel %vm280_vm5, %v5665_v54, -inf }
 0x2c0   :  { %v8754_v52 = vcombine.low %v7944_v58, %v7927_v6  ;;  %v8783_v39 = vcombine.low %v8761_v30, %v8768_v47  ;;  %v8775_v43 = vrot.slane %v8753_v3, %v10573_v16  ;;  %v5359_v59 = vrot.slane %v5345_v48, %v12055_v21  ;;  %v13037_v30 = vld [vmem:[%s13326_s8] ss:$0 sm:$0xff] }
 0x2c1   :  { %v8813_v9 = vrot.slane %v8806_v38, %v10573_v16  ;;  %v13028_v40 = vrot.slane %v9845_v2, %v10573_v16  ;;  %v7257_v37 = vadd.f32 %v12950_v60, %v12627_v19  ;;  %v7262_v22 = vadd.f32 %v12950_v60, %v12661_v4 }
 0x2c2   :  { %v8782_v44 = vrot.slane %v8754_v52, %v10573_v16  ;;  %v8791_v62 = vrot.slane %v8783_v39, %v10573_v16  ;;  %v5360_v35 = vcombine.high %v5352_v23, %v5352_v23  ;;  %v5361_v8 = vcombine.high %v5359_v59, %v5359_v59 }
 0x2c3   :  { %v5666_v49 = vcombine.low %v5344_v5, %v5352_v23  ;;  %v9121_v63 = vsel %vm9065_vm12, %v8813_v9, -inf  ;;  %v7288_v12 = vmax.f32 %v7257_v37, 0.0  ;;  %v7289_v29 = vmax.f32 %v7262_v22, 0.0 }
 0x2c4   :  { %v8784_v27 = vcombine.low %v8775_v43, %v8782_v44  ;;  %v5667_v6 = vcombine.low %v5360_v35, %v5359_v59  ;;  %v5689_v4 = vrot.slane %v5361_v8, %v12055_v21  ;;  %v9315_v46 = vadd.f32 %v12663_v55, %v13037_v30 }
 0x2c5   :  { %v5674_v19 = vrot.slane %v5666_v49, %v12055_v21  ;;  %v7946_v54 = vcombine.high %v7288_v12, %v7288_v12  ;;  %v7953_v58 = vrot.slane %v7288_v12, %v10573_v16  ;;  %v7995_v3 = vcombine.high %v7289_v29, %v7289_v29 }
 0x2c6   :  { %v8798_v14 = vrot.slane %v8784_v27, %v10573_v16  ;;  %v5681_v47 = vrot.slane %v5667_v6, %v12055_v21  ;;  %v5795_v38 = vsel %vm5717_vm11, %v5689_v4, -inf  ;;  %v8002_v2 = vrot.slane %v7289_v29, %v10573_v16 }
 0x2c7   :  { %v9307_v5 = vadd.f32 %v13037_v30, %v12673_v1  ;;  %v7960_v52 = vrot.slane %v7946_v54, %v10573_v16  ;;  %v7961_v39 = vcombine.high %v7953_v58, %v7953_v58  ;;  %v7969_v55 = vrot.slane %v7953_v58, %v10573_v16 }
 0x2c8   :  { %v8799_v48 = vcombine.low %v8791_v62, %v8798_v14  ;;  %v5682_v43 = vcombine.low %v5674_v19, %v5681_v47  ;;  %v8009_v9 = vrot.slane %v7995_v3, %v10573_v16  ;;  %v8010_v23 = vcombine.high %v8002_v2, %v8002_v2 }
 0x2c9   :  { %v8018_v59 = vrot.slane %v8002_v2, %v10573_v16  ;;  %v7962_v44 = vcombine.high %v7960_v52, %v7960_v52  ;;  %v7976_v37 = vrot.slane %v7960_v52, %v10573_v16  ;;  %v7983_v22 = vrot.slane %v7961_v39, %v10573_v16 }
 0x2ca   :  { %v9119_v21 = vsel %vm280_vm5, %v8799_v48, -inf  ;;  %v5793_v62 = vsel %vm280_vm5, %v5682_v43, -inf  ;;  %v8011_v35 = vcombine.high %v8009_v9, %v8009_v9  ;;  %v8025_v8 = vrot.slane %v8009_v9, %v10573_v16 }
 0x2cb   :  { %v9120_v1 = vmax.f32 %v13010_v45, %v9119_v21  ;;  %v5794_v49 = vmax.f32 %v5792_v42, %v5793_v62  ;;  %v7990_v27 = vrot.slane %v7962_v44, %v10573_v16  ;;  %v8815_v12 = vcombine.low %v7969_v55, %v7983_v22 }
 0x2cc   :  { %v9846_v29 = vcombine.high %v7969_v55, %v7983_v22  ;;  %v8032_v19 = vrot.slane %v8010_v23, %v10573_v16  ;;  %v8039_v4 = vrot.slane %v8011_v35, %v10573_v16  ;;  %v8041_v14 = vcombine.high %v8025_v8, %v8025_v8 }
 0x2cd   :  { %v13063_v6 = vmax.f32 %v9120_v1, %v9121_v63  ;;  %v13067_v54 = vmax.f32 %v5794_v49, %v5795_v38  ;;  %v8817_v45 = vcombine.low %v7976_v37, %v7990_v27  ;;  %v8831_v58 = vrot.slane %v8815_v12, %v10573_v16 }
 0x2ce   :  { %v9371_v3 = vmax.f32 %v9315_v46, 0.0  ;;  %v9847_v47 = vcombine.high %v7976_v37, %v7990_v27  ;;  %v8864_v2 = vcombine.low %v8018_v59, %v8032_v19  ;;  %v9848_v42 = vcombine.high %v8018_v59, %v8032_v19 }
 0x2cf   :  { %v8866_v48 = vcombine.low %v8025_v8, %v8039_v4  ;;  %v8838_v52 = vrot.slane %v9846_v29, %v10573_v16  ;;  %v8845_v63 = vrot.slane %v8817_v45, %v10573_v16  ;;  %v8846_v39 = vcombine.low %v13028_v40, %v8831_v58 }
 0x2d0   :  { %v8918_v55 = vrot.slane %v8041_v14, %v10573_v16  ;;  %v8873_v43 = vrot.slane %v9847_v47, %v10573_v16  ;;  %v8880_v38 = vrot.slane %v8864_v2, %v10573_v16  ;;  %v8887_v9 = vrot.slane %v9848_v42, %v10573_v16 }
 0x2d1   :  { %v8894_v46 = vrot.slane %v8866_v48, %v10573_v16  ;;  %v8847_v23 = vcombine.low %v8838_v52, %v8845_v63  ;;  %v9394_v21 = vsel %vm280_vm5, %v9371_v3, -inf  ;;  %v9369_v44 = vmax.f32 %v9307_v5, 0.0 }
 0x2d2   :  { %v8925_v59 = vrot.slane %v8918_v55, %v10573_v16  ;;  %v8854_v37 = vrot.slane %v8846_v39, %v10573_v16  ;;  %v8895_v22 = vcombine.low %v8873_v43, %v8880_v38  ;;  %v7265_v1 = vadd.f32 %v12950_v60, %v12684_v32 }
 0x2d3   :  { %v8896_v40 = vcombine.low %v8887_v9, %v8894_v46  ;;  %v8861_v62 = vrot.slane %v8847_v23, %v10573_v16  ;;  %v8043_v8 = vcombine.high %v8039_v4, %v8039_v4  ;;  %v9318_v49 = vadd.f32 %v12693_v7, %v13037_v30 }
 0x2d4   :  { %v13085_v35 = vsel %vm9065_vm12, %v8925_v59, -inf  ;;  %v8903_v27 = vrot.slane %v8895_v22, %v10573_v16  ;;  %v7290_v12 = vmax.f32 %v7265_v1, 0.0  ;;  %v9310_v29 = vadd.f32 %v13037_v30, %v12697_v15 }
 0x2d5   :  { %v8910_v5 = vrot.slane %v8896_v40, %v10573_v16  ;;  %v8862_v19 = vcombine.low %v8854_v37, %v8861_v62  ;;  %v9385_v32 = vsel %vm280_vm5, %v9369_v44, -inf  ;;  %v9372_v14 = vmax.f32 %v9318_v49, 0.0 }
 0x2d6   :  { %v7270_v45 = vadd.f32 %v12950_v60, %v12758_v50  ;;  %v8044_v4 = vcombine.high %v7290_v12, %v7290_v12  ;;  %v8051_v3 = vrot.slane %v7290_v12, %v10573_v16  ;;  %v9370_v7 = vmax.f32 %v9310_v29, 0.0 }
 0x2d7   :  { %v8911_v58 = vcombine.low %v8903_v27, %v8910_v5  ;;  %v13098_v47 = vsel %vm280_vm5, %v8862_v19, -inf  ;;  %v9395_v2 = vsel %vm280_vm5, %v9372_v14, -inf  ;;  %v13103_v15 = vadd.f32 %v12768_v28, %v13037_v30 }
 0x2d8   :  { %v7291_v42 = vmax.f32 %v7270_v45, 0.0  ;;  %v8058_v50 = vrot.slane %v8044_v4, %v10573_v16  ;;  %v8059_v60 = vcombine.high %v8051_v3, %v8051_v3  ;;  %v8067_v52 = vrot.slane %v8051_v3, %v10573_v16 }
 0x2d9   :  { %v13106_v48 = vsel %vm280_vm5, %v8911_v58, -inf  ;;  %v9396_v63 = vmax.f32 %v9394_v21, %v9395_v2  ;;  %v9386_v39 = vsel %vm280_vm5, %v9370_v7, -inf }
 0x2da   :  { %v8093_v55 = vcombine.high %v7291_v42, %v7291_v42  ;;  %v8100_v43 = vrot.slane %v7291_v42, %v10573_v16  ;;  %v8060_v38 = vcombine.high %v8058_v50, %v8058_v50  ;;  %v8074_v9 = vrot.slane %v8058_v50, %v10573_v16 }
 0x2db   :  { %v8081_v28 = vrot.slane %v8059_v60, %v10573_v16  ;;  %v8089_v46 = vcombine.high %v8067_v52, %v8067_v52  ;;  %v8926_v23 = vcombine.low %v8043_v8, %v8067_v52  ;;  %v9397_v59 = vrot.slane %v9396_v63, 4 }
 0x2dc   :  { %v9387_v44 = vmax.f32 %v9385_v32, %v9386_v39  ;;  %v8107_v37 = vrot.slane %v8093_v55, %v10573_v16  ;;  %v8088_v22 = vrot.slane %v8060_v38, %v10573_v16  ;;  %v8090_v40 = vcombine.high %v8074_v9, %v8074_v9 }
 0x2dd   :  { %v8091_v21 = vcombine.high %v8081_v28, %v8081_v28  ;;  %v8927_v1 = vcombine.low %v8081_v28, %v8089_v46  ;;  %v8936_v62 = vrot.slane %v8926_v23, %v10573_v16  ;;  %v9398_v49 = vmax.f32 %v9396_v63, %v9397_v59 }
 0x2de   :  { %v9388_v27 = vrot.slane %v9387_v44, 4  ;;  %v8108_v5 = vcombine.high %v8100_v43, %v8100_v43  ;;  %v8929_v29 = vcombine.low %v8088_v22, %v8090_v40  ;;  %v8092_v14 = vcombine.high %v8088_v22, %v8088_v22 }
 0x2df   :  { %v8928_v12 = vcombine.low %v8091_v21, %v8074_v9  ;;  %v8943_v19 = vrot.slane %v8927_v1, %v10573_v16  ;;  %v9399_v8 = vrot.slane %v9398_v49, 2  ;;  %v8109_v32 = vcombine.high %v8107_v37, %v8107_v37 }
 0x2e0   :  { %v9389_v45 = vmax.f32 %v9387_v44, %v9388_v27  ;;  %v8116_v58 = vrot.slane %v8100_v43, %v10573_v16  ;;  %v8957_v3 = vrot.slane %v8929_v29, %v10573_v16  ;;  %v8123_v2 = vrot.slane %v8107_v37, %v10573_v16 }
 0x2e1   :  { %v8950_v4 = vrot.slane %v8928_v12, %v10573_v16  ;;  %v8958_v7 = vcombine.low %v8936_v62, %v8943_v19  ;;  %v9400_v42 = vmax.f32 %v9398_v49, %v9399_v8  ;;  %v8130_v60 = vrot.slane %v8108_v5, %v10573_v16 }
 0x2e2   :  { %v9390_v50 = vrot.slane %v9389_v45, 2  ;;  %v8137_v52 = vrot.slane %v8109_v32, %v10573_v16  ;;  %v8138_v55 = vcombine.high %v8116_v58, %v8116_v58  ;;  %v8139_v38 = vcombine.high %v8123_v2, %v8123_v2 }
 0x2e3   :  { %v8959_v63 = vcombine.low %v8950_v4, %v8957_v3  ;;  %v8966_v39 = vrot.slane %v8958_v7, %v10573_v16  ;;  %v9401_v43 = vrot.slane %v9400_v42, 1  ;;  %v8140_v28 = vcombine.high %v8130_v60, %v8130_v60 }
 0x2e4   :  { %v9391_v9 = vmax.f32 %v9389_v45, %v9390_v50  ;;  %v8141_v46 = vcombine.high %v8137_v52, %v8137_v52  ;;  %v8975_v59 = vcombine.low %v8092_v14, %v8116_v58  ;;  %v8976_v44 = vcombine.low %v8130_v60, %v8138_v55 }
 0x2e5   :  { %v8973_v23 = vrot.slane %v8959_v63, %v10573_v16  ;;  %v8978_v37 = vcombine.low %v8137_v52, %v8139_v38  ;;  %v9402_v22 = vmax.f32 %v9400_v42, %v9401_v43  ;;  %v8977_v21 = vcombine.low %v8140_v28, %v8123_v2 }
 0x2e6   :  { %v9392_v40 = vrot.slane %v9391_v9, 1  ;;  %v13127_v1 = vrot.slane %v8141_v46, %v10573_v16  ;;  %v8985_v49 = vrot.slane %v8975_v59, %v10573_v16  ;;  %v8992_v27 = vrot.slane %v8976_v44, %v10573_v16 }
 0x2e7   :  { %v13129_v62 = vcombine.low %v8966_v39, %v8973_v23  ;;  %v9006_v5 = vrot.slane %v8978_v37, %v10573_v16  ;;  %v8999_v29 = vrot.slane %v8977_v21, %v10573_v16  ;;  %v9375_v14 = vmax.f32 %v13103_v15, 0.0 }
 0x2e8   :  { %v9393_v12 = vmax.f32 %v9391_v9, %v9392_v40  ;;  %v9037_v19 = vrot.slane %v13127_v1, %v10573_v16  ;;  %v9007_v8 = vcombine.low %v8985_v49, %v8992_v27  ;;  %v9323_v45 = vadd.f32 %v13037_v30, %v12774_v53 }
 0x2e9   :  { %v9334_v32 = vadd.f32 %v12779_v10, %v13037_v30  ;;  %v9326_v58 = vadd.f32 %v13037_v30, %v12808_v17  ;;  %v9008_v3 = vcombine.low %v8999_v29, %v9006_v5  ;;  %v9412_v7 = vsel %vm280_vm5, %v9375_v14, -inf }
 0x2ea   :  { %v13145_v4 = vsel %vm9465_vm13, %v9402_v22, %v9393_v12  ;;  %v9347_v2 = vadd.f32 %v12812_v20, %v13037_v30  ;;  %v9015_v15 = vrot.slane %v9007_v8, %v10573_v16  ;;  %v9373_v42 = vmax.f32 %v9323_v45, 0.0  ;;  %v13446_v45 = vld [vmem:[#allocation20_spill] sm:$0xff] }
 0x2eb   :  { %v9376_v50 = vmax.f32 %v9334_v32, 0.0  ;;  %v9374_v53 = vmax.f32 %v9326_v58, 0.0  ;;  %v9022_v60 = vrot.slane %v9008_v3, %v10573_v16  ;;  %v9339_v17 = vadd.f32 %v13037_v30, %v12819_v26 }
 0x2ec   :  { %v9379_v10 = vmax.f32 %v9347_v2, 0.0  ;;  %v9350_v52 = vadd.f32 %v12825_v31, %v13037_v30  ;;  %v9403_v63 = vsel %vm280_vm5, %v9373_v42, -inf  ;;  %v9342_v55 = vadd.f32 %v13037_v30, %v12834_v41 }
 0x2ed   :  { %v9413_v39 = vsel %vm280_vm5, %v9376_v50, -inf  ;;  %v9404_v20 = vsel %vm280_vm5, %v9374_v53, -inf  ;;  %v13161_v38 = vcombine.low %v9015_v15, %v9022_v60  ;;  %v9377_v46 = vmax.f32 %v9339_v17, 0.0 }
 0x2ee   :  { %v9414_v43 = vmax.f32 %v9412_v7, %v9413_v39  ;;  %v9405_v9 = vmax.f32 %v9403_v63, %v9404_v20  ;;  %v9430_v28 = vsel %vm280_vm5, %v9379_v10, -inf  ;;  %v9380_v26 = vmax.f32 %v9350_v52, 0.0 }
 0x2ef   :  { %v9378_v23 = vmax.f32 %v9342_v55, 0.0  ;;  %v9363_v31 = vadd.f32 %v12839_v56, %v13037_v30  ;;  %v9355_v37 = vadd.f32 %v13037_v30, %v12847_v24  ;;  %v9366_v41 = vadd.f32 %v12851_v33, %v13037_v30 }
 0x2f0   :  { %v9415_v59 = vrot.slane %v9414_v43, 4  ;;  %v9406_v44 = vrot.slane %v9405_v9, 4  ;;  %v9421_v22 = vsel %vm280_vm5, %v9377_v46, -inf  ;;  %v9431_v40 = vsel %vm280_vm5, %v9380_v26, -inf  ;;  %v10115_v26 = vld [vmem:[%s13325_s9 + $0x8] sm:$0xff]  }
 0x2f1   :  { %v9422_v21 = vsel %vm280_vm5, %v9378_v23, -inf  ;;  %v9383_v49 = vmax.f32 %v9363_v31, 0.0  ;;  %v9432_v12 = vmax.f32 %v9430_v28, %v9431_v40  ;;  %v9381_v14 = vmax.f32 %v9355_v37, 0.0  ;;  %10067 = vmatpush3.bf16.msra.mxu1 %v10115_v26 }
 0x2f2   :  { %v9416_v27 = vmax.f32 %v9414_v43, %v9415_v59  ;;  %v9407_v5 = vmax.f32 %v9405_v9, %v9406_v44  ;;  %v9423_v29 = vmax.f32 %v9421_v22, %v9422_v21  ;;  %v9384_v8 = vmax.f32 %v9366_v41, 0.0  ;;  %10068 = vmatprep.subr.bf16.mxu1 %v13388_v0 }
 0x2f3   :  { %v9448_v56 = vsel %vm280_vm5, %v9383_v49, -inf  ;;  %v5757_v24 = vrot.slane %v13446_v45, 1  ;;  %v9433_v33 = vrot.slane %v9432_v12, 4  ;;  %v13176_v7 = vsel %vm280_vm5, %v9381_v14, -inf  ;;  %v13448_v14 = vld [vmem:[#allocation18_spill] sm:$0xff] }
 0x2f4   :  { %v9417_v32 = vrot.slane %v9416_v27, 2  ;;  %v9408_v58 = vrot.slane %v9407_v5, 2  ;;  %v9424_v3 = vrot.slane %v9423_v29, 4  ;;  %v9449_v2 = vsel %vm280_vm5, %v9384_v8, -inf }
 0x2f5   :  { %v5758_v15 = vmax.f32 %v13446_v45, %v5757_v24  ;;  %v5769_v42 = vmax.f32 %v12865_v57, %v5768_v34  ;;  %v9434_v60 = vmax.f32 %v9432_v12, %v9433_v33  ;;  %v9450_v17 = vmax.f32 %v9448_v56, %v9449_v2  ;;  %v13447_v56 = vld [vmem:[#allocation8_spill] sm:$0xff]  ;;  %v10117_v45 = vld [vmem:[%s13325_s9 + $0x18] sm:$0xff]   ;;  %v13449_v24 = vld [vmem:[#allocation19_spill] sm:$0xff] }
 0x2f6   :  { %v9418_v50 = vmax.f32 %v9416_v27, %v9417_v32  ;;  %v9409_v53 = vmax.f32 %v9407_v5, %v9408_v58  ;;  %v9425_v10 = vmax.f32 %v9423_v29, %v9424_v3  ;;  %v5778_v52 = vmax.f32 %v12966_v25, %v5777_v36  ;;  %v13450_v33 = vld [vmem:[#allocation21_spill] sm:$0xff] }
 0x2f7   :  { %v5788_v63 = vrot.slane %v13019_v61, 2  ;;  %v5797_v39 = vrot.slane %v13067_v54, 4  ;;  %v9435_v43 = vrot.slane %v9434_v60, 2  ;;  %v9451_v28 = vrot.slane %v9450_v17, 4 }
 0x2f8   :  { %v9419_v20 = vrot.slane %v9418_v50, 1  ;;  %v9410_v55 = vrot.slane %v9409_v53, 1  ;;  %v9426_v9 = vrot.slane %v9425_v10, 2  ;;  %v5779_v46 = vrot.slane %v5778_v52, 1 }
 0x2f9   :  { %v5789_v57 = vmax.f32 %v13019_v61, %v5788_v63  ;;  %v5798_v34 = vmax.f32 %v13067_v54, %v5797_v39  ;;  %v9436_v36 = vmax.f32 %v9434_v60, %v9435_v43  ;;  %v9452_v59 = vmax.f32 %v9450_v17, %v9451_v28  ;;  %v10116_v61 = vld [vmem:[%s13325_s9 + $0x10] sm:$0xff]  }
 0x2fa   :  { %v13193_v23 = vmax.f32 %v9418_v50, %v9419_v20  ;;  %v13195_v25 = vmax.f32 %v9409_v53, %v9410_v55  ;;  %v9427_v31 = vmax.f32 %v9425_v10, %v9426_v9  ;;  %v5780_v44 = vmax.f32 %v5778_v52, %v5779_v46  ;;  %10069 = vmatpush3.bf16.msra.mxu1 %v10116_v61 }
 0x2fb   :  { %v5790_v37 = vrot.slane %v5789_v57, 1  ;;  %v5799_v41 = vrot.slane %v5798_v34, 2  ;;  %v9437_v54 = vrot.slane %v9436_v36, 1  ;;  %v9453_v40 = vrot.slane %v9452_v59, 2  ;;  %10070 = vmatprep.subr.bf16.mxu1 %v13388_v0 }
 0x2fc   :  { %v9428_v22 = vrot.slane %v9427_v31, 1  ;;  %v9488_v8 = vsel %vm9465_vm13, %v13448_v14, %v13447_v56  ;;  %v9358_v58 = vadd.f32 %v13037_v30, %v12863_v13  ;;  %v13451_v3 = vrot.slane %v13450_v33, 1 }
 0x2fd   :  { %v5791_v21 = vmax.f32 %v5789_v57, %v5790_v37  ;;  %v5800_v49 = vmax.f32 %v5798_v34, %v5799_v41  ;;  %v13201_v27 = vmax.f32 %v9436_v36, %v9437_v54  ;;  %v9454_v12 = vmax.f32 %v9452_v59, %v9453_v40 }
 0x2fe   :  { %v13203_v5 = vmax.f32 %v9427_v31, %v9428_v22  ;;  %v9489_v32 = vsel %vm9467_vm14, %v13449_v24, %v9488_v8  ;;  %v9084_v2 = vmax.f32 %v13450_v33, %v13451_v3  ;;  %v9094_v50 = vrot.slane %v12918_v11, 1  ;;  %10071 = vmatpush3.bf16.msra.mxu1 %v10117_v45  ;;  %v13452_v31 = vld [vmem:[#allocation2_spill] sm:$0xff]  ;;  %v13453_v8 = vld [vmem:[#allocation13_spill] sm:$0xff] }
 0x2ff   :  { %v5801_v29 = vrot.slane %v5800_v49, 1  ;;  %v9490_v60 = vsel %vm9469_vm15, %v5758_v15, %v9489_v32  ;;  %v9103_v10 = vrot.slane %v12932_v51, 2  ;;  %v9114_v17 = vrot.slane %v13004_v18, 2  ;;  %v13455_v32 = vld [vmem:[#allocation14_spill] sm:$0xff] }
 0x300   :  { %v9491_v52 = vsel %vm9471_vm0, %v5769_v42, %v9490_v60  ;;  %v9382_v63 = vmax.f32 %v9358_v58, 0.0  ;;  %v9095_v13 = vmax.f32 %v12918_v11, %v9094_v50  ;;  %v9123_v30 = vrot.slane %v13063_v6, 4 }
 0x301   :  { %v5802_v53 = vmax.f32 %v5800_v49, %v5801_v29  ;;  %v9492_v39 = vsel %vm9473_vm1, %v5780_v44, %v9491_v52  ;;  %v9104_v20 = vmax.f32 %v12932_v51, %v9103_v10  ;;  %v9115_v0 = vmax.f32 %v13004_v18, %v9114_v17  ;;  %v13457_v10 = vld [vmem:[#allocation7_spill] sm:$0xff] }
 0x302   :  { %v9131_v15 = vmax.f32 %v13098_v47, %v13106_v48  ;;  %v9493_v55 = vsel %vm9475_vm2, %v5791_v21, %v9492_v39  ;;  %v9440_v43 = vsel %vm280_vm5, %v9382_v63, -inf  ;;  %v9124_v42 = vmax.f32 %v13063_v6, %v9123_v30  ;;  %v13458_v30 = vld [vmem:[#allocation5_spill] sm:$0xff]  ;;  %v13460_v39 = vld [vmem:[#allocation12_spill] sm:$0xff] }
 0x303   :  { %v9140_v11 = vsel %vm280_vm5, %v13129_v62, -inf  ;;  %v9494_v9 = vsel %vm9477_vm3, %v5802_v53, %v9493_v55  ;;  %v9441_v28 = vmax.f32 %v13176_v7, %v9440_v43  ;;  %v9105_v51 = vrot.slane %v9104_v20, 1 }
 0x304   :  { %v9116_v46 = vrot.slane %v9115_v0, 1  ;;  %9495 = vrot.lane.b32.xlu0 %v9494_v9, %s10132_s12  ;;  %v9125_v18 = vrot.slane %v9124_v42, 2  ;;  %v9133_v47 = vmax.f32 %v9131_v15, %v13085_v35  ;;  %v9141_v48 = vsel %vm280_vm5, %v13161_v38, -inf }
 0x305   :  { %v9143_v6 = vsel %vm9065_vm12, %v9037_v19, -inf  ;;  %v9442_v62 = vrot.slane %v9441_v28, 4  ;;  %v9106_v57 = vmax.f32 %v9104_v20, %v9105_v51  ;;  %v9142_v26 = vmax.f32 %v9140_v11, %v9141_v48 }
 0x306   :  { %v9117_v34 = vmax.f32 %v9115_v0, %v9116_v46  ;;  %v9126_v7 = vmax.f32 %v9124_v42, %v9125_v18  ;;  %v9134_v36 = vrot.slane %v9133_v47, 4  ;;  %v9506_v59 = vsel %vm9465_vm13, %v9084_v2, %v13452_v31  ;;  %v13456_v2 = vld [vmem:[#allocation3_spill] sm:$0xff]  ;;  %v13462_v42 = vld [vmem:[#allocation6_spill] sm:$0xff]  ;;  %v13464_v18 = vld [vmem:[#allocation9_spill] sm:$0xff] }
 0x307   :  { %v9455_v44 = vrot.slane %v9454_v12, 1  ;;  %v9443_v37 = vmax.f32 %v9441_v28, %v9442_v62  ;;  %v9144_v35 = vmax.f32 %v9142_v26, %v9143_v6  ;;  %v9507_v41 = vsel %vm9467_vm14, %v9095_v13, %v9506_v59  ;;  %v13467_v26 = vld [vmem:[#allocation10_spill] sm:$0xff] }
 0x308   :  { %v9525_v1 = vsel %vm9467_vm14, %v13195_v25, %v13145_v4  ;;  %v9127_v38 = vrot.slane %v9126_v7, 1  ;;  %v9135_v19 = vmax.f32 %v9133_v47, %v9134_v36  ;;  %v9508_v61 = vsel %vm9469_vm15, %v9106_v57, %v9507_v41  ;;  %v13465_v47 = vld [vmem:[#allocation11_spill] sm:$0xff] }
 0x309   :  { %v9456_v54 = vmax.f32 %v9454_v12, %v9455_v44  ;;  %v9444_v22 = vrot.slane %v9443_v37, 2  ;;  %v9145_v40 = vrot.slane %v9144_v35, 4  ;;  %v9509_v21 = vsel %vm9471_vm0, %v9117_v34, %v9508_v61 }
 0x30a   :  { %v9526_v49 = vsel %vm9469_vm15, %v13193_v23, %v9525_v1  ;;  %v9128_v29 = vmax.f32 %v9126_v7, %v9127_v38  ;;  %v9136_v56 = vrot.slane %v9135_v19, 2  ;;  %v13454_v45 = vrot.slane %v13453_v8, 2  ;;  %v13468_v38 = vld [vmem:[#allocation16_spill] sm:$0xff] }
 0x30b   :  { %v9527_v14 = vsel %vm9471_vm0, %v13203_v5, %v9526_v49  ;;  %v9445_v25 = vmax.f32 %v9443_v37, %v9444_v22  ;;  %v9146_v24 = vmax.f32 %v9144_v35, %v9145_v40  ;;  %v3738_v58 = vrot.slane %v13455_v32, 1  ;;  %v13469_v22 = vld [vmem:[#allocation17_spill] sm:$0xff] }
 0x30c   :  { %v3726_v4 = vmax.f32 %v13453_v8, %v13454_v45  ;;  %v9528_v12 = vsel %vm9473_vm1, %v13201_v27, %v9527_v14  ;;  %v9137_v33 = vmax.f32 %v9135_v19, %v9136_v56  ;;  %v9510_v3 = vsel %vm9473_vm1, %v9128_v29, %v9509_v21  ;;  %v13459_v27 = vld [vmem:[#allocation4_spill] sm:$0xff]  ;;  %v13470_v8 = vld [vmem:[#allocation15_spill] sm:$0xff] }
 0x30d   :  { %v3747_v50 = vrot.slane %v13456_v2, 2  ;;  %v9446_v53 = vrot.slane %v9445_v25, 1  ;;  %v9147_v60 = vrot.slane %v9146_v24, 2  ;;  %v3739_v5 = vmax.f32 %v13455_v32, %v3738_v58 }
 0x30e   :  { %v3727_v23 = vrot.slane %v3726_v4, 1  ;;  %v3758_v17 = vrot.slane %v13457_v10, 2  ;;  %v9138_v52 = vrot.slane %v9137_v33, 1  ;;  %v13461_v20 = vmax.f32 %v13459_v27, %v13460_v39 }
 0x30f   :  { %v3748_v13 = vmax.f32 %v13456_v2, %v3747_v50  ;;  %v9148_v15 = vmax.f32 %v9146_v24, %v9147_v60  ;;  %v9447_v55 = vmax.f32 %v9445_v25, %v9446_v53  ;;  %v13463_v11 = vrot.slane %v13462_v42, %v10573_v16 }
 0x310   :  { %v3728_v63 = vmax.f32 %v3726_v4, %v3727_v23  ;;  %v3766_v0 = vmax.f32 %v13461_v20, %v13458_v30  ;;  %v3759_v43 = vmax.f32 %v13457_v10, %v3758_v17  ;;  %v9139_v28 = vmax.f32 %v9137_v33, %v9138_v52 }
 0x311   :  { %v3776_v9 = vsel %vm3720_vm10, %v13463_v11, -inf  ;;  %v3749_v51 = vrot.slane %v3748_v13, 1  ;;  %v13466_v48 = vmax.f32 %v13464_v18, %v13465_v47  ;;  %v9149_v62 = vrot.slane %v9148_v15, 1 }
 0x312   :  { %v3767_v46 = vrot.slane %v3766_v0, 4  ;;  %v9529_v57 = vsel %vm9475_vm2, %v9447_v55, %v9528_v12  ;;  %v3760_v34 = vrot.slane %v3759_v43, 1  ;;  %v3789_v7 = vrot.slane %v13467_v26, 4 }
 0x313   :  { %v3777_v6 = vmax.f32 %v13466_v48, %v3776_v9  ;;  %v9511_v36 = vsel %vm9475_vm2, %v9139_v28, %v9510_v3  ;;  %v9530_v31 = vsel %vm9477_vm3, %v9456_v54, %v9529_v57  ;;  %v3750_v59 = vmax.f32 %v3748_v13, %v3749_v51  ;;  %v9863_v9 = vld [vmem:[%s13327_s10] ss:$0 sm:$0xff] }
 0x314   :  { %v3768_v44 = vmax.f32 %v3766_v0, %v3767_v46  ;;  %v9150_v37 = vmax.f32 %v9148_v15, %v9149_v62  ;;  %9531 = vrot.lane.b32.xlu0 %v9530_v31, %s10134_s1  ;;  %v3761_v35 = vmax.f32 %v3759_v43, %v3760_v34  ;;  %v3790_v1 = vmax.f32 %v13467_v26, %v3789_v7 }
 0x315   :  { %v3778_v41 = vrot.slane %v3777_v6, 4  ;;  %v3795_v19 = vsel %vm280_vm5, %v13468_v38, -inf  ;;  %v3796_v40 = vsel %vm280_vm5, %v13469_v22, -inf  ;;  %v9466_v21 = vsel %vm9465_vm13, %v3739_v5, %v3728_v63 }
 0x316   :  { %v3769_v61 = vrot.slane %v3768_v44, 2  ;;  %v9512_v54 = vsel %vm9477_vm3, %v9150_v37, %v9511_v36  ;;  %v3791_v29 = vrot.slane %v3790_v1, 2  ;;  %v3797_v56 = vmax.f32 %v3795_v19, %v3796_v40 }
 0x317   :  { %v3779_v49 = vmax.f32 %v3777_v6, %v3778_v41  ;;  %9513 = vrot.lane.b32.xlu1 %v9512_v54, %s10133_s15  ;;  %v13471_v45 = vrot.slane %v13470_v8, %v10573_v16  ;;  %v9468_v25 = vsel %vm9467_vm14, %v3750_v59, %v9466_v21 }
 0x318   :  { %v3770_v14 = vmax.f32 %v3768_v44, %v3769_v61  ;;  %v3792_v12 = vmax.f32 %v3790_v1, %v3791_v29  ;;  %v9470_v58 = vsel %vm9469_vm15, %v3761_v35, %v9468_v25 }
 0x319   :  { %v3798_v4 = vsel %vm3720_vm10, %v13471_v45, -inf  ;;  %v3780_v24 = vrot.slane %v3779_v49, 2 }
 0x31a   :  { %v3799_v32 = vmax.f32 %v3797_v56, %v3798_v4  ;;  %v3771_v33 = vrot.slane %v3770_v14, 1  ;;  %v3793_v23 = vrot.slane %v3792_v12, 1 }
 0x31b   :  { %v3781_v3 = vmax.f32 %v3779_v49, %v3780_v24 }
 0x31c   :  { %v3800_v2 = vrot.slane %v3799_v32, 4  ;;  %v3772_v50 = vmax.f32 %v3770_v14, %v3771_v33  ;;  %v3794_v5 = vmax.f32 %v3792_v12, %v3793_v23 }
 0x31d   :  { %v3782_v53 = vrot.slane %v3781_v3, 1 }
 0x31e   :  { %v3801_v60 = vmax.f32 %v3799_v32, %v3800_v2  ;;  %v9472_v10 = vsel %vm9471_vm0, %v3772_v50, %v9470_v58 }
 0x31f   :  { %v3783_v16 = vmax.f32 %v3781_v3, %v3782_v53 }
 0x320   :  { %v3802_v17 = vrot.slane %v3801_v60, 2 }
 0x321   :  { %v9474_v63 = vsel %vm9473_vm1, %v3783_v16, %v9472_v10 }
 0x322   :  { %v3803_v52 = vmax.f32 %v3801_v60, %v3802_v17  ;;  %v9476_v13 = vsel %vm9475_vm2, %v3794_v5, %v9474_v63 }
 0x324   :  { %v3804_v30 = vrot.slane %v3803_v52, 1 }
 0x326   :  { %v3805_v27 = vmax.f32 %v3803_v52, %v3804_v30 }
 0x328   :  { %v9478_v39 = vsel %vm9477_vm3, %v3805_v27, %v9476_v13 }
 0x376   :  { %v9496_v20 = vpop.permute.xlu0 %9495 }
 0x377   :  { %v9534_v15 = vsel %vm280_vm5, %v9478_v39, %v9496_v20 }
 0x386   :  { %v9532_v0 = vpop.permute.xlu0 %9531 }
 0x389   :  { %v9514_v55 = vpop.permute.xlu1 %9513 }
 0x38a   :  { %v9535_v43 = vsel %vm1613_vm6, %v9534_v15, %v9514_v55 }
 0x38b   :  { %v9536_v42 = vsel %vm4887_vm7, %v9535_v43, %v9532_v0 }
 0x38c   :  { %v9537_v11 = vpack.c.bf16 %v9536_v42, %v9536_v42 }
 0x38e   :  { %10073 = vmatmul.mubr.msk.bf16.vlgmr.msra.gmra.mrb[52].mxu1 %vm7143_vm8, %v9537_v11 }
 0x461   :  { %v9614_v28 = vpop.f32.mrb[52].mxu1 }
 0x462   :  { %v9615_v51 = vadd.f32 %v9863_v9, %v9614_v28  ;;  %v10074_v46 = vpop.f32.mrb[53].mxu1 }
 0x463   :  { %v9617_v18 = vpop.f32.mrb[54].mxu1 }
 0x464   :  { %9620 = vxpose.xlu1.b32.start.end [1/1] (short) (narrow) %v9615_v51, 16  ;;  %v10075_v47 = vpop.f32.mrb[55].mxu1 }
 0x4e4   :  { %v9636_v48 = vpop.trf.xlu1 }
 0x4e5   :  { %v9871_v6 = vpack.c.bf16 %v9636_v48, %v9636_v48 }
 0x4e7   :  { %9661 = vst.msk [vmem:[%s13328_s11] sm:$0xf] %vm9660_vm4, %v9871_v6 }
 0x4e8   :  { %v9637_v62 = vpop.trf.xlu1 }
 0x4e9   :  { %v9872_v57 = vpack.c.bf16 %v9637_v62, %v9637_v62 }
 0x4eb   :  { %9662 = vst.msk [vmem:[%s13328_s11 + $0x4] sm:$0xf] %vm9660_vm4, %v9872_v57 }

</bundles_post_ra>
